<compile_context>
chip_gen: v7x
topology: tpu7x:2x2x1
jax: 0.10.0
libtpu: 0.0.40
codegen_flags: <defaults>
</compile_context>

<pallas_src>
from functools import partial

import jax
import jax.numpy as jnp
from jax import lax
from jax.experimental import pallas as pl
from jax.experimental.pallas import tpu as pltpu

# ----------------------------- model dimensions ------------------------------
B  = 2            # batch
C  = 4            # RGBA channels (mode='combined')
H = W = D = 8     # voxel grid
N  = H * W * D    # voxels per sample = 512  (lane axis, multiple of 128)
TE = 32           # sinusoidal time-embedding width
CM = 128          # hidden channels
L  = 8            # encoder_hidden_states sequence length
DC = 32           # cross-attention context dim
NUM_TIMESTEPS = 1000

_F32 = jnp.float32
_BF16 = jnp.bfloat16


# --------------------------- dot_general helpers -----------------------------
def _dot_tA(w, x):
    """(K, M) . (K, N) -> (M, N): contract dim0 of both (no explicit transpose)."""
    return lax.dot_general(w, x, (((0,), (0,)), ((), ())), preferred_element_type=_F32)


def _dot_nn(a, b):
    """(M, K) . (K, N) -> (M, N): plain matmul."""
    return lax.dot_general(a, b, (((1,), (0,)), ((), ())), preferred_element_type=_F32)


# ============================ fused Pallas kernel =============================
def _make_kernel(bpg):
    """bpg = batches folded into one grid step (1 -> per-batch grid, B -> collapsed grid)."""

    def kernel(sa_ref, sb_ref, isa_ref,              # (bpg*C, 1) scheduler columns
               clean_ref, noise_ref,                 # (bpg*C, N) activations
               bcpe_ref,                             # (bpg*CM, 1) conv_in bias + hoisted temb
               wc_ref,                               # (bpg*C, bpg*CM)  bf16 (block-diag)
               a_ref, bv_ref,                        # (bpg*L, bpg*CM)  bf16 folded attention
               wout_ref, bout_ref,                   # (bpg*CM, bpg*C) bf16, (bpg*C, 1) f32
               noisy_ref, pred_ref, x0_ref):         # outputs, each (bpg*C, N) f32
        # -------- scheduler.add_noise prologue --------------------------------
        x_t = sa_ref[...] * clean_ref[...] + sb_ref[...] * noise_ref[...]
        noisy_ref[...] = x_t

        # -------- 1x1x1 conv_in + temb injection + SiLU (EUP reciprocal) ------
        h = _dot_tA(wc_ref[...], x_t.astype(_BF16)) + bcpe_ref[...]        # (bpg*CM, N) f32
        h = h * pl.reciprocal(1.0 + jnp.exp(-h), approx=True)              # SiLU

        # -------- folded cross-attention over encoder_hidden_states -----------
        # s = A @ h  with A = (ehs@wk)@wq.T / sqrt(CM) precomputed in the wrapper.
        h_bf = h.astype(_BF16)                                             # single bf16 copy
        s = _dot_nn(a_ref[...], h_bf)                                      # (bpg*L, N) f32
        parts = []
        for b in range(bpg):                                               # static unroll
            s_b = s[b * L:(b + 1) * L, :]                                  # tile-aligned slice
            s_b = s_b - jnp.max(s_b, axis=0, keepdims=True)
            p_b = jnp.exp(s_b)
            parts.append(p_b * pl.reciprocal(jnp.sum(p_b, axis=0, keepdims=True),
                                             approx=True))
        p_att = parts[0] if bpg == 1 else jnp.concatenate(parts, axis=0)   # (bpg*L, N) f32
        # out = Bv.T @ p_att  with Bv = (ehs@wv)@wo precomputed in the wrapper.
        h = h + _dot_tA(bv_ref[...], p_att.astype(_BF16))                  # (bpg*CM, N)

        # -------- 1x1x1 conv_out: predicted noise ------------------------------
        eps = _dot_tA(wout_ref[...], h.astype(_BF16)) + bout_ref[...]      # (bpg*C, N) f32
        pred_ref[...] = eps

        # -------- predict_original_sample epilogue -----------------------------
        x0_ref[...] = (x_t - sb_ref[...] * eps) * isa_ref[...]

    return kernel


# ============================ wrapper =========================================
def _fold_block_diag(wb, bpg):
    """(B, r, c) per-batch blocks -> (G, bpg*r, bpg*c) block-diagonal per grid step."""
    Bt, r, c = wb.shape
    g = Bt // bpg
    eye = jnp.eye(bpg, dtype=wb.dtype)
    out = jnp.einsum("gbrc,bk->gbrkc", wb.reshape(g, bpg, r, c), eye)
    return out.reshape(g, bpg * r, bpg * c)


@partial(jax.jit, static_argnames=("grid_steps",))
def fused_diffusion_step(clean_bcn, noise_bcn, sqrt_a, sqrt_b, temb, ehs, params, *,
                         grid_steps):
    """clean/noise: [B,C,N]; sqrt_a/sqrt_b: [B]; temb: [B,TE]; ehs: [B,L,DC]."""
    Bn, Cc, Nn = clean_bcn.shape
    G = grid_steps
    bpg = Bn // G
    assert bpg * G == Bn

    # ---- hoisted XLA precompute (independent of x_t) --------------------------
    # time-embedding MLP -> folded into the conv_in bias column
    e = temb @ params["w1"] + params["b1"]
    e = e * jax.nn.sigmoid(e)
    e = e @ params["w2"] + params["b2"]                                   # (B, CM)
    bcpe = params["bc"][None, :] + e                                      # (B, CM)

    # fold the big wq / wo projections onto the tiny L=8 context
    scale = 1.0 / (CM ** 0.5)
    kproj = jnp.einsum("bld,dm->blm", ehs, params["wk"])                  # (B, L, CM)
    vproj = jnp.einsum("bld,dm->blm", ehs, params["wv"])                  # (B, L, CM)
    A  = jnp.einsum("blm,km->blk", kproj, params["wq"]) * scale           # (B, L, CM)
    Bv = jnp.einsum("blm,mo->blo", vproj, params["wo"])                   # (B, L, CM)

    # ---- pack per-grid-step operands ------------------------------------------
    def cols(v_b):                                    # (B, r) -> (G, bpg*r, 1)
        return v_b.reshape(G, bpg * v_b.shape[1], 1)

    sa_col   = cols(jnp.broadcast_to(sqrt_a[:, None], (Bn, Cc)))
    sb_col   = cols(jnp.broadcast_to(sqrt_b[:, None], (Bn, Cc)))
    isa_col  = cols(jnp.broadcast_to((1.0 / sqrt_a)[:, None], (Bn, Cc)))  # no in-kernel divide
    bcpe_col = cols(bcpe)
    bout_col = cols(jnp.broadcast_to(params["bout"][None, :], (Bn, Cc)))

    wc_blk   = _fold_block_diag(
        jnp.broadcast_to(params["wc"].astype(_BF16)[None], (Bn, Cc, CM)), bpg)
    wout_blk = _fold_block_diag(
        jnp.broadcast_to(params["wout"].astype(_BF16)[None], (Bn, CM, Cc)), bpg)
    a_blk  = _fold_block_diag(A.astype(_BF16), bpg)                       # scale applied pre-cast
    bv_blk = _fold_block_diag(Bv.astype(_BF16), bpg)

    clean_g = clean_bcn.reshape(G, bpg * Cc, Nn)
    noise_g = noise_bcn.reshape(G, bpg * Cc, Nn)

    # ---- specs ----------------------------------------------------------------
    def blk(r, c):
        return pl.BlockSpec((None, r, c), lambda g: (g, 0, 0))

    in_specs = [
        blk(bpg * Cc, 1), blk(bpg * Cc, 1), blk(bpg * Cc, 1),             # sa / sb / 1/sa
        blk(bpg * Cc, Nn), blk(bpg * Cc, Nn),                             # clean / noise
        blk(bpg * CM, 1),                                                 # conv_in bias + temb
        blk(bpg * Cc, bpg * CM),                                          # wc (block-diag)
        blk(bpg * L, bpg * CM), blk(bpg * L, bpg * CM),                   # A / Bv
        blk(bpg * CM, bpg * Cc), blk(bpg * Cc, 1),                        # wout / bout
    ]
    out_spec = blk(bpg * Cc, Nn)
    out_shape = tuple(jax.ShapeDtypeStruct((G, bpg * Cc, Nn), _F32) for _ in range(3))

    # ---- advisory cost estimate (kernel is launch/overhead bound at this size) -
    macs = G * Nn * ((bpg * Cc) * (bpg * CM)            # conv_in
                     + 2 * (bpg * L) * (bpg * CM)       # scores + attn-out
                     + (bpg * CM) * (bpg * Cc))         # conv_out
    cost = pl.CostEstimate(
        flops=int(2 * macs + 12 * Bn * CM * Nn),
        transcendentals=int(Bn * CM * Nn + 2 * Bn * L * Nn),
        bytes_accessed=int(4 * 5 * Bn * Cc * Nn
                           + 2 * (wc_blk.size + wout_blk.size + a_blk.size + bv_blk.size)
                           + 4 * (3 * sa_col.size + bcpe_col.size + bout_col.size)),
    )

    noisy, pred, x0 = pl.pallas_call(
        _make_kernel(bpg),
        grid=(G,),
        in_specs=in_specs,
        out_specs=(out_spec, out_spec, out_spec),
        out_shape=out_shape,
        compiler_params=pltpu.CompilerParams(dimension_semantics=("parallel",)),
        cost_estimate=cost,
    )(sa_col, sb_col, isa_col, clean_g, noise_g, bcpe_col,
      wc_blk, a_blk, bv_blk, wout_blk, bout_col)

    return (noisy.reshape(Bn, Cc, Nn),
            pred.reshape(Bn, Cc, Nn),
            x0.reshape(Bn, Cc, Nn))


def preferred_grid_steps(batch):
    """v7x has 2 TensorCores per chip -> one batch per parallel grid step.
    Single-TC parts (v5e/v6e) -> collapse to a single full-tile grid step."""
    try:
        kind = jax.devices()[0].device_kind.lower()
    except Exception:
        return 1
    return batch if ("v7" in kind or "7x" in kind) else 1


# ============================ diffusion glue ==================================
def make_alphas_cumprod(num_timesteps=NUM_TIMESTEPS, beta_start=1e-4, beta_end=2e-2):
    # DDPMScheduler / DDIMScheduler with beta_schedule='linear'
    betas = jnp.linspace(beta_start, beta_end, num_timesteps, dtype=_F32)
    return jnp.cumprod(1.0 - betas)


def sinusoidal_time_embedding(timesteps, dim=TE):
    half = dim // 2
    freqs = jnp.exp(-jnp.log(10000.0) * jnp.arange(half, dtype=_F32) / half)
    args = timesteps.astype(_F32)[:, None] * freqs[None, :]
    return jnp.concatenate([jnp.sin(args), jnp.cos(args)], axis=-1)      # (B, TE)


def init_params(key):
    ks = jax.random.split(key, 12)

    def lin(k, fi, fo):
        return jax.random.normal(k, (fi, fo), _F32) / jnp.sqrt(jnp.float32(fi))

    def bias(k, n):
        return 0.1 * jax.random.normal(k, (n,), _F32)

    return {
        "w1": lin(ks[0], TE, CM), "b1": bias(ks[1], CM),
        "w2": lin(ks[2], CM, CM), "b2": bias(ks[3], CM),
        "wc": lin(ks[4], C, CM),  "bc": bias(ks[5], CM),
        "wq": lin(ks[6], CM, CM), "wk": lin(ks[7], DC, CM),
        "wv": lin(ks[8], DC, CM), "wo": lin(ks[9], CM, CM),
        "wout": lin(ks[10], CM, C), "bout": bias(ks[11], C),
    }


def unet3d_forward_ref(x_bcn, temb, ehs, p):
    """Pure-JAX f32 reference of the UNet3D stand-in (unfolded attention)."""
    x = jnp.transpose(x_bcn, (0, 2, 1))                                   # (B, N, C)
    e = temb @ p["w1"] + p["b1"]
    e = e * jax.nn.sigmoid(e)
    e = e @ p["w2"] + p["b2"]
    h = x @ p["wc"] + p["bc"] + e[:, None, :]
    h = h * jax.nn.sigmoid(h)
    q = jnp.einsum("bnk,km->bnm", h, p["wq"])
    k = jnp.einsum("bld,dm->blm", ehs, p["wk"])
    v = jnp.einsum("bld,dm->blm", ehs, p["wv"])
    s = jnp.einsum("bnm,blm->bnl", q, k) * (1.0 / (CM ** 0.5))
    a = jax.nn.softmax(s, axis=-1)
    attn = jnp.einsum("bnl,blm->bnm", a, v)
    h = h + jnp.einsum("bnm,mo->bno", attn, p["wo"])
    eps = h @ p["wout"] + p["bout"]
    return jnp.transpose(eps, (0, 2, 1))                                  # (B, C, N)


# ============================ main ============================================
if __name__ == "__main__":
    key = jax.random.PRNGKey(0)
    k_clean, k_noise, k_t, k_ehs, k_par = jax.random.split(key, 5)

    # PyTorch-layout inputs: [B, C, H, W, D]  (mode='combined' -> 4 RGBA channels)
    clean_images = jax.random.normal(k_clean, (B, C, H, W, D), _F32)
    noise        = jax.random.normal(k_noise, (B, C, H, W, D), _F32)
    timesteps    = jax.random.randint(k_t, (B,), 0, NUM_TIMESTEPS, jnp.int32)
    encoder_hidden_states = jax.random.normal(k_ehs, (B, L, DC), _F32)
    params = init_params(k_par)

    alphas_cumprod = make_alphas_cumprod()
    a_prod = alphas_cumprod[timesteps]                                    # (B,)
    sqrt_a = jnp.sqrt(a_prod)
    sqrt_b = jnp.sqrt(1.0 - a_prod)

    # [B, C, H, W, D] -> [B, C, N]: a pure reshape; voxels sit on the 128-lane axis.
    clean_bcn = clean_images.reshape(B, C, N)
    noise_bcn = noise.reshape(B, C, N)
    temb = sinusoidal_time_embedding(timesteps, TE)

    # ---- pure-JAX references --------------------------------------------------
    sa3 = sqrt_a.reshape(B, 1, 1)
    sb3 = sqrt_b.reshape(B, 1, 1)
    noisy_ref = sa3 * clean_bcn + sb3 * noise_bcn
    pred_ref = unet3d_forward_ref(noisy_ref, temb, encoder_hidden_states, params)

    preferred = preferred_grid_steps(B)

    # Build and verify BOTH grid configurations (collapsed single-step for v5e/v6e,
    # one-batch-per-TensorCore for v7x); the preferred one is used for final outputs.
    outputs = {}
    for g in sorted({1, B, preferred}):
        noisy, pred, x0 = fused_diffusion_step(
            clean_bcn, noise_bcn, sqrt_a, sqrt_b, temb, encoder_hidden_states,
            params, grid_steps=g)
        jax.block_until_ready((noisy, pred, x0))

        # 1) scheduler.add_noise
        assert jnp.allclose(noisy, noisy_ref, atol=1e-5, rtol=1e-5), f"add_noise (grid={g})"
        # 2) model forward; tolerance covers bf16 MXU operands, the folded attention
        #    reassociation and the approximate EUP reciprocals.
        assert jnp.allclose(pred, pred_ref, atol=5e-2, rtol=5e-2), f"forward (grid={g})"
        # 3) predict_original_sample (checked against the kernel's own noise prediction)
        x0_self = (noisy - sb3 * pred) / sa3
        assert jnp.allclose(x0, x0_self, atol=1e-3, rtol=1e-3), f"predict_x0 (grid={g})"
        outputs[g] = (noisy, pred, x0)

    noisy, pred, x0 = outputs[preferred]
    # back to the PyTorch voxel layout [B, C, H, W, D]
    noise_pred = pred.reshape(B, C, H, W, D)
    x0_vox = x0.reshape(B, C, H, W, D)
    jax.block_until_ready((noise_pred, x0_vox))

    print("KERNEL_OK")
</pallas_src>

<mosaic_0001>
module attributes {stable_mosaic.version = 11 : i64} {
  func.func @kernel(%arg0: i32, %arg1: memref<1x8x1xf32, #tpu.memory_space<vmem>>, %arg2: memref<1x8x1xf32, #tpu.memory_space<vmem>>, %arg3: memref<1x8x1xf32, #tpu.memory_space<vmem>>, %arg4: memref<1x8x512xf32, #tpu.memory_space<vmem>>, %arg5: memref<1x8x512xf32, #tpu.memory_space<vmem>>, %arg6: memref<1x256x1xf32, #tpu.memory_space<vmem>>, %arg7: memref<1x8x256xbf16, #tpu.memory_space<vmem>>, %arg8: memref<1x16x256xbf16, #tpu.memory_space<vmem>>, %arg9: memref<1x16x256xbf16, #tpu.memory_space<vmem>>, %arg10: memref<1x256x8xbf16, #tpu.memory_space<vmem>>, %arg11: memref<1x8x1xf32, #tpu.memory_space<vmem>>, %arg12: memref<1x8x512xf32, #tpu.memory_space<vmem>>, %arg13: memref<1x8x512xf32, #tpu.memory_space<vmem>>, %arg14: memref<1x8x512xf32, #tpu.memory_space<vmem>>) attributes {dimension_semantics = [#tpu.dimension_semantics<parallel>], iteration_bounds = array<i64: 1>, scalar_prefetch = 0 : i64, scratch_operands = 0 : i64, tpu.core_type = #tpu.core_type<tc>, window_params = [{transform_indices = @transform_0, window_bounds = array<i64: 1, 8, 1>}, {transform_indices = @transform_1, window_bounds = array<i64: 1, 8, 1>}, {transform_indices = @transform_2, window_bounds = array<i64: 1, 8, 1>}, {transform_indices = @transform_3, window_bounds = array<i64: 1, 8, 512>}, {transform_indices = @transform_4, window_bounds = array<i64: 1, 8, 512>}, {transform_indices = @transform_5, window_bounds = array<i64: 1, 256, 1>}, {transform_indices = @transform_6, window_bounds = array<i64: 1, 8, 256>}, {transform_indices = @transform_7, window_bounds = array<i64: 1, 16, 256>}, {transform_indices = @transform_8, window_bounds = array<i64: 1, 16, 256>}, {transform_indices = @transform_9, window_bounds = array<i64: 1, 256, 8>}, {transform_indices = @transform_10, window_bounds = array<i64: 1, 8, 1>}, {transform_indices = @transform_11, window_bounds = array<i64: 1, 8, 512>}, {transform_indices = @transform_12, window_bounds = array<i64: 1, 8, 512>}, {transform_indices = @transform_13, window_bounds = array<i64: 1, 8, 512>}]} {
    %c0 = arith.constant 0 : index
    %c0_0 = arith.constant 0 : index
    %c0_1 = arith.constant 0 : index
    %0 = vector.load %arg1[%c0, %c0_0, %c0_1] : memref<1x8x1xf32, #tpu.memory_space<vmem>>, vector<1x8x1xf32>
    %1 = vector.shape_cast %0 : vector<1x8x1xf32> to vector<8x1xf32>
    %c0_2 = arith.constant 0 : index
    %c0_3 = arith.constant 0 : index
    %c0_4 = arith.constant 0 : index
    %2 = vector.load %arg4[%c0_2, %c0_3, %c0_4] : memref<1x8x512xf32, #tpu.memory_space<vmem>>, vector<1x8x512xf32>
    %3 = vector.shape_cast %2 : vector<1x8x512xf32> to vector<8x512xf32>
    %4 = vector.broadcast %1 : vector<8x1xf32> to vector<8x512xf32>
    %5 = arith.mulf %4, %3 : vector<8x512xf32>
    %c0_5 = arith.constant 0 : index
    %c0_6 = arith.constant 0 : index
    %c0_7 = arith.constant 0 : index
    %6 = vector.load %arg2[%c0_5, %c0_6, %c0_7] : memref<1x8x1xf32, #tpu.memory_space<vmem>>, vector<1x8x1xf32>
    %7 = vector.shape_cast %6 : vector<1x8x1xf32> to vector<8x1xf32>
    %c0_8 = arith.constant 0 : index
    %c0_9 = arith.constant 0 : index
    %c0_10 = arith.constant 0 : index
    %8 = vector.load %arg5[%c0_8, %c0_9, %c0_10] : memref<1x8x512xf32, #tpu.memory_space<vmem>>, vector<1x8x512xf32>
    %9 = vector.shape_cast %8 : vector<1x8x512xf32> to vector<8x512xf32>
    %10 = vector.broadcast %7 : vector<8x1xf32> to vector<8x512xf32>
    %11 = arith.mulf %10, %9 : vector<8x512xf32>
    %12 = arith.addf %5, %11 : vector<8x512xf32>
    %c0_11 = arith.constant 0 : index
    %c0_12 = arith.constant 0 : index
    %c0_13 = arith.constant 0 : index
    %13 = vector.load %arg12[%c0_11, %c0_12, %c0_13] : memref<1x8x512xf32, #tpu.memory_space<vmem>>, vector<1x8x512xf32>
    %14 = vector.shape_cast %13 : vector<1x8x512xf32> to vector<8x512xf32>
    %15 = vector.shape_cast %12 : vector<8x512xf32> to vector<1x8x512xf32>
    tpu.vector_store %arg12[%c0_11, %c0_12, %c0_13], %15 {strides = array<i32>} : memref<1x8x512xf32, #tpu.memory_space<vmem>>, vector<1x8x512xf32>,
    %c0_14 = arith.constant 0 : index
    %c0_15 = arith.constant 0 : index
    %c0_16 = arith.constant 0 : index
    %16 = vector.load %arg7[%c0_14, %c0_15, %c0_16] : memref<1x8x256xbf16, #tpu.memory_space<vmem>>, vector<1x8x256xbf16>
    %17 = vector.shape_cast %16 : vector<1x8x256xbf16> to vector<8x256xbf16>
    %18 = arith.truncf %12 : vector<8x512xf32> to vector<8x512xbf16>
    %cst = arith.constant dense<0.000000e+00> : vector<256x512xf32>
    %19 = tpu.matmul %17, %18, %cst {dimension_numbers = #tpu.dot_dimension_numbers<[0], [0], [1], [1], [0, 1, 1, 1], [], []>} : vector<8x256xbf16>, vector<8x512xbf16>, vector<256x512xf32> -> vector<256x512xf32>
    %c0_17 = arith.constant 0 : index
    %c0_18 = arith.constant 0 : index
    %c0_19 = arith.constant 0 : index
    %20 = vector.load %arg6[%c0_17, %c0_18, %c0_19] : memref<1x256x1xf32, #tpu.memory_space<vmem>>, vector<1x256x1xf32>
    %21 = vector.shape_cast %20 : vector<1x256x1xf32> to vector<256x1xf32>
    %22 = vector.broadcast %21 : vector<256x1xf32> to vector<256x512xf32>
    %23 = arith.addf %19, %22 : vector<256x512xf32>
    %cst_20 = arith.constant 0.000000e+00 : f32
    %24 = vector.broadcast %cst_20 : f32 to vector<256x512xf32>
    %25 = arith.subf %24, %23 : vector<256x512xf32>
    %26 = math.exp %25 : vector<256x512xf32>
    %cst_21 = arith.constant 1.000000e+00 : f32
    %27 = vector.broadcast %cst_21 : f32 to vector<256x512xf32>
    %28 = arith.addf %27, %26 : vector<256x512xf32>
    %29 = tpu.reciprocal %28 {approx = true} : vector<256x512xf32> -> vector<256x512xf32>
    %30 = arith.mulf %23, %29 : vector<256x512xf32>
    %31 = arith.truncf %30 : vector<256x512xf32> to vector<256x512xbf16>
    %c0_22 = arith.constant 0 : index
    %c0_23 = arith.constant 0 : index
    %c0_24 = arith.constant 0 : index
    %32 = vector.load %arg8[%c0_22, %c0_23, %c0_24] : memref<1x16x256xbf16, #tpu.memory_space<vmem>>, vector<1x16x256xbf16>
    %33 = vector.shape_cast %32 : vector<1x16x256xbf16> to vector<16x256xbf16>
    %cst_25 = arith.constant dense<0.000000e+00> : vector<16x512xf32>
    %34 = tpu.matmul %33, %31, %cst_25 {dimension_numbers = #tpu.dot_dimension_numbers<[1], [0], [0], [1], [0, 0, 1, 1], [], []>} : vector<16x256xbf16>, vector<256x512xbf16>, vector<16x512xf32> -> vector<16x512xf32>
    %35 = vector.extract_strided_slice %34 {offsets = [0, 0], sizes = [8, 512], strides = [1, 1]} : vector<16x512xf32> to vector<8x512xf32>
    %cst_26 = arith.constant dense<0xFF800000> : vector<512xf32>
    %36 = vector.multi_reduction <maximumf>, %35, %cst_26 [0] : vector<8x512xf32> to vector<512xf32>
    %37 = vector.shape_cast %36 : vector<512xf32> to vector<1x512xf32>
    %38 = vector.broadcast %37 : vector<1x512xf32> to vector<8x512xf32>
    %39 = arith.subf %35, %38 : vector<8x512xf32>
    %40 = math.exp %39 : vector<8x512xf32>
    %cst_27 = arith.constant dense<0.000000e+00> : vector<512xf32>
    %41 = vector.multi_reduction <add>, %40, %cst_27 [0] : vector<8x512xf32> to vector<512xf32>
    %42 = vector.shape_cast %41 : vector<512xf32> to vector<1x512xf32>
    %43 = tpu.reciprocal %42 {approx = true} : vector<1x512xf32> -> vector<1x512xf32>
    %44 = vector.broadcast %43 : vector<1x512xf32> to vector<8x512xf32>
    %45 = arith.mulf %40, %44 : vector<8x512xf32>
    %46 = vector.extract_strided_slice %34 {offsets = [8, 0], sizes = [8, 512], strides = [1, 1]} : vector<16x512xf32> to vector<8x512xf32>
    %cst_28 = arith.constant dense<0xFF800000> : vector<512xf32>
    %47 = vector.multi_reduction <maximumf>, %46, %cst_28 [0] : vector<8x512xf32> to vector<512xf32>
    %48 = vector.shape_cast %47 : vector<512xf32> to vector<1x512xf32>
    %49 = vector.broadcast %48 : vector<1x512xf32> to vector<8x512xf32>
    %50 = arith.subf %46, %49 : vector<8x512xf32>
    %51 = math.exp %50 : vector<8x512xf32>
    %cst_29 = arith.constant dense<0.000000e+00> : vector<512xf32>
    %52 = vector.multi_reduction <add>, %51, %cst_29 [0] : vector<8x512xf32> to vector<512xf32>
    %53 = vector.shape_cast %52 : vector<512xf32> to vector<1x512xf32>
    %54 = tpu.reciprocal %53 {approx = true} : vector<1x512xf32> -> vector<1x512xf32>
    %55 = vector.broadcast %54 : vector<1x512xf32> to vector<8x512xf32>
    %56 = arith.mulf %51, %55 : vector<8x512xf32>
    %57 = tpu.concatenate %45, %56 in 0 : vector<8x512xf32>, vector<8x512xf32> -> vector<16x512xf32>
    %c0_30 = arith.constant 0 : index
    %c0_31 = arith.constant 0 : index
    %c0_32 = arith.constant 0 : index
    %58 = vector.load %arg9[%c0_30, %c0_31, %c0_32] : memref<1x16x256xbf16, #tpu.memory_space<vmem>>, vector<1x16x256xbf16>
    %59 = vector.shape_cast %58 : vector<1x16x256xbf16> to vector<16x256xbf16>
    %60 = arith.truncf %57 : vector<16x512xf32> to vector<16x512xbf16>
    %cst_33 = arith.constant dense<0.000000e+00> : vector<256x512xf32>
    %61 = tpu.matmul %59, %60, %cst_33 {dimension_numbers = #tpu.dot_dimension_numbers<[0], [0], [1], [1], [0, 1, 1, 1], [], []>} : vector<16x256xbf16>, vector<16x512xbf16>, vector<256x512xf32> -> vector<256x512xf32>
    %62 = arith.addf %30, %61 : vector<256x512xf32>
    %c0_34 = arith.constant 0 : index
    %c0_35 = arith.constant 0 : index
    %c0_36 = arith.constant 0 : index
    %63 = vector.load %arg10[%c0_34, %c0_35, %c0_36] : memref<1x256x8xbf16, #tpu.memory_space<vmem>>, vector<1x256x8xbf16>
    %64 = vector.shape_cast %63 : vector<1x256x8xbf16> to vector<256x8xbf16>
    %65 = arith.truncf %62 : vector<256x512xf32> to vector<256x512xbf16>
    %cst_37 = arith.constant dense<0.000000e+00> : vector<8x512xf32>
    %66 = tpu.matmul %64, %65, %cst_37 {dimension_numbers = #tpu.dot_dimension_numbers<[0], [0], [1], [1], [0, 1, 1, 1], [], []>} : vector<256x8xbf16>, vector<256x512xbf16>, vector<8x512xf32> -> vector<8x512xf32>
    %c0_38 = arith.constant 0 : index
    %c0_39 = arith.constant 0 : index
    %c0_40 = arith.constant 0 : index
    %67 = vector.load %arg11[%c0_38, %c0_39, %c0_40] : memref<1x8x1xf32, #tpu.memory_space<vmem>>, vector<1x8x1xf32>
    %68 = vector.shape_cast %67 : vector<1x8x1xf32> to vector<8x1xf32>
    %69 = vector.broadcast %68 : vector<8x1xf32> to vector<8x512xf32>
    %70 = arith.addf %66, %69 : vector<8x512xf32>
    %c0_41 = arith.constant 0 : index
    %c0_42 = arith.constant 0 : index
    %c0_43 = arith.constant 0 : index
    %71 = vector.load %arg13[%c0_41, %c0_42, %c0_43] : memref<1x8x512xf32, #tpu.memory_space<vmem>>, vector<1x8x512xf32>
    %72 = vector.shape_cast %71 : vector<1x8x512xf32> to vector<8x512xf32>
    %73 = vector.shape_cast %70 : vector<8x512xf32> to vector<1x8x512xf32>
    tpu.vector_store %arg13[%c0_41, %c0_42, %c0_43], %73 {strides = array<i32>} : memref<1x8x512xf32, #tpu.memory_space<vmem>>, vector<1x8x512xf32>,
    %c0_44 = arith.constant 0 : index
    %c0_45 = arith.constant 0 : index
    %c0_46 = arith.constant 0 : index
    %74 = vector.load %arg2[%c0_44, %c0_45, %c0_46] : memref<1x8x1xf32, #tpu.memory_space<vmem>>, vector<1x8x1xf32>
    %75 = vector.shape_cast %74 : vector<1x8x1xf32> to vector<8x1xf32>
    %76 = vector.broadcast %75 : vector<8x1xf32> to vector<8x512xf32>
    %77 = arith.mulf %76, %70 : vector<8x512xf32>
    %78 = arith.subf %12, %77 : vector<8x512xf32>
    %c0_47 = arith.constant 0 : index
    %c0_48 = arith.constant 0 : index
    %c0_49 = arith.constant 0 : index
    %79 = vector.load %arg3[%c0_47, %c0_48, %c0_49] : memref<1x8x1xf32, #tpu.memory_space<vmem>>, vector<1x8x1xf32>
    %80 = vector.shape_cast %79 : vector<1x8x1xf32> to vector<8x1xf32>
    %81 = vector.broadcast %80 : vector<8x1xf32> to vector<8x512xf32>
    %82 = arith.mulf %78, %81 : vector<8x512xf32>
    %c0_50 = arith.constant 0 : index
    %c0_51 = arith.constant 0 : index
    %c0_52 = arith.constant 0 : index
    %83 = vector.load %arg14[%c0_50, %c0_51, %c0_52] : memref<1x8x512xf32, #tpu.memory_space<vmem>>, vector<1x8x512xf32>
    %84 = vector.shape_cast %83 : vector<1x8x512xf32> to vector<8x512xf32>
    %85 = vector.shape_cast %82 : vector<8x512xf32> to vector<1x8x512xf32>
    tpu.vector_store %arg14[%c0_50, %c0_51, %c0_52], %85 {strides = array<i32>} : memref<1x8x512xf32, #tpu.memory_space<vmem>>, vector<1x8x512xf32>,
    return
  }
  func.func @transform_0(%arg0: i32) -> (i32, i32, i32) {
    %c0_i32 = arith.constant 0 : i32
    %c0_i32_0 = arith.constant 0 : i32
    %c0_i32_1 = arith.constant 0 : i32
    return %arg0, %c0_i32, %c0_i32_0 : i32, i32, i32
  }
  func.func @transform_1(%arg0: i32) -> (i32, i32, i32) {
    %c0_i32 = arith.constant 0 : i32
    %c0_i32_0 = arith.constant 0 : i32
    %c0_i32_1 = arith.constant 0 : i32
    return %arg0, %c0_i32, %c0_i32_0 : i32, i32, i32
  }
  func.func @transform_2(%arg0: i32) -> (i32, i32, i32) {
    %c0_i32 = arith.constant 0 : i32
    %c0_i32_0 = arith.constant 0 : i32
    %c0_i32_1 = arith.constant 0 : i32
    return %arg0, %c0_i32, %c0_i32_0 : i32, i32, i32
  }
  func.func @transform_3(%arg0: i32) -> (i32, i32, i32) {
    %c0_i32 = arith.constant 0 : i32
    %c0_i32_0 = arith.constant 0 : i32
    %c0_i32_1 = arith.constant 0 : i32
    return %arg0, %c0_i32, %c0_i32_0 : i32, i32, i32
  }
  func.func @transform_4(%arg0: i32) -> (i32, i32, i32) {
    %c0_i32 = arith.constant 0 : i32
    %c0_i32_0 = arith.constant 0 : i32
    %c0_i32_1 = arith.constant 0 : i32
    return %arg0, %c0_i32, %c0_i32_0 : i32, i32, i32
  }
  func.func @transform_5(%arg0: i32) -> (i32, i32, i32) {
    %c0_i32 = arith.constant 0 : i32
    %c0_i32_0 = arith.constant 0 : i32
    %c0_i32_1 = arith.constant 0 : i32
    return %arg0, %c0_i32, %c0_i32_0 : i32, i32, i32
  }
  func.func @transform_6(%arg0: i32) -> (i32, i32, i32) {
    %c0_i32 = arith.constant 0 : i32
    %c0_i32_0 = arith.constant 0 : i32
    %c0_i32_1 = arith.constant 0 : i32
    return %arg0, %c0_i32, %c0_i32_0 : i32, i32, i32
  }
  func.func @transform_7(%arg0: i32) -> (i32, i32, i32) {
    %c0_i32 = arith.constant 0 : i32
    %c0_i32_0 = arith.constant 0 : i32
    %c0_i32_1 = arith.constant 0 : i32
    return %arg0, %c0_i32, %c0_i32_0 : i32, i32, i32
  }
  func.func @transform_8(%arg0: i32) -> (i32, i32, i32) {
    %c0_i32 = arith.constant 0 : i32
    %c0_i32_0 = arith.constant 0 : i32
    %c0_i32_1 = arith.constant 0 : i32
    return %arg0, %c0_i32, %c0_i32_0 : i32, i32, i32
  }
  func.func @transform_9(%arg0: i32) -> (i32, i32, i32) {
    %c0_i32 = arith.constant 0 : i32
    %c0_i32_0 = arith.constant 0 : i32
    %c0_i32_1 = arith.constant 0 : i32
    return %arg0, %c0_i32, %c0_i32_0 : i32, i32, i32
  }
  func.func @transform_10(%arg0: i32) -> (i32, i32, i32) {
    %c0_i32 = arith.constant 0 : i32
    %c0_i32_0 = arith.constant 0 : i32
    %c0_i32_1 = arith.constant 0 : i32
    return %arg0, %c0_i32, %c0_i32_0 : i32, i32, i32
  }
  func.func @transform_11(%arg0: i32) -> (i32, i32, i32) {
    %c0_i32 = arith.constant 0 : i32
    %c0_i32_0 = arith.constant 0 : i32
    %c0_i32_1 = arith.constant 0 : i32
    return %arg0, %c0_i32, %c0_i32_0 : i32, i32, i32
  }
  func.func @transform_12(%arg0: i32) -> (i32, i32, i32) {
    %c0_i32 = arith.constant 0 : i32
    %c0_i32_0 = arith.constant 0 : i32
    %c0_i32_1 = arith.constant 0 : i32
    return %arg0, %c0_i32, %c0_i32_0 : i32, i32, i32
  }
  func.func @transform_13(%arg0: i32) -> (i32, i32, i32) {
    %c0_i32 = arith.constant 0 : i32
    %c0_i32_0 = arith.constant 0 : i32
    %c0_i32_1 = arith.constant 0 : i32
    return %arg0, %c0_i32, %c0_i32_0 : i32, i32, i32
  }
}

</mosaic_0001>

<bundles_post_ra>
// kernel: fused_diffusion_step.1
= control target key start
LH: loop header
LB: loop body
LE: loop exit
PB: predicated region body
PF: predicated region fallthrough
CT: control target
= control target key end

     0   :  { %v5520_v0 = vmov 0   ;;  %vm363_vm0 = vcmask 1043456   ;;  %vm314_vm1 = vcmask 64512   ;;  %vm1876_vm2 = vcmask 130048   ;;  %s5506_s0 = inlined_call_operand.vmem [shape: f32[1,8,1], index: 0, kind: input, shape index: {}]   ;;  %s5507_s1 = inlined_call_operand.vmem [shape: f32[1,8,1], index: 1, kind: input, shape index: {}]   ;;  %s5508_s6 = inlined_call_operand.vmem [shape: bf16[1,8,256], index: 6, kind: input, shape index: {}]   ;;  %s5509_s5 = inlined_call_operand.vmem [shape: f32[1,256,1], index: 5, kind: input, shape index: {}]   ;;  %s5510_s8 = inlined_call_operand.vmem [shape: bf16[1,16,256], index: 8, kind: input, shape index: {}]   ;;  %s5511_s9 = inlined_call_operand.vmem [shape: bf16[1,256,8], index: 9, kind: input, shape index: {}]   ;;  %s5512_s3 = inlined_call_operand.vmem [shape: f32[1,8,512], index: 3, kind: input, shape index: {}]   ;;  %s5513_s4 = inlined_call_operand.vmem [shape: f32[1,8,512], index: 4, kind: input, shape index: {}]   ;;  %s5514_s11 = inlined_call_operand.vmem [shape: f32[1,8,512], index: 11, kind: output, shape index: {0}]   ;;  %s5515_s10 = inlined_call_operand.vmem [shape: f32[1,8,1], index: 10, kind: input, shape index: {}]   ;;  %s5516_s2 = inlined_call_operand.vmem [shape: f32[1,8,1], index: 2, kind: input, shape index: {}]   ;;  %s5517_s7 = inlined_call_operand.vmem [shape: bf16[1,16,256], index: 7, kind: input, shape index: {}]   ;;  %s5518_s12 = inlined_call_operand.vmem [shape: f32[1,8,512], index: 12, kind: output, shape index: {1}]   ;;  %s5519_s13 = inlined_call_operand.vmem [shape: f32[1,8,512], index: 13, kind: output, shape index: {2}]  }
   0x1   :  { %2884 = vset.pattern.permute.xlu0 %v5520_v0  ;;  %v42_v1 = vld [vmem:[%s5506_s0] sm:$0xff]  ;;  %408 = vmatprep.mubr.bf16.mxu0 %v5520_v0  ;;  %v84_v6 = vld [vmem:[%s5509_s5 + $0x8] sm:$0xff]  ;;  %v85_v7 = vld [vmem:[%s5509_s5 + $0x10] sm:$0xff] }
   0x2   :  { %49 = vperm.xlu0 %2884, %v42_v1   ;;  %601 = vmatprep.mubr.bf16.mxu1 %v5520_v0  ;;  %v3538_v2 = vld [vmem:[%s5507_s1] sm:$0xff]  ;;  %v86_v8 = vld [vmem:[%s5509_s5 + $0x18] sm:$0xff]  ;;  %v88_v10 = vld [vmem:[%s5509_s5 + $0x28] sm:$0xff] }
   0x3   :  { %v78_v3 = vld [vmem:[%s5508_s6] sm:$0xff]  ;;  %v89_v11 = vld [vmem:[%s5509_s5 + $0x30] sm:$0xff]  ;;  %v92_v14 = vld [vmem:[%s5509_s5 + $0x48] sm:$0xff] }
   0x4   :  { %v2795_v4 = vcombine.low %v78_v3, %v78_v3  ;;  %v83_v5 = vld [vmem:[%s5509_s5] sm:$0xff]  ;;  %v2796_v12 = vcombine.high %v78_v3, %v78_v3  ;;  %v93_v15 = vld [vmem:[%s5509_s5 + $0x50] sm:$0xff]  ;;  %v94_v16 = vld [vmem:[%s5509_s5 + $0x58] sm:$0xff] }
   0x5   :  { %v87_v9 = vld [vmem:[%s5509_s5 + $0x20] sm:$0xff]  ;;  %v96_v18 = vld [vmem:[%s5509_s5 + $0x68] sm:$0xff]  ;;  %v97_v19 = vld [vmem:[%s5509_s5 + $0x70] sm:$0xff] }
   0x6   :  { %63 = vperm.xlu0 %2884, %v3538_v2   ;;  %282 = vxpose.xlu1.c.b16.start.end [1/1] (short) %v2795_v4, 128  ;;  %v91_v13 = vld [vmem:[%s5509_s5 + $0x40] sm:$0xff]  ;;  %v98_v20 = vld [vmem:[%s5509_s5 + $0x78] sm:$0xff]  ;;  %v100_v22 = vld [vmem:[%s5509_s5 + $0x88] sm:$0xff] }
   0x7   :  { %v95_v17 = vld [vmem:[%s5509_s5 + $0x60] sm:$0xff]  ;;  %v90_v21 = vld [vmem:[%s5509_s5 + $0x38] sm:$0xff]  ;;  %v101_v25 = vld [vmem:[%s5509_s5 + $0x90] sm:$0xff] }
   0x8   :  { %v99_v23 = vld [vmem:[%s5509_s5 + $0x80] sm:$0xff]  ;;  %v102_v24 = vld [vmem:[%s5509_s5 + $0x98] sm:$0xff]  ;;  %v104_v26 = vld [vmem:[%s5509_s5 + $0xa8] sm:$0xff] }
   0x9   :  { %v103_v27 = vld [vmem:[%s5509_s5 + $0xa0] sm:$0xff]  ;;  %v106_v28 = vld [vmem:[%s5509_s5 + $0xb8] sm:$0xff]  ;;  %v105_v29 = vld [vmem:[%s5509_s5 + $0xb0] sm:$0xff] }
   0xa   :  { %117 = vperm.xlu0 %2884, %v83_v5   ;;  %v108_v30 = vld [vmem:[%s5509_s5 + $0xc8] sm:$0xff]  ;;  %v107_v31 = vld [vmem:[%s5509_s5 + $0xc0] sm:$0xff]  ;;  %v110_v32 = vld [vmem:[%s5509_s5 + $0xd8] sm:$0xff] }
   0xb   :  { %v109_v33 = vld [vmem:[%s5509_s5 + $0xd0] sm:$0xff]  ;;  %v112_v34 = vld [vmem:[%s5509_s5 + $0xe8] sm:$0xff]  ;;  %v111_v35 = vld [vmem:[%s5509_s5 + $0xe0] sm:$0xff] }
   0xc   :  { %v114_v36 = vld [vmem:[%s5509_s5 + $0xf8] sm:$0xff]  ;;  %v113_v37 = vld [vmem:[%s5509_s5 + $0xf0] sm:$0xff]  ;;  %v2890_v38 = vld [vmem:[%s5510_s8 + $0x4] ss:$8 sps:$4 sm:$0xff]  }
   0xd   :  { %v2888_v39 = vld [vmem:[%s5510_s8] ss:$8 sps:$4 sm:$0xff]   ;;  %v45_v43 = vld [vmem:[%s5512_s3 + $0x10] sm:$0xff]  ;;  %v46_v44 = vld [vmem:[%s5512_s3 + $0x18] sm:$0xff] }
   0xe   :  { %122 = vperm.xlu0 %2884, %v84_v6   ;;  %v43_v40 = vld [vmem:[%s5512_s3] sm:$0xff]  ;;  %v44_v41 = vld [vmem:[%s5512_s3 + $0x8] sm:$0xff]  ;;  %v59_v47 = vld [vmem:[%s5513_s4 + $0x10] sm:$0xff] }
   0xf   :  { %v57_v45 = vld [vmem:[%s5513_s4] sm:$0xff]  ;;  %v58_v46 = vld [vmem:[%s5513_s4 + $0x8] sm:$0xff]  ;;  %v60_v48 = vld [vmem:[%s5513_s4 + $0x18] sm:$0xff] }
  0x12   :  { %127 = vperm.xlu0 %2884, %v85_v7  }
  0x16   :  { %132 = vperm.xlu0 %2884, %v86_v8   ;;  %v2891_v8 = vld [vmem:[%s5511_s9 + $0x40] sm:$0xff]  }
  0x1a   :  { %137 = vperm.xlu0 %2884, %v87_v9  }
  0x1e   :  { %142 = vperm.xlu0 %2884, %v88_v10   ;;  %v2892_v10 = vld [vmem:[%s5511_s9 + $0x48] sm:$0xff]  }
  0x22   :  { %147 = vperm.xlu0 %2884, %v89_v11   ;;  %v2899_v11 = vld [vmem:[%s5511_s9] sm:$0xff]  }
  0x23   :  { %298 = vxpose.xlu1.c.b16.start.end [1/1] (short) %v2796_v12, 128  ;;  %v2893_v12 = vld [vmem:[%s5511_s9 + $0x50] sm:$0xff]  }
  0x26   :  { %157 = vperm.xlu0 %2884, %v91_v13  }
  0x27   :  { %2885 = vset.pattern.permute.xlu1 %v5520_v0 }
  0x2a   :  { %162 = vperm.xlu0 %2884, %v92_v14   ;;  %v2894_v14 = vld [vmem:[%s5511_s9 + $0x58] sm:$0xff]  }
  0x2e   :  { %167 = vperm.xlu0 %2884, %v93_v15   ;;  %v2900_v15 = vld [vmem:[%s5511_s9 + $0x8] sm:$0xff]  }
  0x32   :  { %172 = vperm.xlu0 %2884, %v94_v16   ;;  %v2895_v16 = vld [vmem:[%s5511_s9 + $0x60] sm:$0xff]  }
  0x36   :  { %177 = vperm.xlu0 %2884, %v95_v17   ;;  %v2901_v17 = vld [vmem:[%s5511_s9 + $0x10] sm:$0xff]  }
  0x3a   :  { %182 = vperm.xlu0 %2884, %v96_v18  }
  0x3e   :  { %187 = vperm.xlu0 %2884, %v97_v19   ;;  %v2896_v19 = vld [vmem:[%s5511_s9 + $0x68] sm:$0xff]  }
  0x42   :  { %192 = vperm.xlu0 %2884, %v98_v20   ;;  %v2902_v20 = vld [vmem:[%s5511_s9 + $0x18] sm:$0xff]  }
  0x43   :  { %152 = vperm.xlu1 %2885, %v90_v21   ;;  %v2897_v21 = vld [vmem:[%s5511_s9 + $0x70] sm:$0xff]  }
  0x46   :  { %202 = vperm.xlu0 %2884, %v100_v22   ;;  %v2903_v22 = vld [vmem:[%s5511_s9 + $0x20] sm:$0xff]  }
  0x47   :  { %197 = vperm.xlu1 %2885, %v99_v23  }
  0x4a   :  { %212 = vperm.xlu0 %2884, %v102_v24   ;;  %v2898_v24 = vld [vmem:[%s5511_s9 + $0x78] sm:$0xff]  }
  0x4b   :  { %207 = vperm.xlu1 %2885, %v101_v25   ;;  %v2904_v25 = vld [vmem:[%s5511_s9 + $0x28] sm:$0xff]  }
  0x4e   :  { %222 = vperm.xlu0 %2884, %v104_v26   ;;  %v2905_v26 = vld [vmem:[%s5511_s9 + $0x30] sm:$0xff]  }
  0x4f   :  { %217 = vperm.xlu1 %2885, %v103_v27  }
  0x52   :  { %232 = vperm.xlu0 %2884, %v106_v28   ;;  %v2906_v28 = vld [vmem:[%s5511_s9 + $0x38] sm:$0xff]  }
  0x53   :  { %227 = vperm.xlu1 %2885, %v105_v29   ;;  %v2535_v29 = vld [vmem:[%s5515_s10] sm:$0xff] }
  0x56   :  { %242 = vperm.xlu0 %2884, %v108_v30  }
  0x57   :  { %237 = vperm.xlu1 %2885, %v107_v31   ;;  %v2769_v31 = vld [vmem:[%s5516_s2] sm:$0xff] }
  0x5a   :  { %252 = vperm.xlu0 %2884, %v110_v32  }
  0x5b   :  { %247 = vperm.xlu1 %2885, %v109_v33  }
  0x5e   :  { %262 = vperm.xlu0 %2884, %v112_v34  }
  0x5f   :  { %257 = vperm.xlu1 %2885, %v111_v35  }
  0x62   :  { %272 = vperm.xlu0 %2884, %v114_v36  }
  0x63   :  { %267 = vperm.xlu1 %2885, %v113_v37  }
  0x6c   :  { %v290_v6 = vpop.trf.xlu1 }
  0x70   :  { %v291_v7 = vpop.trf.xlu1 }
  0x74   :  { %v292_v9 = vpop.trf.xlu1 }
  0x78   :  { %v293_v13 = vpop.trf.xlu1 }
  0x7c   :  { %v294_v18 = vpop.trf.xlu1 }
  0x80   :  { %1860 = vxpose.xlu0.c.b16.start.end [1/1] (short) %v2890_v38, 128  ;;  %v295_v23 = vpop.trf.xlu1 }
  0x81   :  { %v50_v42 = vpop.permute.xlu0 %49 }
  0x82   :  { %v52_v49 = vmul.f32 %v50_v42, %v43_v40  ;;  %v53_v50 = vmul.f32 %v50_v42, %v44_v41  ;;  %v54_v51 = vmul.f32 %v50_v42, %v45_v43  ;;  %v55_v52 = vmul.f32 %v50_v42, %v46_v44 }
  0x84   :  { %v296_v27 = vpop.trf.xlu1 }
  0x85   :  { %v64_v53 = vpop.permute.xlu0 %63 }
  0x86   :  { %v66_v54 = vmul.f32 %v64_v53, %v57_v45  ;;  %v67_v55 = vmul.f32 %v64_v53, %v58_v46  ;;  %v68_v56 = vmul.f32 %v64_v53, %v59_v47  ;;  %v69_v57 = vmul.f32 %v64_v53, %v60_v48  ;;  %1844 = vxpose.xlu1.c.b16.start.end [1/1] (short) %v2888_v39, 128 }
  0x88   :  { %v71_v58 = vadd.f32 %v67_v55, %v53_v50  ;;  %v73_v59 = vadd.f32 %v69_v57, %v55_v52  ;;  %v70_v60 = vadd.f32 %v66_v54, %v52_v49  ;;  %v72_v61 = vadd.f32 %v68_v56, %v54_v51  ;;  %v297_v30 = vpop.trf.xlu1 }
  0x89   :  { %v118_v39 = vpop.permute.xlu0 %117 }
  0x8a   :  { %75 = vst [vmem:[%s5514_s11 + $0x8] sm:$0xff] %v71_v58  ;;  %v80_v62 = vpack.c.bf16 %v71_v58, %v71_v58  ;;  %77 = vst [vmem:[%s5514_s11 + $0x18] sm:$0xff] %v73_v59  ;;  %v82_v63 = vpack.c.bf16 %v73_v59, %v73_v59  ;;  %v79_v1 = vpack.c.bf16 %v70_v60, %v70_v60 }
  0x8b   :  { %74 = vst [vmem:[%s5514_s11] sm:$0xff] %v70_v60  ;;  %76 = vst [vmem:[%s5514_s11 + $0x10] sm:$0xff] %v72_v61  ;;  %v81_v3 = vpack.c.bf16 %v72_v61, %v72_v61 }
  0x8c   :  { %2797 = vmatprep.subr.msk.bf16.mxu0 %vm363_vm0, %v80_v62  ;;  %2814 = vmatprep.subr.msk.bf16.mxu1 %vm363_vm0, %v82_v63  ;;  %v365_v4 = vsel %vm363_vm0, %v79_v1, 0  ;;  %v306_v32 = vpop.trf.xlu1 }
  0x8d   :  { %v371_v5 = vsel %vm363_vm0, %v81_v3, 0  ;;  %377 = vmatpush1.bf16.msra.mxu0 %v365_v4  ;;  %v123_v40 = vpop.permute.xlu0 %122 }
  0x8e   :  { %570 = vmatpush1.bf16.msra.mxu1 %v371_v5 }
  0x90   :  { %2798 = vmatmul.mubr.msk.bf16.vlgmr.msra.gmra.mrb[0].mxu0 %vm314_vm1, %v290_v6 }
  0x91   :  { %2815 = vmatmul.mubr.msk.bf16.vlgmr.msra.gmra.mrb[0].mxu1 %vm314_vm1, %v290_v6  ;;  %418 = vmatprep.mubr.bf16.mxu0 %v5520_v0  ;;  %v128_v41 = vpop.permute.xlu0 %127 }
  0x92   :  { %611 = vmatprep.mubr.bf16.mxu1 %v5520_v0 }
  0x98   :  { %2799 = vmatmul.mubr.msk.bf16.gmra.mrb[4].mxu0 %vm314_vm1, %v291_v7 }
  0x99   :  { %2816 = vmatmul.mubr.msk.bf16.gmra.mrb[4].mxu1 %vm314_vm1, %v291_v7  ;;  %428 = vmatprep.mubr.bf16.mxu0 %v5520_v0 }
  0x9a   :  { %621 = vmatprep.mubr.bf16.mxu1 %v5520_v0 }
  0x9d   :  { %2653 = vxpose.xlu0.c.b16.start [1/8] (narrow) %v2891_v8, 16  ;;  %v3824_v8 = vpop.permute.xlu0 %132 }
  0xa0   :  { %2800 = vmatmul.mubr.msk.bf16.gmra.mrb[8].mxu0 %vm314_vm1, %v292_v9 }
  0xa1   :  { %2817 = vmatmul.mubr.msk.bf16.gmra.mrb[8].mxu1 %vm314_vm1, %v292_v9  ;;  %2654 = vxpose.xlu0.c.b16.cont [2/8] (narrow) %v2892_v10, 16 }
  0xa2   :  { %438 = vmatprep.mubr.bf16.mxu0 %v5520_v0  ;;  %631 = vmatprep.mubr.bf16.mxu1 %v5520_v0 }
  0xa3   :  { %2637 = vxpose.xlu1.c.b16.start [1/8] (narrow) %v2899_v11, 16 }
  0xa5   :  { %2655 = vxpose.xlu0.c.b16.cont [3/8] (narrow) %v2893_v12, 16 }
  0xa7   :  { %2638 = vxpose.xlu1.c.b16.cont [2/8] (narrow) %v2900_v15, 16 }
  0xa8   :  { %2801 = vmatmul.mubr.msk.bf16.gmra.mrb[12].mxu0 %vm314_vm1, %v293_v13 }
  0xa9   :  { %2818 = vmatmul.mubr.msk.bf16.gmra.mrb[12].mxu1 %vm314_vm1, %v293_v13  ;;  %2656 = vxpose.xlu0.c.b16.cont [4/8] (narrow) %v2894_v14, 16 }
  0xaa   :  { %448 = vmatprep.mubr.bf16.mxu0 %v5520_v0  ;;  %641 = vmatprep.mubr.bf16.mxu1 %v5520_v0 }
  0xab   :  { %2639 = vxpose.xlu1.c.b16.cont [3/8] (narrow) %v2901_v17, 16 }
  0xad   :  { %2657 = vxpose.xlu0.c.b16.cont [5/8] (narrow) %v2895_v16, 16 }
  0xaf   :  { %2640 = vxpose.xlu1.c.b16.cont [4/8] (narrow) %v2902_v20, 16 }
  0xb0   :  { %2802 = vmatmul.mubr.msk.bf16.gmra.mrb[16].mxu0 %vm314_vm1, %v294_v18 }
  0xb1   :  { %2819 = vmatmul.mubr.msk.bf16.gmra.mrb[16].mxu1 %vm314_vm1, %v294_v18  ;;  %2658 = vxpose.xlu0.c.b16.cont [6/8] (narrow) %v2896_v19, 16 }
  0xb2   :  { %458 = vmatprep.mubr.bf16.mxu0 %v5520_v0  ;;  %651 = vmatprep.mubr.bf16.mxu1 %v5520_v0 }
  0xb3   :  { %2641 = vxpose.xlu1.c.b16.cont [5/8] (narrow) %v2903_v22, 16 }
  0xb5   :  { %2659 = vxpose.xlu0.c.b16.cont [7/8] (narrow) %v2897_v21, 16 }
  0xb7   :  { %2642 = vxpose.xlu1.c.b16.cont [6/8] (narrow) %v2904_v25, 16 }
  0xb8   :  { %2803 = vmatmul.mubr.msk.bf16.gmra.mrb[20].mxu0 %vm314_vm1, %v295_v23 }
  0xb9   :  { %2820 = vmatmul.mubr.msk.bf16.gmra.mrb[20].mxu1 %vm314_vm1, %v295_v23  ;;  %2660 = vxpose.xlu0.c.b16.end [8/8] (narrow) %v2898_v24, 16 }
  0xba   :  { %468 = vmatprep.mubr.bf16.mxu0 %v5520_v0  ;;  %661 = vmatprep.mubr.bf16.mxu1 %v5520_v0 }
  0xbb   :  { %2643 = vxpose.xlu1.c.b16.cont [7/8] (narrow) %v2905_v26, 16 }
  0xbf   :  { %2644 = vxpose.xlu1.c.b16.end [8/8] (narrow) %v2906_v28, 16 }
  0xc0   :  { %2804 = vmatmul.mubr.msk.bf16.gmra.mrb[24].mxu0 %vm314_vm1, %v296_v27 }
  0xc1   :  { %2821 = vmatmul.mubr.msk.bf16.gmra.mrb[24].mxu1 %vm314_vm1, %v296_v27  ;;  %478 = vmatprep.mubr.bf16.mxu0 %v5520_v0 }
  0xc2   :  { %671 = vmatprep.mubr.bf16.mxu1 %v5520_v0  ;;  %2538 = vperm.xlu0 %2884, %v2535_v29  }
  0xc3   :  { %2758 = vperm.xlu1 %2885, %v3538_v2   ;;  %v307_v2 = vpop.trf.xlu1 }
  0xc7   :  { %2772 = vperm.xlu1 %2885, %v2769_v31   ;;  %v308_v33 = vpop.trf.xlu1 }
  0xc8   :  { %2805 = vmatmul.mubr.msk.bf16.gmra.mrb[28].mxu0 %vm314_vm1, %v297_v30 }
  0xc9   :  { %2822 = vmatmul.mubr.msk.bf16.gmra.mrb[28].mxu1 %vm314_vm1, %v297_v30  ;;  %488 = vmatprep.mubr.bf16.mxu0 %v5520_v0 }
  0xca   :  { %681 = vmatprep.mubr.bf16.mxu1 %v5520_v0 }
  0xcb   :  { %v309_v34 = vpop.trf.xlu1 }
  0xcf   :  { %v310_v35 = vpop.trf.xlu1 }
  0xd0   :  { %2806 = vmatmul.mubr.msk.bf16.gmra.mrb[32].mxu0 %vm314_vm1, %v306_v32 }
  0xd1   :  { %2823 = vmatmul.mubr.msk.bf16.gmra.mrb[32].mxu1 %vm314_vm1, %v306_v32  ;;  %498 = vmatprep.mubr.bf16.mxu0 %v5520_v0 }
  0xd2   :  { %691 = vmatprep.mubr.bf16.mxu1 %v5520_v0 }
  0xd3   :  { %v311_v36 = vpop.trf.xlu1 }
  0xd7   :  { %v312_v37 = vpop.trf.xlu1 }
  0xd8   :  { %2807 = vmatmul.mubr.msk.bf16.gmra.mrb[36].mxu0 %vm314_vm1, %v307_v2 }
  0xd9   :  { %2824 = vmatmul.mubr.msk.bf16.gmra.mrb[36].mxu1 %vm314_vm1, %v307_v2  ;;  %508 = vmatprep.mubr.bf16.mxu0 %v5520_v0 }
  0xda   :  { %701 = vmatprep.mubr.bf16.mxu1 %v5520_v0 }
  0xdb   :  { %v313_v38 = vpop.trf.xlu1 }
  0xe0   :  { %2808 = vmatmul.mubr.msk.bf16.gmra.mrb[40].mxu0 %vm314_vm1, %v308_v33 }
  0xe1   :  { %2825 = vmatmul.mubr.msk.bf16.gmra.mrb[40].mxu1 %vm314_vm1, %v308_v33  ;;  %518 = vmatprep.mubr.bf16.mxu0 %v5520_v0 }
  0xe2   :  { %711 = vmatprep.mubr.bf16.mxu1 %v5520_v0 }
  0xe8   :  { %2809 = vmatmul.mubr.msk.bf16.gmra.mrb[44].mxu0 %vm314_vm1, %v309_v34 }
  0xe9   :  { %2826 = vmatmul.mubr.msk.bf16.gmra.mrb[44].mxu1 %vm314_vm1, %v309_v34  ;;  %528 = vmatprep.mubr.bf16.mxu0 %v5520_v0  ;;  %v138_v34 = vpop.permute.xlu0 %137 }
  0xea   :  { %721 = vmatprep.mubr.bf16.mxu1 %v5520_v0 }
  0xf0   :  { %2810 = vmatmul.mubr.msk.bf16.gmra.mrb[48].mxu0 %vm314_vm1, %v310_v35 }
  0xf1   :  { %2827 = vmatmul.mubr.msk.bf16.gmra.mrb[48].mxu1 %vm314_vm1, %v310_v35  ;;  %538 = vmatprep.mubr.bf16.mxu0 %v5520_v0 }
  0xf2   :  { %731 = vmatprep.mubr.bf16.mxu1 %v5520_v0 }
  0xf8   :  { %2811 = vmatmul.mubr.msk.bf16.gmra.mrb[52].mxu0 %vm314_vm1, %v311_v36 }
  0xf9   :  { %2828 = vmatmul.mubr.msk.bf16.gmra.mrb[52].mxu1 %vm314_vm1, %v311_v36  ;;  %548 = vmatprep.mubr.bf16.mxu0 %v5520_v0 }
  0xfa   :  { %741 = vmatprep.mubr.bf16.mxu1 %v5520_v0 }
 0x100   :  { %2812 = vmatmul.mubr.msk.bf16.gmra.mrb[56].mxu0 %vm314_vm1, %v312_v37 }
 0x101   :  { %2829 = vmatmul.mubr.msk.bf16.gmra.mrb[56].mxu1 %vm314_vm1, %v312_v37  ;;  %558 = vmatprep.mubr.bf16.mxu0 %v5520_v0 }
 0x102   :  { %751 = vmatprep.mubr.bf16.mxu1 %v5520_v0 }
 0x108   :  { %2813 = vmatmul.mubr.msk.bf16.gmra.mrb[60].mxu0 %vm314_vm1, %v313_v38 }
 0x109   :  { %2830 = vmatmul.mubr.msk.bf16.gmra.mrb[60].mxu1 %vm314_vm1, %v313_v38 }
 0x163   :  { %v410_v42 = vpop.f32.mrb[0].mxu0 }
 0x164   :  { %v603_v43 = vpop.f32.mrb[0].mxu1  ;;  %v3800_v44 = vadd.f32 %v410_v42, %v118_v39  ;;  %v412_v46 = vpop.f32.mrb[1].mxu0 }
 0x165   :  { %v3802_v45 = vadd.f32 %v603_v43, %v118_v39  ;;  %v605_v47 = vpop.f32.mrb[1].mxu1  ;;  %v3804_v48 = vadd.f32 %v412_v46, %v118_v39  ;;  %v414_v50 = vpop.f32.mrb[2].mxu0 }
 0x166   :  { %v3806_v49 = vadd.f32 %v605_v47, %v118_v39  ;;  %v607_v51 = vpop.f32.mrb[2].mxu1  ;;  %v762_v52 = vsub.f32 0.0, %v3800_v44  ;;  %v3810_v54 = vadd.f32 %v414_v50, %v123_v40  ;;  %v416_v56 = vpop.f32.mrb[3].mxu0 }
 0x167   :  { %v764_v53 = vsub.f32 0.0, %v3802_v45  ;;  %v3812_v55 = vadd.f32 %v607_v51, %v123_v40  ;;  %v609_v57 = vpop.f32.mrb[3].mxu1  ;;  %v763_v58 = vsub.f32 0.0, %v3804_v48  ;;  %v3816_v60 = vadd.f32 %v416_v56, %v123_v40 }
 0x168   :  { %v765_v59 = vsub.f32 0.0, %v3806_v49  ;;  %v3818_v61 = vadd.f32 %v609_v57, %v123_v40  ;;  %v890_v62 = vmul.f32 1.442695, %v762_v52  ;;  %v766_v1 = vsub.f32 0.0, %v3810_v54 }
 0x169   :  { %v894_v63 = vmul.f32 1.442695, %v764_v53  ;;  %v768_v3 = vsub.f32 0.0, %v3812_v55  ;;  %v892_v4 = vmul.f32 1.442695, %v763_v58  ;;  %v767_v6 = vsub.f32 0.0, %v3816_v60 }
 0x16a   :  { %v896_v5 = vmul.f32 1.442695, %v765_v59  ;;  %v769_v7 = vsub.f32 0.0, %v3818_v61  ;;  %2910 = vpow2.f32 %v890_v62  ;;  %v898_v9 = vmul.f32 1.442695, %v766_v1 }
 0x16b   :  { %2912 = vpow2.f32 %v894_v63  ;;  %v902_v10 = vmul.f32 1.442695, %v768_v3  ;;  %v420_v11 = vpop.f32.mrb[4].mxu0  ;;  %v900_v13 = vmul.f32 1.442695, %v767_v6  ;;  %v143_v6 = vpop.permute.xlu0 %142 }
 0x16c   :  { %v613_v12 = vpop.f32.mrb[4].mxu1  ;;  %2914 = vpow2.f32 %v892_v4  ;;  %v3826_v14 = vadd.f32 %v420_v11, %v128_v41  ;;  %v422_v16 = vpop.f32.mrb[5].mxu0  ;;  %v904_v18 = vmul.f32 1.442695, %v769_v7 }
 0x16d   :  { %v3828_v15 = vadd.f32 %v613_v12, %v128_v41  ;;  %v615_v17 = vpop.f32.mrb[5].mxu1  ;;  %2916 = vpow2.f32 %v896_v5  ;;  %v3830_v19 = vadd.f32 %v422_v16, %v128_v41  ;;  %v424_v21 = vpop.f32.mrb[6].mxu0 }
 0x16e   :  { %v3832_v20 = vadd.f32 %v615_v17, %v128_v41  ;;  %v617_v22 = vpop.f32.mrb[6].mxu1  ;;  %2918 = vpow2.f32 %v898_v9  ;;  %v770_v23 = vsub.f32 0.0, %v3826_v14  ;;  %v3837_v25 = vadd.f32 %v424_v21, %v3824_v8  ;;  %v426_v26 = vpop.f32.mrb[7].mxu0 }
 0x16f   :  { %v772_v24 = vsub.f32 0.0, %v3828_v15  ;;  %v619_v27 = vpop.f32.mrb[7].mxu1  ;;  %2920 = vpow2.f32 %v902_v10  ;;  %v771_v28 = vsub.f32 0.0, %v3830_v19  ;;  %v3843_v39 = vadd.f32 %v617_v22, %v3824_v8 }
 0x170   :  { %v773_v29 = vsub.f32 0.0, %v3832_v20  ;;  %2922 = vpow2.f32 %v900_v13  ;;  %v906_v30 = vmul.f32 1.442695, %v770_v23  ;;  %v774_v32 = vsub.f32 0.0, %v3837_v25 }
 0x171   :  { %v910_v31 = vmul.f32 1.442695, %v772_v24  ;;  %2924 = vpow2.f32 %v904_v18  ;;  %v908_v2 = vmul.f32 1.442695, %v771_v28  ;;  %v3846_v52 = vadd.f32 %v426_v26, %v3824_v8 }
 0x172   :  { %v912_v33 = vmul.f32 1.442695, %v773_v29  ;;  %2926 = vpow2.f32 %v906_v30  ;;  %v914_v35 = vmul.f32 1.442695, %v774_v32  ;;  %v776_v63 = vsub.f32 0.0, %v3843_v39 }
 0x173   :  { %2928 = vpow2.f32 %v910_v31  ;;  %v430_v36 = vpop.f32.mrb[8].mxu0  ;;  %v3850_v4 = vadd.f32 %v619_v27, %v3824_v8  ;;  %v775_v9 = vsub.f32 0.0, %v3846_v52 }
 0x174   :  { %v623_v37 = vpop.f32.mrb[8].mxu1  ;;  %v2911_v38 = vpop.eup %2910  ;;  %2930 = vpow2.f32 %v908_v2  ;;  %v3853_v12 = vadd.f32 %v430_v36, %v138_v34  ;;  %v918_v21 = vmul.f32 1.442695, %v776_v63 }
 0x175   :  { %v432_v40 = vpop.f32.mrb[9].mxu0  ;;  %v625_v41 = vpop.f32.mrb[9].mxu1  ;;  %v1146_v43 = vadd.f32 1.0, %v2911_v38  ;;  %2932 = vpow2.f32 %v912_v33  ;;  %v3855_v22 = vadd.f32 %v623_v37, %v138_v34  ;;  %v777_v27 = vsub.f32 0.0, %v3850_v4 }
 0x176   :  { %v2913_v42 = vpop.eup %2912  ;;  %v434_v46 = vpop.f32.mrb[10].mxu0  ;;  %2934 = vpow2.f32 %v914_v35  ;;  %v3862_v28 = vadd.f32 %v432_v40, %v138_v34  ;;  %v916_v2 = vmul.f32 1.442695, %v775_v9  ;;  %v3868_v33 = vadd.f32 %v625_v41, %v138_v34 }
 0x177   :  { %v627_v47 = vpop.f32.mrb[10].mxu1  ;;  %v2915_v50 = vpop.eup %2914  ;;  %v1148_v51 = vadd.f32 1.0, %v2913_v42  ;;  %2936 = vrcp.f32 %v1146_v43  ;;  %v778_v40 = vsub.f32 0.0, %v3853_v12  ;;  %v3875_v42 = vadd.f32 %v434_v46, %v143_v6 }
 0x178   :  { %v436_v53 = vpop.f32.mrb[11].mxu0  ;;  %v2917_v56 = vpop.eup %2916  ;;  %v1147_v57 = vadd.f32 1.0, %v2915_v50  ;;  %5644 = vst [vmem:[#allocation2_spill] sm:$0xff] %v3868_v33  ;;  %v920_v46 = vmul.f32 1.442695, %v777_v27 }
 0x179   :  { %v629_v58 = vpop.f32.mrb[11].mxu1  ;;  %v2919_v59 = vpop.eup %2918  ;;  %2938 = vrcp.f32 %v1148_v51  ;;  %v1149_v62 = vadd.f32 1.0, %v2917_v56  ;;  %5645 = vst [vmem:[#allocation3_spill] sm:$0xff] %v3875_v42  ;;  %v780_v51 = vsub.f32 0.0, %v3855_v22  ;;  %v3878_v56 = vadd.f32 %v627_v47, %v143_v6 }
 0x17a   :  { %v2921_v1 = vpop.eup %2920  ;;  %2940 = vrcp.f32 %v1147_v57  ;;  %v1150_v3 = vadd.f32 1.0, %v2919_v59  ;;  %v779_v57 = vsub.f32 0.0, %v3862_v28  ;;  %v3883_v59 = vadd.f32 %v436_v53, %v143_v6  ;;  %v148_v63 = vpop.permute.xlu0 %147 }
 0x17b   :  { %v2923_v5 = vpop.eup %2922  ;;  %2942 = vrcp.f32 %v1149_v62  ;;  %v1152_v7 = vadd.f32 1.0, %v2921_v1  ;;  %v440_v13 = vpop.f32.mrb[12].mxu0  ;;  %5646 = vst [vmem:[#allocation4_spill] sm:$0xff] %v3878_v56  ;;  %v781_v1 = vsub.f32 0.0, %v3868_v33  ;;  %v922_v47 = vmul.f32 1.442695, %v778_v40 }
 0x17c   :  { %v2925_v10 = vpop.eup %2924  ;;  %2944 = vrcp.f32 %v1150_v3  ;;  %v1151_v11 = vadd.f32 1.0, %v2923_v5  ;;  %v633_v16 = vpop.f32.mrb[12].mxu1  ;;  %5647 = vst [vmem:[#allocation5_spill] sm:$0xff] %v3883_v59  ;;  %v3888_v3 = vadd.f32 %v629_v58, %v143_v6  ;;  %v3893_v9 = vadd.f32 %v440_v13, %v148_v63 }
 0x17d   :  { %v2927_v17 = vpop.eup %2926  ;;  %2946 = vrcp.f32 %v1152_v7  ;;  %v1153_v18 = vadd.f32 1.0, %v2925_v10  ;;  %v3857_v8 = vpop.f32.mrb[13].mxu0  ;;  %v782_v7 = vsub.f32 0.0, %v3875_v42  ;;  %v924_v27 = vmul.f32 1.442695, %v779_v57 }
 0x17e   :  { %v3859_v23 = vpop.f32.mrb[13].mxu1  ;;  %v2929_v24 = vpop.eup %2928  ;;  %2948 = vrcp.f32 %v1151_v11  ;;  %v1154_v26 = vadd.f32 1.0, %v2927_v17  ;;  %5648 = vst [vmem:[#allocation6_spill] sm:$0xff] %v3888_v3  ;;  %5649 = vst [vmem:[#allocation7_spill] sm:$0xff] %v3893_v9  ;;  %v926_v17 = vmul.f32 1.442695, %v780_v51 }
 0x17f   :  { %v3864_v29 = vpop.f32.mrb[14].mxu0  ;;  %v3866_v30 = vpop.f32.mrb[14].mxu1  ;;  %2950 = vrcp.f32 %v1153_v18  ;;  %v1156_v32 = vadd.f32 1.0, %v2929_v24  ;;  %v784_v18 = vsub.f32 0.0, %v3878_v56  ;;  %v3900_v24 = vadd.f32 %v633_v16, %v148_v63 }
 0x180   :  { %v2931_v31 = vpop.eup %2930  ;;  %v3870_v35 = vpop.f32.mrb[15].mxu0  ;;  %2952 = vrcp.f32 %v1154_v26  ;;  %v783_v13 = vsub.f32 0.0, %v3883_v59 }
 0x181   :  { %v3872_v36 = vpop.f32.mrb[15].mxu1  ;;  %v2933_v37 = vpop.eup %2932  ;;  %v1155_v38 = vadd.f32 1.0, %v2931_v31  ;;  %2954 = vrcp.f32 %v1156_v32  ;;  %5650 = vst [vmem:[#allocation8_spill] sm:$0xff] %v3900_v24  ;;  %v788_v57 = vsub.f32 0.0, %v3900_v24 }
 0x182   :  { %v2935_v43 = vpop.eup %2934  ;;  %v1157_v50 = vadd.f32 1.0, %v2933_v37 }
 0x183   :  { %v3880_v34 = vpop.eup %2936  ;;  %2956 = vrcp.f32 %v1155_v38  ;;  %v1158_v41 = vadd.f32 1.0, %v2935_v43  ;;  %v3895_v10 = vpop.f32.mrb[16].mxu0  ;;  %v785_v38 = vsub.f32 0.0, %v3888_v3  ;;  %v3927_v3 = vadd.f32 %v3857_v8, %v148_v63 }
 0x184   :  { %v3885_v62 = vpop.eup %2938  ;;  %2958 = vrcp.f32 %v1157_v50  ;;  %v3897_v53 = vpop.f32.mrb[16].mxu1  ;;  %v786_v50 = vsub.f32 0.0, %v3893_v9  ;;  %v3944_v8 = vadd.f32 %v3859_v23, %v148_v63  ;;  %v3952_v59 = vmul.f32 %v3880_v34, %v3800_v44 }
 0x185   :  { %v3890_v5 = vpop.eup %2940  ;;  %2960 = vrcp.f32 %v1158_v41  ;;  %v3902_v58 = vpop.f32.mrb[17].mxu0  ;;  %v934_v41 = vmul.f32 1.442695, %v784_v18  ;;  %v936_v56 = vmul.f32 1.442695, %v785_v38  ;;  %5651 = vst [vmem:[#allocation9_spill] sm:$0xff] %v3927_v3  ;;  %v3961_v23 = vmul.f32 %v3885_v62, %v3802_v45 }
 0x186   :  { %v2943_v11 = vpop.eup %2942  ;;  %2962 = vpow2.f32 %v918_v21  ;;  %v3904_v6 = vpop.f32.mrb[17].mxu1  ;;  %v928_v21 = vmul.f32 1.442695, %v781_v1  ;;  %v932_v1 = vmul.f32 1.442695, %v783_v13  ;;  %5652 = vst [vmem:[#allocation10_spill] sm:$0xff] %v3944_v8  ;;  %v3968_v44 = vmul.f32 %v3890_v5, %v3804_v48 }
 0x187   :  { %v2945_v26 = vpop.eup %2944  ;;  %2964 = vpow2.f32 %v916_v2  ;;  %v3907_v31 = vpop.f32.mrb[18].mxu0  ;;  %v930_v2 = vmul.f32 1.442695, %v782_v7  ;;  %v938_v7 = vmul.f32 1.442695, %v786_v50  ;;  %5654 = vst [vmem:[#allocation12_spill] sm:$0xff] %v3952_v59 }
 0x188   :  { %v3909_v32 = vpop.f32.mrb[18].mxu1  ;;  %v2947_v37 = vpop.eup %2946  ;;  %2966 = vpow2.f32 %v920_v46  ;;  %5656 = vst [vmem:[#allocation14_spill] sm:$0xff] %v3961_v23  ;;  %v3964_v63 = vmul.f32 %v2945_v26, %v3810_v54  ;;  %5658 = vst [vmem:[#allocation16_spill] sm:$0xff] %v3968_v44  ;;  %v789_v62 = vsub.f32 0.0, %v3944_v8 }
 0x189   :  { %v3912_v16 = vpop.f32.mrb[19].mxu0  ;;  %v3914_v40 = vpop.f32.mrb[19].mxu1  ;;  %2968 = vpow2.f32 %v922_v47  ;;  %v3974_v45 = vmul.f32 %v2947_v37, %v3812_v55 }
 0x18a   :  { %v3916_v43 = vpop.eup %2948  ;;  %2970 = vpow2.f32 %v926_v17  ;;  %5657 = vst [vmem:[#allocation15_spill] sm:$0xff] %v3964_v63 }
 0x18b   :  { %v3919_v51 = vpop.eup %2950  ;;  %2972 = vpow2.f32 %v924_v27  ;;  %v3931_v9 = vpop.f32.mrb[20].mxu0  ;;  %v942_v27 = vmul.f32 1.442695, %v788_v57  ;;  %5660 = vst [vmem:[#allocation18_spill] sm:$0xff] %v3974_v45 }
 0x18c   :  { %v3922_v46 = vpop.eup %2952  ;;  %2974 = vpow2.f32 %v928_v21  ;;  %v3933_v17 = vpop.f32.mrb[20].mxu1 }
 0x18d   :  { %v3924_v0 = vpop.eup %2954  ;;  %2976 = vpow2.f32 %v930_v2  ;;  %v3937_v13 = vpop.f32.mrb[21].mxu0 }
 0x18e   :  { %v3929_v47 = vpop.eup %2956  ;;  %2978 = vpow2.f32 %v934_v41  ;;  %v3939_v24 = vpop.f32.mrb[21].mxu1  ;;  %v787_v41 = vsub.f32 0.0, %v3927_v3 }
 0x18f   :  { %v3935_v18 = vpop.eup %2958  ;;  %2980 = vpow2.f32 %v932_v1  ;;  %v3946_v38 = vpop.f32.mrb[22].mxu0 }
 0x190   :  { %v3941_v21 = vpop.eup %2960  ;;  %v3948_v2 = vpop.f32.mrb[22].mxu1  ;;  %2982 = vpow2.f32 %v936_v56  ;;  %v3971_v56 = vmul.f32 %v2943_v11, %v3806_v49  ;;  %v3977_v48 = vmul.f32 1.442695, %v787_v41  ;;  %v1530_v11 = vpack.c.bf16 %v3964_v63, %v3952_v59 }
 0x191   :  { %5653 = vst [vmem:[#allocation11_spill] sm:$0xff] %v3948_v2  ;;  %v2963_v50 = vpop.eup %2962  ;;  %v3955_v57 = vpop.f32.mrb[23].mxu0  ;;  %2984 = vpow2.f32 %v938_v7  ;;  %v4004_v63 = vmul.f32 1.442695, %v789_v62 }
 0x192   :  { %v3957_v42 = vpop.f32.mrb[23].mxu1  ;;  %v2965_v1 = vpop.eup %2964  ;;  %v1160_v2 = vadd.f32 1.0, %v2963_v50  ;;  %5659 = vst [vmem:[#allocation17_spill] sm:$0xff] %v3971_v56  ;;  %2986 = vpow2.f32 %v942_v27 }
 0x193   :  { %5655 = vst [vmem:[#allocation13_spill] sm:$0xff] %v3957_v42  ;;  %v2967_v33 = vpop.eup %2966  ;;  %v1159_v34 = vadd.f32 1.0, %v2965_v1  ;;  %v153_v42 = vpop.permute.xlu1 %152 }
 0x194   :  { %v2969_v3 = vpop.eup %2968  ;;  %2988 = vrcp.f32 %v1160_v2  ;;  %v1161_v54 = vadd.f32 1.0, %v2967_v33  ;;  %v158_v7 = vpop.permute.xlu0 %157  ;;  %v3980_v49 = vadd.f32 %v3864_v29, %v153_v42  ;;  %v3985_v37 = vadd.f32 %v3866_v30, %v153_v42 }
 0x195   :  { %v2971_v26 = vpop.eup %2970  ;;  %2990 = vrcp.f32 %v1159_v34  ;;  %v1162_v50 = vadd.f32 1.0, %v2969_v3  ;;  %v3987_v33 = vpop.f32.mrb[24].mxu0  ;;  %v3993_v3 = vmul.f32 %v3916_v43, %v3816_v60  ;;  %v3996_v41 = vadd.f32 %v3870_v35, %v153_v42 }
 0x196   :  { %5661 = vst [vmem:[#allocation19_spill] sm:$0xff] %v3980_v49  ;;  %v2973_v5 = vpop.eup %2972  ;;  %2992 = vrcp.f32 %v1161_v54  ;;  %v1164_v55 = vadd.f32 1.0, %v2971_v26  ;;  %v3989_v27 = vpop.f32.mrb[24].mxu1  ;;  %v1532_v54 = vpack.c.bf16 %v3974_v45, %v3961_v23  ;;  %v4012_v35 = vmul.f32 %v3919_v51, %v3818_v61 }
 0x197   :  { %v2975_v2 = vpop.eup %2974  ;;  %5662 = vst [vmem:[#allocation20_spill] sm:$0xff] %v3993_v3  ;;  %2994 = vrcp.f32 %v1162_v50  ;;  %v1163_v29 = vadd.f32 1.0, %v2973_v5  ;;  %v3998_v1 = vpop.f32.mrb[25].mxu0  ;;  %v790_v5 = vsub.f32 0.0, %v3980_v49  ;;  %v4021_v23 = vadd.f32 %v3872_v36, %v153_v42 }
 0x198   :  { %v4000_v34 = vpop.f32.mrb[25].mxu1  ;;  %v2977_v30 = vpop.eup %2976  ;;  %2996 = vrcp.f32 %v1164_v55  ;;  %v1165_v26 = vadd.f32 1.0, %v2975_v2  ;;  %5664 = vst [vmem:[#allocation22_spill] sm:$0xff] %v4012_v35  ;;  %v792_v2 = vsub.f32 0.0, %v3985_v37  ;;  %v791_v51 = vsub.f32 0.0, %v3996_v41 }
 0x199   :  { %v4006_v59 = vpop.f32.mrb[26].mxu0  ;;  %v4008_v60 = vpop.f32.mrb[26].mxu1  ;;  %2998 = vrcp.f32 %v1163_v29  ;;  %v1166_v50 = vadd.f32 1.0, %v2977_v30  ;;  %v4025_v29 = vadd.f32 %v3895_v10, %v158_v7  ;;  %v1533_v10 = vpack.c.bf16 %v4012_v35, %v3971_v56 }
 0x19a   :  { %5663 = vst [vmem:[#allocation21_spill] sm:$0xff] %v4008_v60  ;;  %v2979_v43 = vpop.eup %2978  ;;  %v4015_v8 = vpop.f32.mrb[27].mxu0  ;;  %3000 = vrcp.f32 %v1165_v26  ;;  %v1531_v26 = vpack.c.bf16 %v3993_v3, %v3968_v44 }
 0x19b   :  { %v4017_v45 = vpop.f32.mrb[27].mxu1  ;;  %v2981_v55 = vpop.eup %2980  ;;  %v1168_v62 = vadd.f32 1.0, %v2979_v43  ;;  %3002 = vrcp.f32 %v1166_v50  ;;  %v4033_v50 = vadd.f32 %v3902_v58, %v158_v7  ;;  %v946_v58 = vmul.f32 1.442695, %v790_v5  ;;  %1649 = vmatprep.subr.bf16.mxu1 %v1533_v10 }
 0x19c   :  { %5665 = vst [vmem:[#allocation23_spill] sm:$0xff] %v4017_v45  ;;  %v2983_v60 = vpop.eup %2982  ;;  %v1167_v61 = vadd.f32 1.0, %v2981_v55  ;;  %v4028_v45 = vadd.f32 %v3897_v53, %v158_v7  ;;  %v163_v36 = vpop.permute.xlu0 %162  ;;  %v793_v53 = vsub.f32 0.0, %v4021_v23  ;;  %1606 = vmatprep.subr.bf16.mxu0 %v1531_v26  ;;  %v794_v44 = vsub.f32 0.0, %v4025_v29  ;;  %1650 = vmatpush1.bf16.msra.mxu1 %v1532_v54 }
 0x19d   :  { %v2985_v30 = vpop.eup %2984  ;;  %3004 = vrcp.f32 %v1168_v62  ;;  %v1169_v49 = vadd.f32 1.0, %v2983_v60  ;;  %5667 = vst [vmem:[#allocation25_spill] sm:$0xff] %v4033_v50  ;;  %v4041_v62 = vadd.f32 %v3904_v6, %v158_v7  ;;  %v4043_v3 = vpop.f32.mrb[28].mxu0  ;;  %v4049_v35 = vadd.f32 %v3907_v31, %v163_v36  ;;  %1607 = vmatpush1.bf16.msra.mxu0 %v1530_v11 }
 0x19e   :  { %5666 = vst [vmem:[#allocation24_spill] sm:$0xff] %v4028_v45  ;;  %v2987_v43 = vpop.eup %2986  ;;  %3006 = vrcp.f32 %v1167_v61  ;;  %v1170_v42 = vadd.f32 1.0, %v2985_v30  ;;  %v4045_v61 = vpop.f32.mrb[28].mxu1  ;;  %v950_v7 = vmul.f32 1.442695, %v792_v2  ;;  %v796_v26 = vsub.f32 0.0, %v4028_v45 }
 0x19f   :  { %v4037_v55 = vpop.eup %2988  ;;  %3008 = vrcp.f32 %v1169_v49  ;;  %v1172_v60 = vadd.f32 1.0, %v2987_v43  ;;  %5668 = vst [vmem:[#allocation26_spill] sm:$0xff] %v4041_v62  ;;  %v4051_v49 = vpop.f32.mrb[29].mxu0  ;;  %v4057_v56 = vadd.f32 %v3909_v32, %v163_v36  ;;  %v948_v11 = vmul.f32 1.442695, %v791_v51 }
 0x1a0   :  { %v2991_v30 = vpop.eup %2990  ;;  %3010 = vrcp.f32 %v1170_v42  ;;  %v4053_v43 = vpop.f32.mrb[29].mxu1  ;;  %v795_v10 = vsub.f32 0.0, %v4033_v50  ;;  %v4078_v54 = vmul.f32 %v3922_v46, %v3826_v14  ;;  %v4093_v14 = vmul.f32 %v3935_v18, %v3832_v20 }
 0x1a1   :  { %v2993_v6 = vpop.eup %2992  ;;  %3012 = vrcp.f32 %v1172_v60  ;;  %v4059_v5 = vpop.f32.mrb[30].mxu0  ;;  %v4068_v60 = vadd.f32 %v3912_v16, %v163_v36  ;;  %v4086_v16 = vmul.f32 %v3929_v47, %v3830_v19  ;;  %v958_v46 = vmul.f32 1.442695, %v796_v26 }
 0x1a2   :  { %v4061_v42 = vpop.f32.mrb[30].mxu1  ;;  %v4063_v31 = vpop.eup %2994  ;;  %3014 = vpow2.f32 %v3977_v48  ;;  %5672 = vst [vmem:[#allocation30_spill] sm:$0xff] %v4078_v54  ;;  %v797_v48 = vsub.f32 0.0, %v4041_v62  ;;  %5674 = vst [vmem:[#allocation32_spill] sm:$0xff] %v4093_v14  ;;  %v956_v19 = vmul.f32 1.442695, %v795_v10  ;;  %v4108_v20 = vmul.f32 %v3941_v21, %v3837_v25 }
 0x1a3   :  { %5669 = vst [vmem:[#allocation27_spill] sm:$0xff] %v4061_v42  ;;  %v4070_v2 = vpop.f32.mrb[31].mxu0  ;;  %v4072_v45 = vpop.f32.mrb[31].mxu1  ;;  %3016 = vpow2.f32 %v4004_v63  ;;  %v952_v42 = vmul.f32 1.442695, %v793_v53  ;;  %5673 = vst [vmem:[#allocation31_spill] sm:$0xff] %v4086_v16 }
 0x1a4   :  { %5670 = vst [vmem:[#allocation28_spill] sm:$0xff] %v4070_v2  ;;  %5671 = vst [vmem:[#allocation29_spill] sm:$0xff] %v4072_v45  ;;  %v4074_v32 = vpop.eup %2996  ;;  %3018 = vpow2.f32 %v946_v58  ;;  %v954_v2 = vmul.f32 1.442695, %v794_v44  ;;  %v798_v45 = vsub.f32 0.0, %v4049_v35  ;;  %v800_v63 = vsub.f32 0.0, %v4057_v56  ;;  %v4098_v62 = vpop.permute.xlu0 %167 }
 0x1a5   :  { %v4082_v51 = vpop.eup %2998  ;;  %3020 = vpow2.f32 %v950_v7  ;;  %v799_v47 = vsub.f32 0.0, %v4068_v60  ;;  %v4102_v44 = vadd.f32 %v3914_v40, %v163_v36  ;;  %5675 = vst [vmem:[#allocation33_spill] sm:$0xff] %v4108_v20  ;;  %v960_v18 = vmul.f32 1.442695, %v797_v48  ;;  %v4114_v26 = vpop.f32.mrb[32].mxu0 }
 0x1a6   :  { %v4089_v50 = vpop.eup %3000  ;;  %3022 = vpow2.f32 %v948_v11  ;;  %v4112_v7 = vadd.f32 %v3931_v9, %v4098_v62  ;;  %v4116_v11 = vpop.f32.mrb[32].mxu1  ;;  %v4121_v40 = vmul.f32 %v2991_v30, %v3846_v52  ;;  %v4124_v36 = vmul.f32 %v2993_v6, %v3850_v4 }
 0x1a7   :  { %v4096_v53 = vpop.eup %3002  ;;  %3024 = vpow2.f32 %v952_v42  ;;  %5677 = vst [vmem:[#allocation35_spill] sm:$0xff] %v4116_v11  ;;  %v962_v25 = vmul.f32 1.442695, %v798_v45  ;;  %v4126_v21 = vpop.f32.mrb[33].mxu0  ;;  %v4134_v48 = vmul.f32 %v4037_v55, %v3843_v39  ;;  %v966_v11 = vmul.f32 1.442695, %v800_v63 }
 0x1a8   :  { %v4104_v58 = vpop.eup %3004  ;;  %5676 = vst [vmem:[#allocation34_spill] sm:$0xff] %v4112_v7  ;;  %5678 = vst [vmem:[#allocation36_spill] sm:$0xff] %v4121_v40  ;;  %3026 = vpow2.f32 %v954_v2  ;;  %v4128_v42 = vpop.f32.mrb[33].mxu1  ;;  %v4138_v52 = vadd.f32 %v3933_v17, %v4098_v62  ;;  %v964_v6 = vmul.f32 1.442695, %v799_v47  ;;  %v801_v2 = vsub.f32 0.0, %v4102_v44 }
 0x1a9   :  { %v4118_v10 = vpop.eup %3006  ;;  %5679 = vst [vmem:[#allocation37_spill] sm:$0xff] %v4124_v36  ;;  %5680 = vst [vmem:[#allocation38_spill] sm:$0xff] %v4128_v42  ;;  %3028 = vpow2.f32 %v958_v46  ;;  %v4140_v4 = vpop.f32.mrb[34].mxu0  ;;  %v4149_v39 = vadd.f32 %v3937_v13, %v4098_v62  ;;  %v4159_v63 = vmul.f32 %v3924_v0, %v3828_v15  ;;  %v1535_v13 = vpack.c.bf16 %v4121_v40, %v4086_v16  ;;  %v5696_v16 = vld [vmem:[#allocation11_spill] sm:$0xff] }
 0x1aa   :  { %v4130_v9 = vpop.eup %3008  ;;  %5681 = vst [vmem:[#allocation39_spill] sm:$0xff] %v4134_v48  ;;  %5682 = vst [vmem:[#allocation40_spill] sm:$0xff] %v4140_v4  ;;  %v4142_v30 = vpop.f32.mrb[34].mxu1  ;;  %3030 = vpow2.f32 %v956_v19  ;;  %v802_v19 = vsub.f32 0.0, %v4112_v7  ;;  %v804_v15 = vsub.f32 0.0, %v4138_v52 }
 0x1ab   :  { %5683 = vst [vmem:[#allocation41_spill] sm:$0xff] %v4142_v30  ;;  %v4144_v45 = vpop.eup %3010  ;;  %v4151_v55 = vpop.f32.mrb[35].mxu0  ;;  %5686 = vst [vmem:[#allocation44_spill] sm:$0xff] %v4159_v63  ;;  %3032 = vpow2.f32 %v960_v18  ;;  %v1534_v30 = vpack.c.bf16 %v4108_v20, %v4078_v54  ;;  %v1536_v4 = vpack.c.bf16 %v4134_v48, %v4159_v63  ;;  %v803_v40 = vsub.f32 0.0, %v4149_v39  ;;  %1608 = vmatprep.subr.bf16.mxu0 %v1535_v13 }
 0x1ac   :  { %5684 = vst [vmem:[#allocation42_spill] sm:$0xff] %v4151_v55  ;;  %v4153_v46 = vpop.f32.mrb[35].mxu1  ;;  %v4155_v17 = vpop.eup %3012  ;;  %3034 = vpow2.f32 %v962_v25  ;;  %v4173_v25 = vmul.f32 1.442695, %v801_v2  ;;  %v4198_v13 = vmul.f32 1.442695, %v804_v15 }
 0x1ad   :  { %5685 = vst [vmem:[#allocation43_spill] sm:$0xff] %v4153_v46  ;;  %v3015_v47 = vpop.eup %3014  ;;  %v1537_v46 = vpack.c.bf16 %v4124_v36, %v4093_v14  ;;  %3036 = vpow2.f32 %v966_v11  ;;  %v4171_v7 = vpop.permute.xlu0 %172  ;;  %v4178_v14 = vmul.f32 %v4063_v31, %v3853_v12  ;;  %1609 = vmatpush1.bf16.msra.mxu0 %v1534_v30  ;;  %v4192_v12 = vadd.f32 %v3939_v24, %v4098_v62 }
 0x1ae   :  { %v3017_v55 = vpop.eup %3016  ;;  %v1171_v0 = vadd.f32 1.0, %v3015_v47  ;;  %3038 = vpow2.f32 %v964_v6  ;;  %v4180_v47 = vmul.f32 1.442695, %v802_v19  ;;  %v4182_v48 = vpop.f32.mrb[36].mxu0  ;;  %v4210_v24 = vmul.f32 %v4082_v51, %v3862_v28  ;;  %v5698_v51 = vld [vmem:[#allocation3_spill] sm:$0xff] }
 0x1af   :  { %v3019_v18 = vpop.eup %3018  ;;  %v1173_v42 = vadd.f32 1.0, %v3017_v55  ;;  %1651 = vmatprep.subr.bf16.mxu1 %v1537_v46  ;;  %5687 = vst [vmem:[#allocation45_spill] sm:$0xff] %v4178_v14  ;;  %v4184_v6 = vpop.f32.mrb[36].mxu1  ;;  %v4188_v55 = vmul.f32 %v4074_v32, %v3855_v22  ;;  %v4222_v63 = vadd.f32 %v5696_v16, %v4171_v7  ;;  %v4234_v16 = vadd.f32 %v3955_v57, %v4171_v7 }
 0x1b0   :  { %v3021_v36 = vpop.eup %3020  ;;  %3040 = vrcp.f32 %v1171_v0  ;;  %v1174_v11 = vadd.f32 1.0, %v3019_v18  ;;  %1652 = vmatpush1.bf16.msra.mxu1 %v1536_v4  ;;  %v4194_v31 = vpop.f32.mrb[37].mxu0  ;;  %v4202_v0 = vadd.f32 %v3946_v38, %v4171_v7  ;;  %5692 = vst [vmem:[#allocation50_spill] sm:$0xff] %v4210_v24 }
 0x1b1   :  { %v3023_v2 = vpop.eup %3022  ;;  %5688 = vst [vmem:[#allocation46_spill] sm:$0xff] %v4188_v55  ;;  %3042 = vrcp.f32 %v1173_v42  ;;  %v1176_v46 = vadd.f32 1.0, %v3021_v36  ;;  %v4196_v19 = vpop.f32.mrb[37].mxu1  ;;  %v4212_v42 = vmul.f32 1.442695, %v803_v40  ;;  %v4228_v40 = vmul.f32 %v4096_v53, %v5698_v51  ;;  %v5702_v53 = vld [vmem:[#allocation6_spill] sm:$0xff] }
 0x1b2   :  { %5689 = vst [vmem:[#allocation47_spill] sm:$0xff] %v4196_v19  ;;  %v3025_v4 = vpop.eup %3024  ;;  %3044 = vrcp.f32 %v1174_v11  ;;  %v1175_v30 = vadd.f32 1.0, %v3023_v2  ;;  %v4204_v22 = vpop.f32.mrb[38].mxu0  ;;  %v5694_v11 = vld [vmem:[#allocation2_spill] sm:$0xff]  ;;  %v808_v57 = vsub.f32 0.0, %v4222_v63 }
 0x1b3   :  { %5690 = vst [vmem:[#allocation48_spill] sm:$0xff] %v4204_v22  ;;  %v4206_v32 = vpop.f32.mrb[38].mxu1  ;;  %v3027_v36 = vpop.eup %3026  ;;  %3046 = vrcp.f32 %v1176_v46  ;;  %v1177_v62 = vadd.f32 1.0, %v3025_v4  ;;  %v4218_v38 = vmul.f32 %v4089_v50, %v5694_v11  ;;  %5699 = vst [vmem:[#allocation3_spill] sm:$0xff] %v4228_v40  ;;  %v805_v4 = vsub.f32 0.0, %v4192_v12 }
 0x1b4   :  { %5691 = vst [vmem:[#allocation49_spill] sm:$0xff] %v4206_v32  ;;  %v4214_v18 = vpop.f32.mrb[39].mxu0  ;;  %v3029_v15 = vpop.eup %3028  ;;  %3048 = vrcp.f32 %v1175_v30  ;;  %v1178_v2 = vadd.f32 1.0, %v3027_v36  ;;  %v806_v36 = vsub.f32 0.0, %v4202_v0 }
 0x1b5   :  { %5693 = vst [vmem:[#allocation51_spill] sm:$0xff] %v4214_v18  ;;  %5695 = vst [vmem:[#allocation2_spill] sm:$0xff] %v4218_v38  ;;  %v4224_v20 = vpop.f32.mrb[39].mxu1  ;;  %v3031_v28 = vpop.eup %3030  ;;  %3050 = vrcp.f32 %v1177_v62  ;;  %v1180_v46 = vadd.f32 1.0, %v3029_v15  ;;  %v4242_v62 = vmul.f32 %v4130_v9, %v5702_v53  ;;  %v807_v53 = vsub.f32 0.0, %v4234_v16 }
 0x1b6   :  { %5697 = vst [vmem:[#allocation11_spill] sm:$0xff] %v4224_v20  ;;  %v3033_v54 = vpop.eup %3032  ;;  %v178_v50 = vpop.permute.xlu0 %177  ;;  %3052 = vrcp.f32 %v1178_v2  ;;  %v1179_v30 = vadd.f32 1.0, %v3031_v28  ;;  %v5700_v20 = vld [vmem:[#allocation5_spill] sm:$0xff]  ;;  %v5704_v2 = vld [vmem:[#allocation4_spill] sm:$0xff] }
 0x1b7   :  { %v3035_v11 = vpop.eup %3034  ;;  %v4238_v18 = vmul.f32 %v4118_v10, %v5700_v20  ;;  %5703 = vst [vmem:[#allocation6_spill] sm:$0xff] %v4242_v62  ;;  %3054 = vrcp.f32 %v1180_v46  ;;  %v1181_v15 = vadd.f32 1.0, %v3033_v54  ;;  %v4246_v28 = vmul.f32 %v4104_v58, %v5704_v2  ;;  %v4249_v22 = vpop.f32.mrb[40].mxu0  ;;  %v5708_v54 = vld [vmem:[#allocation13_spill] sm:$0xff] }
 0x1b8   :  { %v3037_v51 = vpop.eup %3036  ;;  %3056 = vrcp.f32 %v1179_v30  ;;  %v1182_v32 = vadd.f32 1.0, %v3035_v11  ;;  %5706 = vst [vmem:[#allocation52_spill] sm:$0xff] %v4249_v22  ;;  %v4251_v19 = vpop.f32.mrb[40].mxu1  ;;  %v1538_v10 = vpack.c.bf16 %v4228_v40, %v4178_v14  ;;  %v4257_v46 = vadd.f32 %v5708_v54, %v4171_v7 }
 0x1b9   :  { %5701 = vst [vmem:[#allocation5_spill] sm:$0xff] %v4238_v18  ;;  %5705 = vst [vmem:[#allocation4_spill] sm:$0xff] %v4246_v28  ;;  %v3039_v20 = vpop.eup %3038  ;;  %3058 = vrcp.f32 %v1181_v15  ;;  %v1184_v9 = vadd.f32 1.0, %v3037_v51  ;;  %v4259_v58 = vpop.f32.mrb[41].mxu0  ;;  %v4265_v2 = vadd.f32 %v3987_v33, %v178_v50  ;;  %v4274_v7 = vadd.f32 %v3989_v27, %v178_v50 }
 0x1ba   :  { %5707 = vst [vmem:[#allocation53_spill] sm:$0xff] %v4251_v19  ;;  %5709 = vst [vmem:[#allocation13_spill] sm:$0xff] %v4259_v58  ;;  %v4261_v30 = vpop.eup %3040  ;;  %3060 = vrcp.f32 %v1182_v32  ;;  %v1183_v11 = vadd.f32 1.0, %v3039_v20  ;;  %v4267_v19 = vpop.f32.mrb[41].mxu1  ;;  %v1539_v51 = vpack.c.bf16 %v4238_v18, %v4210_v24  ;;  %v1541_v32 = vpack.c.bf16 %v4242_v62, %v4218_v38  ;;  %v5724_v58 = vld [vmem:[#allocation7_spill] sm:$0xff] }
 0x1bb   :  { %5710 = vst [vmem:[#allocation54_spill] sm:$0xff] %v4267_v19  ;;  %v4269_v40 = vpop.f32.mrb[42].mxu0  ;;  %v4271_v15 = vpop.eup %3042  ;;  %3062 = vrcp.f32 %v1184_v9  ;;  %5712 = vst [vmem:[#allocation56_spill] sm:$0xff] %v4274_v7  ;;  %v4289_v27 = vadd.f32 %v3998_v1, %v178_v50  ;;  %v4292_v9 = vadd.f32 %v4000_v34, %v178_v50  ;;  %v976_v38 = vmul.f32 1.442695, %v805_v4 }
 0x1bc   :  { %5711 = vst [vmem:[#allocation55_spill] sm:$0xff] %v4269_v40  ;;  %v4280_v20 = vpop.f32.mrb[42].mxu1  ;;  %v4282_v33 = vpop.f32.mrb[43].mxu0  ;;  %v1540_v40 = vpack.c.bf16 %v4246_v28, %v4188_v55  ;;  %3064 = vrcp.f32 %v1183_v11  ;;  %v809_v24 = vsub.f32 0.0, %v4257_v46  ;;  %1610 = vmatprep.subr.bf16.mxu0 %v1539_v51  ;;  %1653 = vmatprep.subr.bf16.mxu1 %v1541_v32  ;;  %v978_v1 = vmul.f32 1.442695, %v806_v36 }
 0x1bd   :  { %5713 = vst [vmem:[#allocation57_spill] sm:$0xff] %v4280_v20  ;;  %5714 = vst [vmem:[#allocation58_spill] sm:$0xff] %v4282_v33  ;;  %v4284_v54 = vpop.eup %3044  ;;  %v183_v14 = vpop.permute.xlu0 %182  ;;  %3066 = vpow2.f32 %v4173_v25  ;;  %v810_v34 = vsub.f32 0.0, %v4265_v2  ;;  %1611 = vmatpush1.bf16.msra.mxu0 %v1538_v10  ;;  %v982_v25 = vmul.f32 1.442695, %v808_v57  ;;  %v812_v28 = vsub.f32 0.0, %v4274_v7 }
 0x1be   :  { %v4294_v18 = vpop.f32.mrb[43].mxu1  ;;  %v4296_v62 = vpop.eup %3046  ;;  %v4301_v33 = vadd.f32 %v4006_v59, %v183_v14  ;;  %3068 = vpow2.f32 %v4180_v47  ;;  %1654 = vmatpush1.bf16.msra.mxu1 %v1540_v40  ;;  %v980_v4 = vmul.f32 1.442695, %v807_v53  ;;  %v811_v59 = vsub.f32 0.0, %v4289_v27  ;;  %v5716_v36 = vld [vmem:[#allocation21_spill] sm:$0xff] }
 0x1bf   :  { %5715 = vst [vmem:[#allocation59_spill] sm:$0xff] %v4294_v18  ;;  %v3049_v11 = vpop.eup %3048  ;;  %3070 = vpow2.f32 %v4198_v13  ;;  %v813_v47 = vsub.f32 0.0, %v4292_v9  ;;  %v4313_v51 = vadd.f32 %v5716_v36, %v183_v14  ;;  %v4315_v10 = vpop.f32.mrb[44].mxu0  ;;  %v984_v57 = vmul.f32 1.442695, %v809_v24 }
 0x1c0   :  { %v3051_v50 = vpop.eup %3050  ;;  %3072 = vpow2.f32 %v4212_v42  ;;  %5717 = vst [vmem:[#allocation21_spill] sm:$0xff] %v4315_v10  ;;  %v4317_v40 = vpop.f32.mrb[44].mxu1  ;;  %v814_v53 = vsub.f32 0.0, %v4301_v33  ;;  %v4323_v32 = vadd.f32 %v4015_v8, %v183_v14  ;;  %v986_v36 = vmul.f32 1.442695, %v810_v34  ;;  %v5721_v10 = vld [vmem:[#allocation23_spill] sm:$0xff] }
 0x1c1   :  { %v4307_v55 = vpop.eup %3052  ;;  %5718 = vst [vmem:[#allocation60_spill] sm:$0xff] %v4317_v40  ;;  %3074 = vpow2.f32 %v976_v38  ;;  %v4325_v42 = vpop.f32.mrb[45].mxu0  ;;  %v4332_v19 = vadd.f32 %v5721_v10, %v183_v14  ;;  %v4342_v8 = vmul.f32 %v4144_v45, %v5724_v58  ;;  %v816_v22 = vsub.f32 0.0, %v4313_v51 }
 0x1c2   :  { %v4319_v13 = vpop.eup %3054  ;;  %5719 = vst [vmem:[#allocation61_spill] sm:$0xff] %v4325_v42  ;;  %v4327_v18 = vpop.f32.mrb[45].mxu1  ;;  %3076 = vpow2.f32 %v978_v1  ;;  %v5726_v42 = vld [vmem:[#allocation8_spill] sm:$0xff]  ;;  %v990_v1 = vmul.f32 1.442695, %v812_v28  ;;  %v4358_v45 = vmul.f32 %v3049_v11, %v3996_v41  ;;  %v815_v28 = vsub.f32 0.0, %v4323_v32 }
 0x1c3   :  { %5720 = vst [vmem:[#allocation62_spill] sm:$0xff] %v4327_v18  ;;  %v4329_v20 = vpop.eup %3056  ;;  %v4334_v40 = vpop.f32.mrb[46].mxu0  ;;  %5725 = vst [vmem:[#allocation7_spill] sm:$0xff] %v4342_v8  ;;  %v4346_v18 = vmul.f32 %v4155_v17, %v5726_v42  ;;  %3078 = vpow2.f32 %v982_v25  ;;  %v4360_v17 = vmul.f32 1.442695, %v814_v53  ;;  %v5730_v42 = vld [vmem:[#allocation19_spill] sm:$0xff]  ;;  %v4379_v53 = vmul.f32 %v4296_v62, %v3985_v37 }
 0x1c4   :  { %5722 = vst [vmem:[#allocation23_spill] sm:$0xff] %v4334_v40  ;;  %v4336_v38 = vpop.f32.mrb[46].mxu1  ;;  %v4338_v24 = vpop.eup %3058  ;;  %3080 = vpow2.f32 %v980_v4  ;;  %v992_v40 = vmul.f32 1.442695, %v813_v47  ;;  %5729 = vst [vmem:[#allocation65_spill] sm:$0xff] %v4358_v45  ;;  %v4367_v4 = vmul.f32 %v4284_v54, %v5730_v42  ;;  %v817_v47 = vsub.f32 0.0, %v4332_v19 }
 0x1c5   :  { %5723 = vst [vmem:[#allocation63_spill] sm:$0xff] %v4336_v38  ;;  %5727 = vst [vmem:[#allocation8_spill] sm:$0xff] %v4346_v18  ;;  %v4348_v34 = vpop.f32.mrb[47].mxu0  ;;  %v4350_v14 = vpop.f32.mrb[47].mxu1  ;;  %v988_v38 = vmul.f32 1.442695, %v811_v59  ;;  %3082 = vpow2.f32 %v984_v57  ;;  %v4370_v59 = vmul.f32 %v3051_v50, %v4021_v23 }
 0x1c6   :  { %5728 = vst [vmem:[#allocation64_spill] sm:$0xff] %v4350_v14  ;;  %v4352_v10 = vpop.eup %3060  ;;  %v188_v25 = vpop.permute.xlu0 %187  ;;  %5731 = vst [vmem:[#allocation19_spill] sm:$0xff] %v4367_v4  ;;  %3084 = vpow2.f32 %v986_v36  ;;  %v5733_v11 = vld [vmem:[#allocation9_spill] sm:$0xff]  ;;  %v5736_v42 = vld [vmem:[#allocation10_spill] sm:$0xff] }
 0x1c7   :  { %v4355_v7 = vpop.eup %3062  ;;  %5732 = vst [vmem:[#allocation66_spill] sm:$0xff] %v4370_v59  ;;  %v4375_v57 = vmul.f32 %v4261_v30, %v5733_v11  ;;  %5735 = vst [vmem:[#allocation67_spill] sm:$0xff] %v4379_v53  ;;  %3086 = vpow2.f32 %v990_v1  ;;  %v4382_v14 = vadd.f32 %v4043_v3, %v188_v25  ;;  %v4386_v23 = vmul.f32 %v4271_v15, %v5736_v42  ;;  %v4391_v30 = vpop.f32.mrb[48].mxu0 }
 0x1c8   :  { %v4363_v58 = vpop.eup %3064  ;;  %3088 = vpow2.f32 %v988_v38  ;;  %v4389_v36 = vadd.f32 %v4045_v61, %v188_v25  ;;  %v4393_v11 = vpop.f32.mrb[48].mxu1  ;;  %v4396_v3 = vadd.f32 %v4051_v49, %v188_v25  ;;  %v1542_v61 = vpack.c.bf16 %v4367_v4, %v4342_v8 }
 0x1c9   :  { %v3067_v41 = vpop.eup %3066  ;;  %5734 = vst [vmem:[#allocation9_spill] sm:$0xff] %v4375_v57  ;;  %5737 = vst [vmem:[#allocation10_spill] sm:$0xff] %v4386_v23  ;;  %3090 = vpow2.f32 %v992_v40  ;;  %v1543_v1 = vpack.c.bf16 %v4358_v45, %v4375_v57  ;;  %v4400_v15 = vpop.f32.mrb[49].mxu0  ;;  %v1544_v45 = vpack.c.bf16 %v4379_v53, %v4346_v18 }
 0x1ca   :  { %v3069_v54 = vpop.eup %3068  ;;  %v1185_v50 = vadd.f32 1.0, %v3067_v41  ;;  %5738 = vst [vmem:[#allocation68_spill] sm:$0xff] %v4393_v11  ;;  %5739 = vst [vmem:[#allocation69_spill] sm:$0xff] %v4400_v15  ;;  %v4402_v41 = vpop.f32.mrb[49].mxu1  ;;  %v820_v4 = vsub.f32 0.0, %v4389_v36 }
 0x1cb   :  { %v3071_v37 = vpop.eup %3070  ;;  %v1186_v62 = vadd.f32 1.0, %v3069_v54  ;;  %5740 = vst [vmem:[#allocation70_spill] sm:$0xff] %v4402_v41  ;;  %v1545_v54 = vpack.c.bf16 %v4370_v59, %v4386_v23  ;;  %v4408_v40 = vpop.f32.mrb[50].mxu0  ;;  %v818_v41 = vsub.f32 0.0, %v4382_v14  ;;  %1612 = vmatprep.subr.bf16.mxu0 %v1543_v1  ;;  %v4419_v23 = vmul.f32 1.442695, %v816_v22 }
 0x1cc   :  { %v3073_v38 = vpop.eup %3072  ;;  %3092 = vrcp.f32 %v1185_v50  ;;  %v1188_v42 = vadd.f32 1.0, %v3071_v37  ;;  %v4410_v49 = vpop.f32.mrb[50].mxu1  ;;  %1613 = vmatpush1.bf16.msra.mxu0 %v1542_v61  ;;  %v4425_v1 = vadd.f32 %v4053_v43, %v188_v25  ;;  %v819_v22 = vsub.f32 0.0, %v4396_v3  ;;  %v5745_v25 = vld [vmem:[#allocation24_spill] sm:$0xff] }
 0x1cd   :  { %5741 = vst [vmem:[#allocation71_spill] sm:$0xff] %v4410_v49  ;;  %v3075_v11 = vpop.eup %3074  ;;  %3094 = vrcp.f32 %v1186_v62  ;;  %v1187_v57 = vadd.f32 1.0, %v3073_v38  ;;  %v4415_v15 = vpop.f32.mrb[51].mxu0  ;;  %1655 = vmatprep.subr.bf16.mxu1 %v1545_v54  ;;  %v4422_v38 = vmul.f32 1.442695, %v815_v28  ;;  %v4432_v61 = vmul.f32 %v4307_v55, %v4025_v29 }
 0x1ce   :  { %5742 = vst [vmem:[#allocation72_spill] sm:$0xff] %v4415_v15  ;;  %v4417_v50 = vpop.f32.mrb[51].mxu1  ;;  %v3077_v37 = vpop.eup %3076  ;;  %3096 = vrcp.f32 %v1188_v42  ;;  %v1189_v59 = vadd.f32 1.0, %v3075_v11  ;;  %1656 = vmatpush1.bf16.msra.mxu1 %v1544_v45  ;;  %v4427_v42 = vmul.f32 1.442695, %v817_v47  ;;  %v4438_v45 = vmul.f32 %v4319_v13, %v5745_v25  ;;  %v5750_v25 = vld [vmem:[#allocation25_spill] sm:$0xff] }
 0x1cf   :  { %5743 = vst [vmem:[#allocation73_spill] sm:$0xff] %v4417_v50  ;;  %v3079_v8 = vpop.eup %3078  ;;  %3098 = vrcp.f32 %v1187_v57  ;;  %v1190_v62 = vadd.f32 1.0, %v3077_v37  ;;  %5744 = vst [vmem:[#allocation74_spill] sm:$0xff] %v4432_v61  ;;  %v4434_v28 = vmul.f32 1.442695, %v818_v41  ;;  %v193_v43 = vpop.permute.xlu0 %192  ;;  %v821_v55 = vsub.f32 0.0, %v4425_v1 }
 0x1d0   :  { %v3081_v53 = vpop.eup %3080  ;;  %3100 = vrcp.f32 %v1189_v59  ;;  %v1192_v18 = vadd.f32 1.0, %v3079_v8  ;;  %5746 = vst [vmem:[#allocation24_spill] sm:$0xff] %v4438_v45  ;;  %v4440_v59 = vmul.f32 1.442695, %v820_v4  ;;  %v4442_v47 = vpop.f32.mrb[52].mxu0 }
 0x1d1   :  { %v3083_v11 = vpop.eup %3082  ;;  %3102 = vrcp.f32 %v1190_v62  ;;  %v1191_v57 = vadd.f32 1.0, %v3081_v53  ;;  %5747 = vst [vmem:[#allocation75_spill] sm:$0xff] %v4442_v47  ;;  %v4446_v53 = vadd.f32 %v4059_v5, %v193_v43  ;;  %v4448_v41 = vpop.f32.mrb[52].mxu1  ;;  %v4464_v5 = vmul.f32 %v4363_v58, %v4068_v60 }
 0x1d2   :  { %v3085_v54 = vpop.eup %3084  ;;  %3104 = vrcp.f32 %v1192_v18  ;;  %v1193_v8 = vadd.f32 1.0, %v3083_v11  ;;  %5748 = vst [vmem:[#allocation76_spill] sm:$0xff] %v4448_v41  ;;  %v4450_v62 = vpop.f32.mrb[53].mxu0  ;;  %v4454_v18 = vmul.f32 %v4329_v20, %v5750_v25  ;;  %v4456_v11 = vmul.f32 1.442695, %v819_v22  ;;  %v5755_v41 = vld [vmem:[#allocation27_spill] sm:$0xff] }
 0x1d3   :  { %v3087_v37 = vpop.eup %3086  ;;  %3106 = vrcp.f32 %v1191_v57  ;;  %v1194_v29 = vadd.f32 1.0, %v3085_v54  ;;  %5749 = vst [vmem:[#allocation77_spill] sm:$0xff] %v4450_v62  ;;  %v4458_v57 = vpop.f32.mrb[53].mxu1  ;;  %5754 = vst [vmem:[#allocation80_spill] sm:$0xff] %v4464_v5  ;;  %v4467_v50 = vadd.f32 %v5755_v41, %v193_v43 }
 0x1d4   :  { %v3089_v13 = vpop.eup %3088  ;;  %5751 = vst [vmem:[#allocation25_spill] sm:$0xff] %v4454_v18  ;;  %3108 = vrcp.f32 %v1193_v8  ;;  %v1196_v4 = vadd.f32 1.0, %v3087_v37  ;;  %5752 = vst [vmem:[#allocation78_spill] sm:$0xff] %v4458_v57  ;;  %v4460_v54 = vpop.f32.mrb[54].mxu0  ;;  %v5758_v37 = vld [vmem:[#allocation26_spill] sm:$0xff] }
 0x1d5   :  { %5753 = vst [vmem:[#allocation79_spill] sm:$0xff] %v4460_v54  ;;  %v3091_v47 = vpop.eup %3090  ;;  %3110 = vrcp.f32 %v1194_v29  ;;  %v1195_v62 = vadd.f32 1.0, %v3089_v13  ;;  %v4469_v20 = vpop.f32.mrb[54].mxu1  ;;  %v4475_v25 = vmul.f32 %v4338_v24, %v5758_v37  ;;  %v4479_v54 = vmul.f32 %v4352_v10, %v4049_v35  ;;  %v5764_v24 = vld [vmem:[#allocation28_spill] sm:$0xff] }
 0x1d6   :  { %5756 = vst [vmem:[#allocation27_spill] sm:$0xff] %v4469_v20  ;;  %v4471_v8 = vpop.f32.mrb[55].mxu0  ;;  %v3093_v22 = vpop.eup %3092  ;;  %3112 = vrcp.f32 %v1196_v4  ;;  %v1197_v60 = vadd.f32 1.0, %v3091_v47  ;;  %v4487_v13 = vmul.f32 %v4355_v7, %v4057_v56  ;;  %v4493_v37 = vadd.f32 %v5764_v24, %v193_v43  ;;  %v5765_v47 = vld [vmem:[#allocation29_spill] sm:$0xff] }
 0x1d7   :  { %5757 = vst [vmem:[#allocation81_spill] sm:$0xff] %v4471_v8  ;;  %5759 = vst [vmem:[#allocation26_spill] sm:$0xff] %v4475_v25  ;;  %v4481_v58 = vpop.f32.mrb[55].mxu1  ;;  %v4483_v29 = vpop.eup %3094  ;;  %v4490_v8 = vmul.f32 %v3093_v22, %v4102_v44  ;;  %3114 = vrcp.f32 %v1195_v62  ;;  %v822_v10 = vsub.f32 0.0, %v4446_v53  ;;  %v4499_v4 = vadd.f32 %v5765_v47, %v193_v43  ;;  %v5766_v44 = vld [vmem:[#allocation35_spill] sm:$0xff]  ;;  %v5777_v20 = vld [vmem:[#allocation41_spill] sm:$0xff] }
 0x1d8   :  { %5760 = vst [vmem:[#allocation82_spill] sm:$0xff] %v4479_v54  ;;  %5761 = vst [vmem:[#allocation83_spill] sm:$0xff] %v4481_v58  ;;  %v198_v41 = vpop.permute.xlu1 %197  ;;  %v4495_v35 = vpop.eup %3096  ;;  %3116 = vrcp.f32 %v1197_v60  ;;  %v1547_v22 = vpack.c.bf16 %v4464_v5, %v4454_v18  ;;  %v1546_v43 = vpack.c.bf16 %v4479_v54, %v4432_v61  ;;  %v1008_v5 = vmul.f32 1.442695, %v821_v55 }
 0x1d9   :  { %5762 = vst [vmem:[#allocation84_spill] sm:$0xff] %v4487_v13  ;;  %5763 = vst [vmem:[#allocation85_spill] sm:$0xff] %v4490_v8  ;;  %v4502_v58 = vadd.f32 %v4114_v26, %v198_v41  ;;  %v4504_v56 = vpop.eup %3098  ;;  %3118 = vpow2.f32 %v4360_v17  ;;  %v4508_v7 = vadd.f32 %v5766_v44, %v198_v41  ;;  %v4511_v62 = vadd.f32 %v4126_v21, %v198_v41  ;;  %v4523_v24 = vpop.f32.mrb[56].mxu0 }
 0x1da   :  { %v4515_v60 = vpop.eup %3100  ;;  %3120 = vpow2.f32 %v4419_v23  ;;  %v824_v26 = vsub.f32 0.0, %v4467_v50  ;;  %v1549_v17 = vpack.c.bf16 %v4490_v8, %v4475_v25  ;;  %5767 = vst [vmem:[#allocation28_spill] sm:$0xff] %v4523_v24  ;;  %v4525_v47 = vpop.f32.mrb[56].mxu1  ;;  %v1548_v44 = vpack.c.bf16 %v4487_v13, %v4438_v45  ;;  %1614 = vmatprep.subr.bf16.mxu0 %v1547_v22 }
 0x1db   :  { %5768 = vst [vmem:[#allocation29_spill] sm:$0xff] %v4525_v47  ;;  %v3103_v21 = vpop.eup %3102  ;;  %3122 = vpow2.f32 %v4422_v38  ;;  %v823_v18 = vsub.f32 0.0, %v4493_v37  ;;  %v4531_v23 = vpop.f32.mrb[57].mxu0  ;;  %v1010_v8 = vmul.f32 1.442695, %v822_v10  ;;  %v825_v25 = vsub.f32 0.0, %v4499_v4  ;;  %1615 = vmatpush1.bf16.msra.mxu0 %v1546_v43 }
 0x1dc   :  { %5769 = vst [vmem:[#allocation35_spill] sm:$0xff] %v4531_v23  ;;  %v4533_v54 = vpop.f32.mrb[57].mxu1  ;;  %v3105_v61 = vpop.eup %3104  ;;  %3124 = vpow2.f32 %v4427_v42  ;;  %v826_v47 = vsub.f32 0.0, %v4502_v58  ;;  %1657 = vmatprep.subr.bf16.mxu1 %v1549_v17  ;;  %v828_v22 = vsub.f32 0.0, %v4508_v7  ;;  %v827_v45 = vsub.f32 0.0, %v4511_v62 }
 0x1dd   :  { %5770 = vst [vmem:[#allocation86_spill] sm:$0xff] %v4533_v54  ;;  %v4538_v13 = vpop.f32.mrb[58].mxu0  ;;  %v4540_v38 = vpop.f32.mrb[58].mxu1  ;;  %3126 = vpow2.f32 %v4434_v28  ;;  %v5773_v54 = vld [vmem:[#allocation38_spill] sm:$0xff]  ;;  %1658 = vmatpush1.bf16.msra.mxu1 %v1548_v44  ;;  %v1014_v17 = vmul.f32 1.442695, %v824_v26 }
 0x1de   :  { %5771 = vst [vmem:[#allocation87_spill] sm:$0xff] %v4538_v13  ;;  %5772 = vst [vmem:[#allocation88_spill] sm:$0xff] %v4540_v38  ;;  %v3107_v55 = vpop.eup %3106  ;;  %v4546_v42 = vadd.f32 %v5773_v54, %v198_v41  ;;  %v4548_v10 = vpop.f32.mrb[59].mxu0  ;;  %3128 = vpow2.f32 %v4440_v59  ;;  %v1012_v28 = vmul.f32 1.442695, %v823_v18 }
 0x1df   :  { %5774 = vst [vmem:[#allocation38_spill] sm:$0xff] %v4548_v10  ;;  %v4550_v23 = vpop.f32.mrb[59].mxu1  ;;  %v3109_v43 = vpop.eup %3108  ;;  %3130 = vpow2.f32 %v4456_v11  ;;  %v1016_v24 = vmul.f32 1.442695, %v825_v25  ;;  %v1018_v54 = vmul.f32 1.442695, %v826_v47 }
 0x1e0   :  { %5775 = vst [vmem:[#allocation89_spill] sm:$0xff] %v4550_v23  ;;  %v4553_v38 = vpop.eup %3110  ;;  %3132 = vpow2.f32 %v1008_v5  ;;  %v203_v44 = vpop.permute.xlu0 %202  ;;  %v4560_v10 = vmul.f32 1.442695, %v828_v22  ;;  %v4562_v23 = vmul.f32 1.442695, %v827_v45  ;;  %v829_v59 = vsub.f32 0.0, %v4546_v42 }
 0x1e1   :  { %v4556_v13 = vpop.eup %3112  ;;  %3134 = vpow2.f32 %v1010_v8  ;;  %v5776_v11 = vld [vmem:[#allocation40_spill] sm:$0xff]  ;;  %v4571_v5 = vadd.f32 %v5777_v20, %v203_v44  ;;  %v5778_v25 = vld [vmem:[#allocation42_spill] sm:$0xff]  ;;  %v4576_v57 = vpop.f32.mrb[60].mxu0  ;;  %v4581_v22 = vmul.f32 %v3107_v55, %v4234_v16  ;;  %v4584_v15 = vmul.f32 %v3109_v43, %v4257_v46 }
 0x1e2   :  { %v4558_v41 = vpop.eup %3114  ;;  %3136 = vpow2.f32 %v1014_v17  ;;  %v4568_v18 = vadd.f32 %v5776_v11, %v203_v44  ;;  %v4574_v47 = vadd.f32 %v5778_v25, %v203_v44  ;;  %5779 = vst [vmem:[#allocation40_spill] sm:$0xff] %v4576_v57  ;;  %v4578_v8 = vpop.f32.mrb[60].mxu1  ;;  %v5783_v17 = vld [vmem:[#allocation43_spill] sm:$0xff]  ;;  %v4594_v57 = vmul.f32 %v3103_v21, %v4202_v0 }
 0x1e3   :  { %v4565_v26 = vpop.eup %3116  ;;  %5780 = vst [vmem:[#allocation41_spill] sm:$0xff] %v4578_v8  ;;  %5781 = vst [vmem:[#allocation42_spill] sm:$0xff] %v4581_v22  ;;  %3138 = vpow2.f32 %v1012_v28  ;;  %v4587_v11 = vadd.f32 %v5783_v17, %v203_v44  ;;  %v4589_v20 = vpop.f32.mrb[61].mxu0  ;;  %v4597_v8 = vmul.f32 %v3105_v61, %v4222_v63  ;;  %v4605_v28 = vmul.f32 %v4504_v56, %v4149_v39  ;;  %v5790_v61 = vld [vmem:[#allocation34_spill] sm:$0xff] }
 0x1e4   :  { %v3119_v45 = vpop.eup %3118  ;;  %5782 = vst [vmem:[#allocation90_spill] sm:$0xff] %v4584_v15  ;;  %v4591_v49 = vpop.f32.mrb[61].mxu1  ;;  %5784 = vst [vmem:[#allocation43_spill] sm:$0xff] %v4594_v57  ;;  %3140 = vpow2.f32 %v1016_v24  ;;  %v4609_v44 = vmul.f32 %v4515_v60, %v4192_v12  ;;  %v4615_v24 = vmul.f32 %v4483_v29, %v5790_v61 }
 0x1e5   :  { %v3121_v25 = vpop.eup %3120  ;;  %5785 = vst [vmem:[#allocation91_spill] sm:$0xff] %v4597_v8  ;;  %v1198_v16 = vadd.f32 1.0, %v3119_v45  ;;  %v4599_v55 = vpop.f32.mrb[62].mxu0  ;;  %5787 = vst [vmem:[#allocation93_spill] sm:$0xff] %v4605_v28  ;;  %3142 = vpow2.f32 %v1018_v54  ;;  %v4619_v45 = vmul.f32 %v4495_v35, %v4138_v52  ;;  %v1551_v60 = vpack.c.bf16 %v4581_v22, %v4605_v28 }
 0x1e6   :  { %v4601_v46 = vpop.f32.mrb[62].mxu1  ;;  %v3123_v43 = vpop.eup %3122  ;;  %5788 = vst [vmem:[#allocation94_spill] sm:$0xff] %v4609_v44  ;;  %v1200_v0 = vadd.f32 1.0, %v3121_v25  ;;  %5791 = vst [vmem:[#allocation34_spill] sm:$0xff] %v4615_v24  ;;  %v1553_v54 = vpack.c.bf16 %v4584_v15, %v4609_v44  ;;  %v1550_v61 = vpack.c.bf16 %v4594_v57, %v4615_v24  ;;  %v832_v22 = vsub.f32 0.0, %v4571_v5 }
 0x1e7   :  { %5786 = vst [vmem:[#allocation92_spill] sm:$0xff] %v4601_v46  ;;  %v4611_v21 = vpop.f32.mrb[63].mxu0  ;;  %v3125_v63 = vpop.eup %3124  ;;  %5792 = vst [vmem:[#allocation96_spill] sm:$0xff] %v4619_v45  ;;  %3144 = vrcp.f32 %v1198_v16  ;;  %v1199_v39 = vadd.f32 1.0, %v3123_v43  ;;  %v1552_v52 = vpack.c.bf16 %v4597_v8, %v4619_v45  ;;  %1616 = vmatprep.subr.bf16.mxu0 %v1551_v60  ;;  %v831_v28 = vsub.f32 0.0, %v4574_v47 }
 0x1e8   :  { %5789 = vst [vmem:[#allocation95_spill] sm:$0xff] %v4611_v21  ;;  %v4621_v56 = vpop.f32.mrb[63].mxu1  ;;  %v3127_v17 = vpop.eup %3126  ;;  %3146 = vrcp.f32 %v1200_v0  ;;  %v1201_v12 = vadd.f32 1.0, %v3125_v63  ;;  %v830_v0 = vsub.f32 0.0, %v4568_v18  ;;  %1659 = vmatprep.subr.bf16.mxu1 %v1553_v54  ;;  %1617 = vmatpush1.bf16.msra.mxu0 %v1550_v61 }
 0x1e9   :  { %5793 = vst [vmem:[#allocation97_spill] sm:$0xff] %v4621_v56  ;;  %v3129_v25 = vpop.eup %3128  ;;  %v208_v29 = vpop.permute.xlu1 %207  ;;  %3148 = vrcp.f32 %v1199_v39  ;;  %v1202_v35 = vadd.f32 1.0, %v3127_v17  ;;  %1660 = vmatpush1.bf16.msra.mxu1 %v1552_v52  ;;  %v1028_v45 = vmul.f32 1.442695, %v831_v28 }
 0x1ea   :  { %v3131_v16 = vpop.eup %3130  ;;  %3150 = vrcp.f32 %v1201_v12  ;;  %v1204_v43 = vadd.f32 1.0, %v3129_v25  ;;  %v4633_v63 = vadd.f32 %v4182_v48, %v208_v29  ;;  %v1024_v12 = vmul.f32 1.442695, %v829_v59  ;;  %v213_v56 = vpop.permute.xlu0 %212 }
 0x1eb   :  { %v3133_v15 = vpop.eup %3132  ;;  %3152 = vrcp.f32 %v1202_v35  ;;  %v1203_v44 = vadd.f32 1.0, %v3131_v16  ;;  %v833_v25 = vsub.f32 0.0, %v4587_v11  ;;  %v4639_v60 = vadd.f32 %v4184_v6, %v208_v29  ;;  %v5794_v6 = vld [vmem:[#allocation47_spill] sm:$0xff] }
 0x1ec   :  { %v3135_v39 = vpop.eup %3134  ;;  %3154 = vrcp.f32 %v1204_v43  ;;  %v1205_v17 = vadd.f32 1.0, %v3133_v15  ;;  %v4642_v54 = vadd.f32 %v4194_v31, %v208_v29  ;;  %v1026_v61 = vmul.f32 1.442695, %v830_v0 }
 0x1ed   :  { %v3137_v8 = vpop.eup %3136  ;;  %3156 = vrcp.f32 %v1203_v44  ;;  %v1206_v48 = vadd.f32 1.0, %v3135_v39  ;;  %v834_v52 = vsub.f32 0.0, %v4633_v63  ;;  %v1030_v59 = vmul.f32 1.442695, %v832_v22 }
 0x1ee   :  { %v3139_v35 = vpop.eup %3138  ;;  %3158 = vrcp.f32 %v1205_v17  ;;  %v1208_v16 = vadd.f32 1.0, %v3137_v8  ;;  %v1032_v39 = vmul.f32 1.442695, %v833_v25  ;;  %v4646_v24 = vadd.f32 %v5794_v6, %v208_v29 }
 0x1ef   :  { %v3141_v43 = vpop.eup %3140  ;;  %3160 = vrcp.f32 %v1206_v48  ;;  %v1207_v15 = vadd.f32 1.0, %v3139_v35  ;;  %v836_v8 = vsub.f32 0.0, %v4639_v60  ;;  %v835_v0 = vsub.f32 0.0, %v4642_v54  ;;  %v5796_v48 = vld [vmem:[#allocation48_spill] sm:$0xff] }
 0x1f0   :  { %v3143_v57 = vpop.eup %3142  ;;  %3162 = vrcp.f32 %v1208_v16  ;;  %v1209_v44 = vadd.f32 1.0, %v3141_v43  ;;  %v4652_v22 = vmul.f32 %v4553_v38, %v4265_v2  ;;  %v1034_v28 = vmul.f32 1.442695, %v834_v52  ;;  %v5799_v16 = vld [vmem:[#allocation49_spill] sm:$0xff]  ;;  %v5802_v52 = vld [vmem:[#allocation51_spill] sm:$0xff] }
 0x1f1   :  { %v3145_v31 = vpop.eup %3144  ;;  %3164 = vrcp.f32 %v1207_v15  ;;  %v1210_v17 = vadd.f32 1.0, %v3143_v57  ;;  %v4655_v25 = vadd.f32 %v5796_v48, %v213_v56  ;;  %v4659_v35 = vmul.f32 %v4558_v41, %v4289_v27 }
 0x1f2   :  { %v3147_v21 = vpop.eup %3146  ;;  %5795 = vst [vmem:[#allocation47_spill] sm:$0xff] %v4652_v22  ;;  %3166 = vrcp.f32 %v1209_v44  ;;  %v4662_v57 = vmul.f32 %v3145_v31, %v4301_v33  ;;  %v4665_v43 = vadd.f32 %v5799_v16, %v213_v56  ;;  %v4675_v44 = vadd.f32 %v5802_v52, %v213_v56 }
 0x1f3   :  { %v3149_v29 = vpop.eup %3148  ;;  %5797 = vst [vmem:[#allocation48_spill] sm:$0xff] %v4659_v35  ;;  %3168 = vrcp.f32 %v1210_v17  ;;  %v4668_v2 = vmul.f32 %v3147_v21, %v4313_v51  ;;  %v4681_v33 = vmul.f32 %v4565_v26, %v4292_v9  ;;  %v5805_v51 = vld [vmem:[#allocation11_spill] sm:$0xff]  ;;  %v837_v31 = vsub.f32 0.0, %v4646_v24 }
 0x1f4   :  { %5798 = vst [vmem:[#allocation98_spill] sm:$0xff] %v4662_v57  ;;  %v3151_v15 = vpop.eup %3150  ;;  %v4671_v38 = vmul.f32 %v3149_v29, %v4323_v32  ;;  %3170 = vpow2.f32 %v4560_v10  ;;  %v4688_v21 = vadd.f32 %v5805_v51, %v213_v56  ;;  %v5806_v10 = vld [vmem:[#allocation56_spill] sm:$0xff]  ;;  %v840_v48 = vsub.f32 0.0, %v4665_v43 }
 0x1f5   :  { %5800 = vst [vmem:[#allocation49_spill] sm:$0xff] %v4668_v2  ;;  %v4677_v27 = vpop.eup %3152  ;;  %5803 = vst [vmem:[#allocation51_spill] sm:$0xff] %v4681_v33  ;;  %v4684_v41 = vmul.f32 %v3151_v15, %v4332_v19  ;;  %3172 = vpow2.f32 %v4562_v23  ;;  %v4694_v6 = vmul.f32 %v4556_v13, %v5806_v10  ;;  %v1554_v19 = vpack.c.bf16 %v4662_v57, %v4652_v22  ;;  %v5844_v22 = vld [vmem:[#allocation73_spill] sm:$0xff] }
 0x1f6   :  { %5801 = vst [vmem:[#allocation99_spill] sm:$0xff] %v4671_v38  ;;  %v4690_v32 = vpop.eup %3154  ;;  %3174 = vpow2.f32 %v1024_v12  ;;  %v1555_v9 = vpack.c.bf16 %v4671_v38, %v4659_v35  ;;  %v838_v23 = vsub.f32 0.0, %v4655_v25  ;;  %v1038_v12 = vmul.f32 1.442695, %v836_v8 }
 0x1f7   :  { %5804 = vst [vmem:[#allocation100_spill] sm:$0xff] %v4684_v41  ;;  %5807 = vst [vmem:[#allocation11_spill] sm:$0xff] %v4694_v6  ;;  %v3157_v26 = vpop.eup %3156  ;;  %3176 = vpow2.f32 %v1026_v61  ;;  %v1557_v56 = vpack.c.bf16 %v4684_v41, %v4681_v33  ;;  %v1556_v13 = vpack.c.bf16 %v4668_v2, %v4694_v6  ;;  %v1036_v16 = vmul.f32 1.442695, %v835_v0 }
 0x1f8   :  { %v3159_v17 = vpop.eup %3158  ;;  %3178 = vpow2.f32 %v1030_v59  ;;  %1618 = vmatprep.subr.bf16.mxu0 %v1555_v9  ;;  %v839_v15 = vsub.f32 0.0, %v4675_v44  ;;  %v841_v61 = vsub.f32 0.0, %v4688_v21  ;;  %v1040_v51 = vmul.f32 1.442695, %v837_v31 }
 0x1f9   :  { %v3161_v29 = vpop.eup %3160  ;;  %3180 = vpow2.f32 %v1028_v45  ;;  %1661 = vmatprep.subr.bf16.mxu1 %v1557_v56  ;;  %1619 = vmatpush1.bf16.msra.mxu0 %v1554_v19  ;;  %v1042_v59 = vmul.f32 1.442695, %v838_v23  ;;  %v1046_v41 = vmul.f32 1.442695, %v840_v48  ;;  %v218_v45 = vpop.permute.xlu1 %217  ;;  %v5810_v23 = vld [vmem:[#allocation13_spill] sm:$0xff] }
 0x1fa   :  { %v3163_v52 = vpop.eup %3162  ;;  %3182 = vpow2.f32 %v1032_v39  ;;  %1662 = vmatpush1.bf16.msra.mxu1 %v1556_v13  ;;  %v4711_v0 = vmul.f32 1.442695, %v839_v15  ;;  %v4713_v33 = vmul.f32 1.442695, %v841_v61  ;;  %v223_v19 = vpop.permute.xlu0 %222  ;;  %v5808_v39 = vld [vmem:[#allocation52_spill] sm:$0xff]  ;;  %v5809_v13 = vld [vmem:[#allocation53_spill] sm:$0xff]  ;;  %v4737_v57 = vmul.f32 %v3161_v29, %v4446_v53 }
 0x1fb   :  { %v3165_v10 = vpop.eup %3164  ;;  %3184 = vpow2.f32 %v1034_v28  ;;  %v4716_v31 = vadd.f32 %v5808_v39, %v218_v45  ;;  %v4719_v28 = vadd.f32 %v5809_v13, %v218_v45  ;;  %v5812_v61 = vld [vmem:[#allocation55_spill] sm:$0xff]  ;;  %v5814_v13 = vld [vmem:[#allocation57_spill] sm:$0xff]  ;;  %v4753_v53 = vmul.f32 %v3159_v17, %v4425_v1 }
 0x1fc   :  { %v3167_v8 = vpop.eup %3166  ;;  %3186 = vpow2.f32 %v1038_v12  ;;  %v4722_v12 = vadd.f32 %v5810_v23, %v218_v45  ;;  %v4728_v2 = vadd.f32 %v5812_v61, %v223_v19  ;;  %v4734_v6 = vadd.f32 %v5814_v13, %v223_v19  ;;  %5815 = vst [vmem:[#allocation52_spill] sm:$0xff] %v4737_v57  ;;  %v2909_v17 = vld [vmem:[%s5517_s7 + $0x4] ss:$8 sps:$4 sm:$0xff]  }
 0x1fd   :  { %v4709_v9 = vpop.eup %3168  ;;  %3188 = vpow2.f32 %v1036_v16  ;;  %v5811_v16 = vld [vmem:[#allocation54_spill] sm:$0xff]  ;;  %5820 = vst [vmem:[#allocation57_spill] sm:$0xff] %v4753_v53  ;;  %v842_v13 = vsub.f32 0.0, %v4716_v31  ;;  %1638 = vmatprep.mubr.bf16.mxu0 %v2909_v17  ;;  %1681 = vmatprep.mubr.bf16.mxu1 %v2909_v17  ;;  %v5825_v17 = vld [vmem:[#allocation60_spill] sm:$0xff] }
 0x1fe   :  { %v3171_v56 = vpop.eup %3170  ;;  %3190 = vpow2.f32 %v1040_v51  ;;  %v4725_v15 = vadd.f32 %v5811_v16, %v218_v45  ;;  %v4731_v51 = vmul.f32 %v3165_v10, %v4493_v37  ;;  %v4743_v16 = vmul.f32 %v3157_v26, %v4396_v3 }
 0x1ff   :  { %v3173_v48 = vpop.eup %3172  ;;  %v1212_v38 = vadd.f32 1.0, %v3171_v56  ;;  %3192 = vpow2.f32 %v1042_v59  ;;  %v4740_v59 = vmul.f32 %v3167_v8, %v4499_v4  ;;  %v4746_v37 = vmul.f32 %v3163_v52, %v4467_v50  ;;  %v5822_v52 = vld [vmem:[#allocation58_spill] sm:$0xff] }
 0x200   :  { %v3175_v35 = vpop.eup %3174  ;;  %5813 = vst [vmem:[#allocation56_spill] sm:$0xff] %v4731_v51  ;;  %v1211_v39 = vadd.f32 1.0, %v3173_v48  ;;  %3194 = vpow2.f32 %v1046_v41  ;;  %5817 = vst [vmem:[#allocation13_spill] sm:$0xff] %v4743_v16  ;;  %v4750_v48 = vmul.f32 %v4677_v27, %v4382_v14  ;;  %v4757_v3 = vmul.f32 %v4690_v32, %v4389_v36 }
 0x201   :  { %v3177_v23 = vpop.eup %3176  ;;  %5816 = vst [vmem:[#allocation53_spill] sm:$0xff] %v4740_v59  ;;  %3196 = vrcp.f32 %v1212_v38  ;;  %v1213_v45 = vadd.f32 1.0, %v3175_v35  ;;  %5818 = vst [vmem:[#allocation54_spill] sm:$0xff] %v4746_v37  ;;  %v1559_v38 = vpack.c.bf16 %v4731_v51, %v4743_v16  ;;  %v1561_v1 = vpack.c.bf16 %v4740_v59, %v4753_v53 }
 0x202   :  { %v3179_v56 = vpop.eup %3178  ;;  %3198 = vrcp.f32 %v1211_v39  ;;  %v1214_v41 = vadd.f32 1.0, %v3177_v23  ;;  %5819 = vst [vmem:[#allocation55_spill] sm:$0xff] %v4750_v48  ;;  %5821 = vst [vmem:[#allocation101_spill] sm:$0xff] %v4757_v3  ;;  %v1558_v14 = vpack.c.bf16 %v4737_v57, %v4750_v48  ;;  %v1560_v32 = vpack.c.bf16 %v4746_v37, %v4757_v3  ;;  %v5823_v23 = vld [vmem:[#allocation59_spill] sm:$0xff] }
 0x203   :  { %v3181_v10 = vpop.eup %3180  ;;  %3200 = vrcp.f32 %v1213_v45  ;;  %v1216_v4 = vadd.f32 1.0, %v3179_v56  ;;  %v4771_v8 = vadd.f32 %v5822_v52, %v223_v19  ;;  %1620 = vmatprep.subr.bf16.mxu0 %v1559_v38  ;;  %v4775_v45 = vadd.f32 %v5823_v23, %v223_v19  ;;  %1663 = vmatprep.subr.bf16.mxu1 %v1561_v1 }
 0x204   :  { %v3183_v35 = vpop.eup %3182  ;;  %3202 = vrcp.f32 %v1214_v41  ;;  %v1215_v50 = vadd.f32 1.0, %v3181_v10  ;;  %1621 = vmatpush1.bf16.msra.mxu0 %v1558_v14  ;;  %v844_v10 = vsub.f32 0.0, %v4719_v28  ;;  %1664 = vmatpush1.bf16.msra.mxu1 %v1560_v32  ;;  %v845_v38 = vsub.f32 0.0, %v4725_v15 }
 0x205   :  { %v3185_v26 = vpop.eup %3184  ;;  %3204 = vrcp.f32 %v1216_v4  ;;  %v1217_v27 = vadd.f32 1.0, %v3183_v35  ;;  %v843_v4 = vsub.f32 0.0, %v4722_v12  ;;  %v848_v1 = vsub.f32 0.0, %v4734_v6 }
 0x206   :  { %v3187_v36 = vpop.eup %3186  ;;  %3206 = vrcp.f32 %v1215_v50  ;;  %v1218_v29 = vadd.f32 1.0, %v3185_v26  ;;  %v846_v26 = vsub.f32 0.0, %v4728_v2  ;;  %v849_v52 = vsub.f32 0.0, %v4775_v45 }
 0x207   :  { %v3189_v61 = vpop.eup %3188  ;;  %3208 = vrcp.f32 %v1217_v27  ;;  %v1220_v39 = vadd.f32 1.0, %v3187_v36  ;;  %v228_v27 = vpop.permute.xlu1 %227  ;;  %v847_v36 = vsub.f32 0.0, %v4771_v8  ;;  %v1054_v51 = vmul.f32 1.442695, %v844_v10 }
 0x208   :  { %v3191_v56 = vpop.eup %3190  ;;  %3210 = vrcp.f32 %v1218_v29  ;;  %v1219_v41 = vadd.f32 1.0, %v3189_v61  ;;  %v5824_v61 = vld [vmem:[#allocation21_spill] sm:$0xff]  ;;  %v4788_v59 = vadd.f32 %v5825_v17, %v228_v27  ;;  %v1052_v37 = vmul.f32 1.442695, %v843_v4  ;;  %v5827_v17 = vld [vmem:[#allocation62_spill] sm:$0xff] }
 0x209   :  { %v3193_v35 = vpop.eup %3192  ;;  %3212 = vrcp.f32 %v1220_v39  ;;  %v1221_v50 = vadd.f32 1.0, %v3191_v56  ;;  %v4785_v39 = vadd.f32 %v5824_v61, %v228_v27  ;;  %v1050_v56 = vmul.f32 1.442695, %v842_v13 }
 0x20a   :  { %v3195_v19 = vpop.eup %3194  ;;  %3214 = vrcp.f32 %v1219_v41  ;;  %v1222_v14 = vadd.f32 1.0, %v3193_v35  ;;  %v5826_v41 = vld [vmem:[#allocation61_spill] sm:$0xff]  ;;  %v1058_v16 = vmul.f32 1.442695, %v846_v26  ;;  %v1062_v61 = vmul.f32 1.442695, %v848_v1 }
 0x20b   :  { %v3197_v29 = vpop.eup %3196  ;;  %3216 = vrcp.f32 %v1221_v50  ;;  %v1224_v32 = vadd.f32 1.0, %v3195_v19  ;;  %v4791_v35 = vadd.f32 %v5826_v41, %v228_v27  ;;  %v1056_v50 = vmul.f32 1.442695, %v845_v38 }
 0x20c   :  { %v3199_v23 = vpop.eup %3198  ;;  %3218 = vrcp.f32 %v1222_v14  ;;  %v1060_v3 = vmul.f32 1.442695, %v847_v36  ;;  %v1064_v13 = vmul.f32 1.442695, %v849_v52  ;;  %v850_v14 = vsub.f32 0.0, %v4785_v39 }
 0x20d   :  { %v3201_v53 = vpop.eup %3200  ;;  %3220 = vrcp.f32 %v1224_v32  ;;  %v4797_v41 = vadd.f32 %v5827_v17, %v228_v27  ;;  %v852_v4 = vsub.f32 0.0, %v4788_v59  ;;  %v4805_v26 = vmul.f32 %v3199_v23, %v4511_v62  ;;  %v5838_v17 = vld [vmem:[#allocation64_spill] sm:$0xff] }
 0x20e   :  { %v3203_v19 = vpop.eup %3202  ;;  %3222 = vpow2.f32 %v4711_v0  ;;  %v851_v0 = vsub.f32 0.0, %v4791_v35  ;;  %v4820_v36 = vmul.f32 %v3201_v53, %v4546_v42 }
 0x20f   :  { %v3205_v57 = vpop.eup %3204  ;;  %3224 = vpow2.f32 %v4713_v33  ;;  %v4800_v10 = vmul.f32 %v3203_v19, %v4568_v18  ;;  %5829 = vst [vmem:[#allocation59_spill] sm:$0xff] %v4805_v26  ;;  %v4817_v18 = vmul.f32 %v4709_v9, %v4502_v58  ;;  %v1070_v53 = vmul.f32 1.442695, %v852_v4 }
 0x210   :  { %v3207_v48 = vpop.eup %3206  ;;  %3226 = vpow2.f32 %v1050_v56  ;;  %v4808_v33 = vmul.f32 %v3205_v57, %v4571_v5  ;;  %5833 = vst [vmem:[#allocation62_spill] sm:$0xff] %v4820_v36  ;;  %v233_v5 = vpop.permute.xlu0 %232  ;;  %v1066_v57 = vmul.f32 1.442695, %v850_v14 }
 0x211   :  { %5828 = vst [vmem:[#allocation58_spill] sm:$0xff] %v4800_v10  ;;  %v3209_v38 = vpop.eup %3208  ;;  %v4811_v1 = vmul.f32 %v3207_v48, %v4574_v47  ;;  %3228 = vpow2.f32 %v1054_v51  ;;  %5832 = vst [vmem:[#allocation61_spill] sm:$0xff] %v4817_v18  ;;  %v4828_v47 = vmul.f32 %v3197_v29, %v4508_v7  ;;  %v1562_v42 = vpack.c.bf16 %v4800_v10, %v4817_v18  ;;  %v5837_v29 = vld [vmem:[#allocation63_spill] sm:$0xff] }
 0x212   :  { %5830 = vst [vmem:[#allocation21_spill] sm:$0xff] %v4808_v33  ;;  %v4813_v27 = vpop.eup %3210  ;;  %v4823_v32 = vmul.f32 %v3209_v38, %v4587_v11  ;;  %3230 = vpow2.f32 %v1052_v37  ;;  %v5836_v11 = vld [vmem:[#allocation23_spill] sm:$0xff]  ;;  %v4846_v52 = vadd.f32 %v5837_v29, %v233_v5  ;;  %v4854_v19 = vadd.f32 %v4348_v34, %v233_v5 }
 0x213   :  { %5831 = vst [vmem:[#allocation60_spill] sm:$0xff] %v4811_v1  ;;  %v4825_v62 = vpop.eup %3212  ;;  %5835 = vst [vmem:[#allocation103_spill] sm:$0xff] %v4828_v47  ;;  %3232 = vpow2.f32 %v1056_v50  ;;  %v1563_v51 = vpack.c.bf16 %v4811_v1, %v4805_v26  ;;  %v4837_v9 = vadd.f32 %v5836_v11, %v233_v5  ;;  %v1564_v7 = vpack.c.bf16 %v4808_v33, %v4828_v47  ;;  %v5842_v10 = vld [vmem:[#allocation71_spill] sm:$0xff] }
 0x214   :  { %5834 = vst [vmem:[#allocation102_spill] sm:$0xff] %v4823_v32  ;;  %v4832_v58 = vpop.eup %3214  ;;  %3234 = vpow2.f32 %v1058_v16  ;;  %v1565_v37 = vpack.c.bf16 %v4823_v32, %v4820_v36  ;;  %v1068_v16 = vmul.f32 1.442695, %v851_v0  ;;  %v853_v50 = vsub.f32 0.0, %v4797_v41  ;;  %v238_v0 = vpop.permute.xlu1 %237  ;;  %v5840_v36 = vld [vmem:[#allocation69_spill] sm:$0xff] }
 0x215   :  { %v4841_v48 = vpop.eup %3216  ;;  %3236 = vpow2.f32 %v1062_v61  ;;  %1622 = vmatprep.subr.bf16.mxu0 %v1563_v51  ;;  %v854_v14 = vsub.f32 0.0, %v4837_v9  ;;  %v4858_v4 = vadd.f32 %v5838_v17, %v233_v5  ;;  %v856_v51 = vsub.f32 0.0, %v4846_v52 }
 0x216   :  { %v4848_v23 = vpop.eup %3218  ;;  %3238 = vpow2.f32 %v1060_v3  ;;  %1665 = vmatprep.subr.bf16.mxu1 %v1565_v37  ;;  %1623 = vmatpush1.bf16.msra.mxu0 %v1562_v42  ;;  %v4862_v34 = vadd.f32 %v4391_v30, %v238_v0  ;;  %v4864_v37 = vmul.f32 1.442695, %v853_v50  ;;  %v855_v5 = vsub.f32 0.0, %v4854_v19  ;;  %v5839_v30 = vld [vmem:[#allocation68_spill] sm:$0xff] }
 0x217   :  { %v4850_v56 = vpop.eup %3220  ;;  %3240 = vpow2.f32 %v1064_v13  ;;  %1666 = vmatpush1.bf16.msra.mxu1 %v1564_v7  ;;  %v4873_v32 = vadd.f32 %v5839_v30, %v238_v0 }
 0x218   :  { %v3223_v61 = vpop.eup %3222  ;;  %3242 = vpow2.f32 %v1066_v57  ;;  %v1076_v33 = vmul.f32 1.442695, %v855_v5 }
 0x219   :  { %v3225_v3 = vpop.eup %3224  ;;  %v1223_v38 = vadd.f32 1.0, %v3223_v61  ;;  %3244 = vpow2.f32 %v1070_v53  ;;  %v4867_v61 = vmul.f32 1.442695, %v854_v14  ;;  %v857_v53 = vsub.f32 0.0, %v4858_v4 }
 0x21a   :  { %v3227_v13 = vpop.eup %3226  ;;  %v1225_v42 = vadd.f32 1.0, %v3225_v3  ;;  %3246 = vpow2.f32 %v1068_v16  ;;  %v4870_v3 = vmul.f32 1.442695, %v856_v51 }
 0x21b   :  { %v3229_v11 = vpop.eup %3228  ;;  %3248 = vrcp.f32 %v1223_v38  ;;  %v1226_v57 = vadd.f32 1.0, %v3227_v13  ;;  %v858_v13 = vsub.f32 0.0, %v4862_v34  ;;  %v1080_v26 = vmul.f32 1.442695, %v857_v53 }
 0x21c   :  { %v3231_v7 = vpop.eup %3230  ;;  %3250 = vrcp.f32 %v1225_v42  ;;  %v1228_v29 = vadd.f32 1.0, %v3229_v11  ;;  %v4877_v42 = vadd.f32 %v5840_v36, %v238_v0  ;;  %v243_v11 = vpop.permute.xlu0 %242  ;;  %v860_v36 = vsub.f32 0.0, %v4873_v32 }
 0x21d   :  { %v3233_v17 = vpop.eup %3232  ;;  %3252 = vrcp.f32 %v1226_v57  ;;  %v1227_v16 = vadd.f32 1.0, %v3231_v7  ;;  %v5841_v57 = vld [vmem:[#allocation70_spill] sm:$0xff]  ;;  %v4887_v18 = vadd.f32 %v5842_v10, %v243_v11  ;;  %v4896_v46 = vadd.f32 %v5844_v22, %v243_v11 }
 0x21e   :  { %v3235_v38 = vpop.eup %3234  ;;  %3254 = vrcp.f32 %v1228_v29  ;;  %v1229_v50 = vadd.f32 1.0, %v3233_v17  ;;  %v4880_v7 = vadd.f32 %v5841_v57, %v238_v0  ;;  %v4883_v29 = vadd.f32 %v4408_v40, %v243_v11 }
 0x21f   :  { %v3237_v14 = vpop.eup %3236  ;;  %3256 = vrcp.f32 %v1227_v16  ;;  %v1230_v1 = vadd.f32 1.0, %v3235_v38  ;;  %v1082_v0 = vmul.f32 1.442695, %v858_v13  ;;  %v859_v38 = vsub.f32 0.0, %v4877_v42 }
 0x220   :  { %v3239_v51 = vpop.eup %3238  ;;  %3258 = vrcp.f32 %v1229_v50  ;;  %v1232_v30 = vadd.f32 1.0, %v3237_v14  ;;  %v861_v40 = vsub.f32 0.0, %v4880_v7  ;;  %v5843_v14 = vld [vmem:[#allocation72_spill] sm:$0xff]  ;;  %v862_v10 = vsub.f32 0.0, %v4883_v29 }
 0x221   :  { %v3241_v17 = vpop.eup %3240  ;;  %3260 = vrcp.f32 %v1230_v1  ;;  %v1231_v47 = vadd.f32 1.0, %v3239_v51  ;;  %v4892_v57 = vadd.f32 %v5843_v14, %v243_v11  ;;  %v4900_v13 = vmul.f32 %v4848_v23, %v4655_v25 }
 0x222   :  { %v3243_v16 = vpop.eup %3242  ;;  %3262 = vrcp.f32 %v1232_v30  ;;  %v1233_v5 = vadd.f32 1.0, %v3241_v17  ;;  %v864_v17 = vsub.f32 0.0, %v4887_v18  ;;  %v4905_v14 = vmul.f32 %v4832_v58, %v4642_v54 }
 0x223   :  { %v3245_v50 = vpop.eup %3244  ;;  %3264 = vrcp.f32 %v1231_v47  ;;  %v1234_v53 = vadd.f32 1.0, %v3243_v16  ;;  %v4916_v25 = vmul.f32 %v4813_v27, %v4633_v63  ;;  %v4920_v23 = vmul.f32 %v4841_v48, %v4646_v24 }
 0x224   :  { %v3247_v1 = vpop.eup %3246  ;;  %3266 = vrcp.f32 %v1233_v5  ;;  %v1236_v51 = vadd.f32 1.0, %v3245_v50  ;;  %v4909_v5 = vmul.f32 %v4850_v56, %v4665_v43  ;;  %v4927_v43 = vmul.f32 %v4825_v62, %v4639_v60 }
 0x225   :  { %v3249_v30 = vpop.eup %3248  ;;  %3268 = vrcp.f32 %v1234_v53  ;;  %v1235_v47 = vadd.f32 1.0, %v3247_v1  ;;  %5846 = vst [vmem:[#allocation63_spill] sm:$0xff] %v4920_v23  ;;  %v1566_v24 = vpack.c.bf16 %v4900_v13, %v4916_v25  ;;  %v1086_v56 = vmul.f32 1.442695, %v860_v36 }
 0x226   :  { %v3251_v16 = vpop.eup %3250  ;;  %v4912_v22 = vmul.f32 %v3249_v30, %v4675_v44  ;;  %3270 = vrcp.f32 %v1236_v51  ;;  %v863_v44 = vsub.f32 0.0, %v4892_v57  ;;  %v1568_v62 = vpack.c.bf16 %v4909_v5, %v4927_v43 }
 0x227   :  { %v3253_v11 = vpop.eup %3252  ;;  %v4923_v54 = vmul.f32 %v3251_v16, %v4688_v21  ;;  %3272 = vrcp.f32 %v1235_v47  ;;  %v865_v21 = vsub.f32 0.0, %v4896_v46  ;;  %v1084_v50 = vmul.f32 1.442695, %v859_v38 }
 0x228   :  { %5845 = vst [vmem:[#allocation23_spill] sm:$0xff] %v4912_v22  ;;  %v3255_v58 = vpop.eup %3254  ;;  %3274 = vpow2.f32 %v4864_v37  ;;  %v1567_v63 = vpack.c.bf16 %v4912_v22, %v4905_v14  ;;  %v1090_v1 = vmul.f32 1.442695, %v862_v10  ;;  %v1094_v51 = vmul.f32 1.442695, %v864_v17 }
 0x229   :  { %5847 = vst [vmem:[#allocation64_spill] sm:$0xff] %v4923_v54  ;;  %v3257_v27 = vpop.eup %3256  ;;  %3276 = vpow2.f32 %v4867_v61  ;;  %v1569_v48 = vpack.c.bf16 %v4923_v54, %v4920_v23  ;;  %v1088_v61 = vmul.f32 1.442695, %v861_v40  ;;  %v1092_v16 = vmul.f32 1.442695, %v863_v44  ;;  %v248_v40 = vpop.permute.xlu1 %247 }
 0x22a   :  { %v3259_v60 = vpop.eup %3258  ;;  %3278 = vpow2.f32 %v4870_v3  ;;  %1624 = vmatprep.subr.bf16.mxu0 %v1567_v63  ;;  %v1096_v3 = vmul.f32 1.442695, %v865_v21  ;;  %v4946_v63 = vmul.f32 %v3257_v27, %v4722_v12 }
 0x22b   :  { %v3261_v37 = vpop.eup %3260  ;;  %3280 = vpow2.f32 %v1076_v33  ;;  %1667 = vmatprep.subr.bf16.mxu1 %v1569_v48  ;;  %1625 = vmatpush1.bf16.msra.mxu0 %v1566_v24 }
 0x22c   :  { %v3263_v53 = vpop.eup %3262  ;;  %3282 = vpow2.f32 %v1080_v26  ;;  %1668 = vmatpush1.bf16.msra.mxu1 %v1568_v62  ;;  %v4943_v47 = vmul.f32 %v3261_v37, %v4728_v2  ;;  %5849 = vst [vmem:[#allocation69_spill] sm:$0xff] %v4946_v63  ;;  %v4957_v2 = vmul.f32 %v3253_v11, %v4716_v31 }
 0x22d   :  { %v3265_v30 = vpop.eup %3264  ;;  %3284 = vpow2.f32 %v1082_v0  ;;  %v4949_v33 = vmul.f32 %v3263_v53, %v4734_v6  ;;  %v4960_v0 = vmul.f32 %v3259_v60, %v4725_v15  ;;  %v4968_v6 = vmul.f32 %v3255_v58, %v4719_v28 }
 0x22e   :  { %5848 = vst [vmem:[#allocation68_spill] sm:$0xff] %v4943_v47  ;;  %v3267_v36 = vpop.eup %3266  ;;  %v4952_v26 = vmul.f32 %v3265_v30, %v4771_v8  ;;  %3286 = vpow2.f32 %v1086_v56  ;;  %5852 = vst [vmem:[#allocation72_spill] sm:$0xff] %v4957_v2  ;;  %v5856_v8 = vld [vmem:[#allocation75_spill] sm:$0xff]  ;;  %v1570_v15 = vpack.c.bf16 %v4943_v47, %v4957_v2 }
 0x22f   :  { %5850 = vst [vmem:[#allocation70_spill] sm:$0xff] %v4949_v33  ;;  %v4954_v38 = vpop.eup %3268  ;;  %5853 = vst [vmem:[#allocation73_spill] sm:$0xff] %v4960_v0  ;;  %v4963_v10 = vmul.f32 %v3267_v36, %v4775_v45  ;;  %3288 = vpow2.f32 %v1084_v50  ;;  %v4971_v17 = vadd.f32 %v5856_v8, %v248_v40  ;;  %v5857_v45 = vld [vmem:[#allocation76_spill] sm:$0xff]  ;;  %v1572_v27 = vpack.c.bf16 %v4949_v33, %v4968_v6 }
 0x230   :  { %5851 = vst [vmem:[#allocation71_spill] sm:$0xff] %v4952_v26  ;;  %v4965_v12 = vpop.eup %3270  ;;  %5855 = vst [vmem:[#allocation105_spill] sm:$0xff] %v4968_v6  ;;  %3290 = vpow2.f32 %v1088_v61  ;;  %v1571_v31 = vpack.c.bf16 %v4952_v26, %v4946_v63  ;;  %v4980_v44 = vadd.f32 %v5857_v45, %v248_v40  ;;  %v253_v61 = vpop.permute.xlu0 %252  ;;  %v5861_v45 = vld [vmem:[#allocation27_spill] sm:$0xff] }
 0x231   :  { %5854 = vst [vmem:[#allocation104_spill] sm:$0xff] %v4963_v10  ;;  %v4975_v11 = vpop.eup %3272  ;;  %3292 = vpow2.f32 %v1090_v1  ;;  %v1573_v28 = vpack.c.bf16 %v4963_v10, %v4960_v0  ;;  %v866_v37 = vsub.f32 0.0, %v4971_v17  ;;  %v258_v10 = vpop.permute.xlu1 %257  ;;  %v5866_v6 = vld [vmem:[#allocation35_spill] sm:$0xff] }
 0x232   :  { %v3275_v58 = vpop.eup %3274  ;;  %3294 = vpow2.f32 %v1094_v51  ;;  %1626 = vmatprep.subr.bf16.mxu0 %v1571_v31  ;;  %v868_v50 = vsub.f32 0.0, %v4980_v44  ;;  %v5858_v51 = vld [vmem:[#allocation77_spill] sm:$0xff]  ;;  %v5860_v31 = vld [vmem:[#allocation79_spill] sm:$0xff] }
 0x233   :  { %v3277_v24 = vpop.eup %3276  ;;  %v1237_v21 = vadd.f32 1.0, %v3275_v58  ;;  %3296 = vpow2.f32 %v1092_v16  ;;  %1669 = vmatprep.subr.bf16.mxu1 %v1573_v28  ;;  %1627 = vmatpush1.bf16.msra.mxu0 %v1570_v15  ;;  %v4989_v30 = vadd.f32 %v5858_v51, %v248_v40  ;;  %v5859_v16 = vld [vmem:[#allocation78_spill] sm:$0xff]  ;;  %v4995_v15 = vadd.f32 %v5860_v31, %v253_v61 }
 0x234   :  { %v3279_v48 = vpop.eup %3278  ;;  %v1238_v60 = vadd.f32 1.0, %v3277_v24  ;;  %3298 = vpow2.f32 %v1096_v3  ;;  %1670 = vmatpush1.bf16.msra.mxu1 %v1572_v27  ;;  %v4992_v36 = vadd.f32 %v5859_v16, %v248_v40  ;;  %v4998_v28 = vadd.f32 %v5861_v45, %v253_v61  ;;  %v5862_v24 = vld [vmem:[#allocation81_spill] sm:$0xff] }
 0x235   :  { %v3281_v62 = vpop.eup %3280  ;;  %3300 = vrcp.f32 %v1237_v21  ;;  %v1240_v56 = vadd.f32 1.0, %v3279_v48  ;;  %v5001_v21 = vadd.f32 %v5862_v24, %v253_v61  ;;  %v5863_v48 = vld [vmem:[#allocation83_spill] sm:$0xff]  ;;  %v867_v31 = vsub.f32 0.0, %v4989_v30 }
 0x236   :  { %v3283_v53 = vpop.eup %3282  ;;  %3302 = vrcp.f32 %v1238_v60  ;;  %v1239_v1 = vadd.f32 1.0, %v3281_v62  ;;  %v5004_v60 = vadd.f32 %v5863_v48, %v253_v61  ;;  %v869_v45 = vsub.f32 0.0, %v4992_v36 }
 0x237   :  { %v3285_v8 = vpop.eup %3284  ;;  %3304 = vrcp.f32 %v1240_v56  ;;  %v1241_v3 = vadd.f32 1.0, %v3283_v53  ;;  %v1098_v56 = vmul.f32 1.442695, %v866_v37  ;;  %v1102_v53 = vmul.f32 1.442695, %v868_v50 }
 0x238   :  { %v3287_v58 = vpop.eup %3286  ;;  %3306 = vrcp.f32 %v1239_v1  ;;  %v1242_v27 = vadd.f32 1.0, %v3285_v8  ;;  %v870_v24 = vsub.f32 0.0, %v4995_v15  ;;  %v872_v61 = vsub.f32 0.0, %v4998_v28 }
 0x239   :  { %v3289_v40 = vpop.eup %3288  ;;  %3308 = vrcp.f32 %v1241_v3  ;;  %v1244_v62 = vadd.f32 1.0, %v3287_v58  ;;  %v871_v37 = vsub.f32 0.0, %v5001_v21  ;;  %v873_v50 = vsub.f32 0.0, %v5004_v60 }
 0x23a   :  { %v3291_v51 = vpop.eup %3290  ;;  %3310 = vrcp.f32 %v1242_v27  ;;  %v1243_v16 = vadd.f32 1.0, %v3289_v40  ;;  %v5864_v40 = vld [vmem:[#allocation28_spill] sm:$0xff]  ;;  %v1100_v63 = vmul.f32 1.442695, %v867_v31  ;;  %v1104_v2 = vmul.f32 1.442695, %v869_v45 }
 0x23b   :  { %v3293_v1 = vpop.eup %3292  ;;  %3312 = vrcp.f32 %v1244_v62  ;;  %v1245_v8 = vadd.f32 1.0, %v3291_v51  ;;  %v5013_v0 = vadd.f32 %v5864_v40, %v258_v10  ;;  %v5865_v62 = vld [vmem:[#allocation29_spill] sm:$0xff]  ;;  %v1106_v54 = vmul.f32 1.442695, %v870_v24  ;;  %v5868_v45 = vld [vmem:[#allocation87_spill] sm:$0xff] }
 0x23c   :  { %v3295_v48 = vpop.eup %3294  ;;  %3314 = vrcp.f32 %v1243_v16  ;;  %v1246_v3 = vadd.f32 1.0, %v3293_v1  ;;  %v5016_v51 = vadd.f32 %v5865_v62, %v258_v10  ;;  %v5019_v16 = vadd.f32 %v5866_v6, %v258_v10  ;;  %v5021_v62 = vpop.permute.xlu0 %262  ;;  %v5867_v6 = vld [vmem:[#allocation86_spill] sm:$0xff] }
 0x23d   :  { %v3297_v58 = vpop.eup %3296  ;;  %3316 = vrcp.f32 %v1245_v8  ;;  %v1248_v27 = vadd.f32 1.0, %v3295_v48  ;;  %v1110_v48 = vmul.f32 1.442695, %v872_v61  ;;  %v1108_v40 = vmul.f32 1.442695, %v871_v37 }
 0x23e   :  { %v3299_v26 = vpop.eup %3298  ;;  %3318 = vrcp.f32 %v1246_v3  ;;  %v1247_v33 = vadd.f32 1.0, %v3297_v58  ;;  %v1112_v23 = vmul.f32 1.442695, %v873_v50  ;;  %v874_v3 = vsub.f32 0.0, %v5013_v0 }
 0x23f   :  { %v3301_v1 = vpop.eup %3300  ;;  %3320 = vrcp.f32 %v1248_v27  ;;  %v1249_v47 = vadd.f32 1.0, %v3299_v26  ;;  %v876_v31 = vsub.f32 0.0, %v5016_v51  ;;  %v5026_v58 = vadd.f32 %v5867_v6, %v258_v10 }
 0x240   :  { %v3303_v8 = vpop.eup %3302  ;;  %3322 = vrcp.f32 %v1247_v33  ;;  %v875_v33 = vsub.f32 0.0, %v5019_v16  ;;  %v5034_v24 = vadd.f32 %v5868_v45, %v5021_v62  ;;  %v5051_v50 = vmul.f32 %v3301_v1, %v4797_v41 }
 0x241   :  { %v3305_v22 = vpop.eup %3304  ;;  %3324 = vrcp.f32 %v1249_v47  ;;  %v5029_v26 = vmul.f32 %v3303_v8, %v4837_v9  ;;  %v5038_v47 = vmul.f32 %v4975_v11, %v4791_v35 }
 0x242   :  { %v3307_v27 = vpop.eup %3306  ;;  %3326 = vpow2.f32 %v1098_v56  ;;  %v5041_v37 = vmul.f32 %v3305_v22, %v4846_v52  ;;  %v5048_v56 = vmul.f32 %v4954_v38, %v4785_v39  ;;  %v5058_v52 = vmul.f32 %v4965_v12, %v4788_v59 }
 0x243   :  { %v3309_v61 = vpop.eup %3308  ;;  %v5044_v10 = vmul.f32 %v3307_v27, %v4854_v19  ;;  %3328 = vpow2.f32 %v1102_v53  ;;  %v1114_v19 = vmul.f32 1.442695, %v874_v3  ;;  %v878_v41 = vsub.f32 0.0, %v5034_v24 }
 0x244   :  { %v3311_v9 = vpop.eup %3310  ;;  %v5054_v8 = vmul.f32 %v3309_v61, %v4858_v4  ;;  %3330 = vpow2.f32 %v1100_v63  ;;  %v1574_v39 = vpack.c.bf16 %v5029_v26, %v5048_v56  ;;  %v1576_v59 = vpack.c.bf16 %v5041_v37, %v5058_v52 }
 0x245   :  { %v3313_v35 = vpop.eup %3312  ;;  %3332 = vpow2.f32 %v1104_v2  ;;  %v1575_v22 = vpack.c.bf16 %v5044_v10, %v5038_v47  ;;  %v1118_v38 = vmul.f32 1.442695, %v876_v31  ;;  %v1116_v12 = vmul.f32 1.442695, %v875_v33 }
 0x246   :  { %v3315_v11 = vpop.eup %3314  ;;  %3334 = vpow2.f32 %v1106_v54  ;;  %v1577_v4 = vpack.c.bf16 %v5054_v8, %v5051_v50  ;;  %v877_v3 = vsub.f32 0.0, %v5026_v58  ;;  %v1122_v6 = vmul.f32 1.442695, %v878_v41 }
 0x247   :  { %v3317_v63 = vpop.eup %3316  ;;  %3336 = vpow2.f32 %v1110_v48  ;;  %1628 = vmatprep.subr.bf16.mxu0 %v1575_v22  ;;  %v5074_v48 = vmul.f32 %v3315_v11, %v4877_v42  ;;  %v5083_v33 = vmul.f32 %v3311_v9, %v4862_v34  ;;  %v5092_v61 = vmul.f32 %v3313_v35, %v4873_v32 }
 0x248   :  { %v3319_v2 = vpop.eup %3318  ;;  %3338 = vpow2.f32 %v1108_v40  ;;  %1671 = vmatprep.subr.bf16.mxu1 %v1577_v4  ;;  %1629 = vmatpush1.bf16.msra.mxu0 %v1574_v39  ;;  %v5878_v39 = vld [vmem:[#allocation38_spill] sm:$0xff] }
 0x249   :  { %v3321_v53 = vpop.eup %3320  ;;  %3340 = vpow2.f32 %v1112_v23  ;;  %1672 = vmatpush1.bf16.msra.mxu1 %v1576_v59  ;;  %v5070_v1 = vmul.f32 %v3319_v2, %v4883_v29  ;;  %5870 = vst [vmem:[#allocation76_spill] sm:$0xff] %v5074_v48  ;;  %5873 = vst [vmem:[#allocation79_spill] sm:$0xff] %v5083_v33  ;;  %v5086_v29 = vmul.f32 %v3317_v63, %v4880_v7  ;;  %v268_v63 = vpop.permute.xlu1 %267 }
 0x24a   :  { %v3323_v54 = vpop.eup %3322  ;;  %3342 = vpow2.f32 %v1114_v19  ;;  %v5077_v40 = vmul.f32 %v3321_v53, %v4887_v18  ;;  %5876 = vst [vmem:[#allocation83_spill] sm:$0xff] %v5092_v61  ;;  %v5108_v41 = vadd.f32 %v5878_v39, %v5021_v62 }
 0x24b   :  { %5869 = vst [vmem:[#allocation75_spill] sm:$0xff] %v5070_v1  ;;  %v3325_v27 = vpop.eup %3324  ;;  %v5080_v31 = vmul.f32 %v3323_v54, %v4892_v57  ;;  %3344 = vpow2.f32 %v1118_v38  ;;  %5874 = vst [vmem:[#allocation27_spill] sm:$0xff] %v5086_v29  ;;  %v5877_v57 = vld [vmem:[#allocation88_spill] sm:$0xff]  ;;  %v1578_v7 = vpack.c.bf16 %v5070_v1, %v5083_v33  ;;  %v5879_v38 = vld [vmem:[#allocation89_spill] sm:$0xff] }
 0x24c   :  { %5871 = vst [vmem:[#allocation77_spill] sm:$0xff] %v5077_v40  ;;  %v3327_v23 = vpop.eup %3326  ;;  %v5089_v45 = vmul.f32 %v3325_v27, %v4896_v46  ;;  %3346 = vpow2.f32 %v1116_v12  ;;  %v5096_v19 = vadd.f32 %v5877_v57, %v5021_v62  ;;  %v1580_v32 = vpack.c.bf16 %v5077_v40, %v5092_v61  ;;  %v5880_v54 = vld [vmem:[#allocation40_spill] sm:$0xff] }
 0x24d   :  { %5872 = vst [vmem:[#allocation78_spill] sm:$0xff] %v5080_v31  ;;  %v3329_v42 = vpop.eup %3328  ;;  %v1250_v18 = vadd.f32 1.0, %v3327_v23  ;;  %v1579_v34 = vpack.c.bf16 %v5080_v31, %v5074_v48  ;;  %3348 = vpow2.f32 %v1122_v6  ;;  %v5112_v2 = vadd.f32 %v5879_v38, %v5021_v62 }
 0x24e   :  { %5875 = vst [vmem:[#allocation81_spill] sm:$0xff] %v5089_v45  ;;  %v3331_v9 = vpop.eup %3330  ;;  %v1252_v22 = vadd.f32 1.0, %v3329_v42  ;;  %v1581_v46 = vpack.c.bf16 %v5089_v45, %v5086_v29  ;;  %v5115_v6 = vadd.f32 %v5880_v54, %v268_v63  ;;  %v1120_v42 = vmul.f32 1.442695, %v877_v3 }
 0x24f   :  { %v3333_v11 = vpop.eup %3332  ;;  %3350 = vrcp.f32 %v1250_v18  ;;  %v1251_v35 = vadd.f32 1.0, %v3331_v9  ;;  %1630 = vmatprep.subr.bf16.mxu0 %v1579_v34  ;;  %v880_v34 = vsub.f32 0.0, %v5096_v19  ;;  %v879_v62 = vsub.f32 0.0, %v5108_v41 }
 0x250   :  { %v3335_v4 = vpop.eup %3334  ;;  %3352 = vrcp.f32 %v1252_v22  ;;  %v1253_v59 = vadd.f32 1.0, %v3333_v11  ;;  %1673 = vmatprep.subr.bf16.mxu1 %v1581_v46  ;;  %1631 = vmatpush1.bf16.msra.mxu0 %v1578_v7  ;;  %v881_v22 = vsub.f32 0.0, %v5112_v2  ;;  %v5881_v46 = vld [vmem:[#allocation41_spill] sm:$0xff]  ;;  %v882_v3 = vsub.f32 0.0, %v5115_v6 }
 0x251   :  { %v3337_v12 = vpop.eup %3336  ;;  %3354 = vrcp.f32 %v1251_v35  ;;  %v1254_v53 = vadd.f32 1.0, %v3335_v4  ;;  %1674 = vmatpush1.bf16.msra.mxu1 %v1580_v32  ;;  %v5121_v11 = vadd.f32 %v5881_v46, %v268_v63  ;;  %v273_v35 = vpop.permute.xlu0 %272  ;;  %v5125_v4 = vadd.f32 %v4589_v20, %v268_v63 }
 0x252   :  { %v3339_v27 = vpop.eup %3338  ;;  %3356 = vrcp.f32 %v1253_v59  ;;  %v1256_v23 = vadd.f32 1.0, %v3337_v12  ;;  %v5128_v12 = vadd.f32 %v4591_v49, %v268_v63  ;;  %v1126_v20 = vmul.f32 1.442695, %v880_v34 }
 0x253   :  { %v3341_v18 = vpop.eup %3340  ;;  %3358 = vrcp.f32 %v1254_v53  ;;  %v1255_v57 = vadd.f32 1.0, %v3339_v27  ;;  %v5131_v53 = vadd.f32 %v4599_v55, %v273_v35  ;;  %v5882_v27 = vld [vmem:[#allocation92_spill] sm:$0xff]  ;;  %v884_v46 = vsub.f32 0.0, %v5121_v11 }
 0x254   :  { %v3343_v9 = vpop.eup %3342  ;;  %3360 = vrcp.f32 %v1256_v23  ;;  %v1257_v7 = vadd.f32 1.0, %v3341_v18  ;;  %v5134_v23 = vadd.f32 %v5882_v27, %v273_v35  ;;  %v5883_v18 = vld [vmem:[#allocation95_spill] sm:$0xff]  ;;  %v1128_v49 = vmul.f32 1.442695, %v881_v22  ;;  %v5884_v27 = vld [vmem:[#allocation97_spill] sm:$0xff] }
 0x255   :  { %v3345_v32 = vpop.eup %3344  ;;  %3362 = vrcp.f32 %v1255_v57  ;;  %v1258_v39 = vadd.f32 1.0, %v3343_v9  ;;  %v5137_v57 = vadd.f32 %v5883_v18, %v273_v35  ;;  %v883_v63 = vsub.f32 0.0, %v5125_v4 }
 0x256   :  { %v3347_v59 = vpop.eup %3346  ;;  %3364 = vrcp.f32 %v1257_v7  ;;  %v1260_v38 = vadd.f32 1.0, %v3345_v32  ;;  %v1124_v32 = vmul.f32 1.442695, %v879_v62  ;;  %v5144_v45 = vadd.f32 %v5884_v27, %v273_v35 }
 0x257   :  { %v1259_v54 = vadd.f32 1.0, %v3347_v59  ;;  %3366 = vpow2.f32 %v1120_v42  ;;  %v3349_v9 = vpop.eup %3348  ;;  %v885_v42 = vsub.f32 0.0, %v5128_v12  ;;  %v886_v59 = vsub.f32 0.0, %v5131_v53 }
 0x258   :  { %3368 = vrcp.f32 %v1258_v39  ;;  %v1130_v34 = vmul.f32 1.442695, %v882_v3  ;;  %v888_v29 = vsub.f32 0.0, %v5134_v23  ;;  %v887_v39 = vsub.f32 0.0, %v5137_v57 }
 0x259   :  { %v3351_v7 = vpop.eup %3350  ;;  %3370 = vrcp.f32 %v1260_v38  ;;  %v1134_v22 = vmul.f32 1.442695, %v884_v46  ;;  %v1132_v38 = vmul.f32 1.442695, %v883_v63  ;;  %v1136_v48 = vmul.f32 1.442695, %v885_v42 }
 0x25a   :  { %v3353_v55 = vpop.eup %3352  ;;  %3372 = vrcp.f32 %v1259_v54  ;;  %v1138_v61 = vmul.f32 1.442695, %v886_v59  ;;  %v889_v35 = vsub.f32 0.0, %v5144_v45  ;;  %v1142_v3 = vmul.f32 1.442695, %v888_v29 }
 0x25b   :  { %v3355_v18 = vpop.eup %3354  ;;  %3374 = vpow2.f32 %v1126_v20  ;;  %v1140_v1 = vmul.f32 1.442695, %v887_v39  ;;  %v5162_v63 = vmul.f32 %v3351_v7, %v4971_v17  ;;  %v1262_v29 = vadd.f32 1.0, %v3349_v9 }
 0x25c   :  { %v3357_v62 = vpop.eup %3356  ;;  %3376 = vpow2.f32 %v1124_v32  ;;  %v5153_v20 = vmul.f32 %v3355_v18, %v4989_v30  ;;  %v5171_v30 = vmul.f32 %v3353_v55, %v4980_v44 }
 0x25d   :  { %v3359_v31 = vpop.eup %3358  ;;  %3378 = vpow2.f32 %v1128_v49 }
 0x25e   :  { %v3361_v40 = vpop.eup %3360  ;;  %v5150_v54 = vmul.f32 %v3359_v31, %v4995_v15  ;;  %3380 = vpow2.f32 %v1130_v34  ;;  %v5165_v15 = vmul.f32 %v3357_v62, %v4992_v36 }
 0x25f   :  { %v3363_v27 = vpop.eup %3362  ;;  %v5156_v46 = vmul.f32 %v3361_v40, %v4998_v28  ;;  %3382 = vpow2.f32 %v1134_v22  ;;  %v1144_v28 = vmul.f32 1.442695, %v889_v35 }
 0x260   :  { %v3365_v33 = vpop.eup %3364  ;;  %v5159_v32 = vmul.f32 %v3363_v27, %v5001_v21  ;;  %3384 = vpow2.f32 %v1132_v38  ;;  %v1582_v17 = vpack.c.bf16 %v5150_v54, %v5162_v63 }
 0x261   :  { %v3367_v49 = vpop.eup %3366  ;;  %v5168_v31 = vmul.f32 %v3365_v33, %v5004_v60  ;;  %3386 = vpow2.f32 %v1136_v48  ;;  %v1584_v33 = vpack.c.bf16 %v5156_v46, %v5171_v30 }
 0x262   :  { %v1583_v21 = vpack.c.bf16 %v5159_v32, %v5153_v20  ;;  %v3369_v40 = vpop.eup %3368  ;;  %3388 = vpow2.f32 %v1138_v61  ;;  %v1261_v44 = vadd.f32 1.0, %v3367_v49 }
 0x263   :  { %v1585_v36 = vpack.c.bf16 %v5168_v31, %v5165_v15  ;;  %v3371_v60 = vpop.eup %3370  ;;  %3390 = vpow2.f32 %v1142_v3 }
 0x264   :  { %1632 = vmatprep.subr.bf16.mxu0 %v1583_v21  ;;  %v3373_v48 = vpop.eup %3372  ;;  %3392 = vpow2.f32 %v1140_v1 }
 0x265   :  { %1675 = vmatprep.subr.bf16.mxu1 %v1585_v36  ;;  %1633 = vmatpush1.bf16.msra.mxu0 %v1582_v17  ;;  %v3375_v7 = vpop.eup %3374  ;;  %3394 = vpow2.f32 %v1144_v28 }
 0x266   :  { %1676 = vmatpush1.bf16.msra.mxu1 %v1584_v33  ;;  %v3377_v55 = vpop.eup %3376  ;;  %3396 = vrcp.f32 %v1262_v29  ;;  %v1264_v61 = vadd.f32 1.0, %v3375_v7 }
 0x267   :  { %v3379_v9 = vpop.eup %3378  ;;  %3398 = vrcp.f32 %v1261_v44  ;;  %v1263_v42 = vadd.f32 1.0, %v3377_v55 }
 0x268   :  { %v3381_v59 = vpop.eup %3380  ;;  %3400 = vrcp.f32 %v1264_v61  ;;  %v1265_v18 = vadd.f32 1.0, %v3379_v9 }
 0x269   :  { %v3383_v34 = vpop.eup %3382  ;;  %3402 = vrcp.f32 %v1263_v42  ;;  %v1266_v39 = vadd.f32 1.0, %v3381_v59  ;;  %v5185_v42 = vmul.f32 %v3373_v48, %v5019_v16  ;;  %v5203_v16 = vmul.f32 %v3371_v60, %v5016_v51 }
 0x26a   :  { %v3385_v62 = vpop.eup %3384  ;;  %3404 = vrcp.f32 %v1265_v18  ;;  %v1268_v1 = vadd.f32 1.0, %v3383_v34 }
 0x26b   :  { %v3387_v22 = vpop.eup %3386  ;;  %3406 = vrcp.f32 %v1266_v39  ;;  %v1267_v38 = vadd.f32 1.0, %v3385_v62  ;;  %5886 = vst [vmem:[#allocation29_spill] sm:$0xff] %v5185_v42  ;;  %v5194_v39 = vmul.f32 %v3369_v40, %v5013_v0  ;;  %5892 = vst [vmem:[#allocation89_spill] sm:$0xff] %v5203_v16 }
 0x26c   :  { %v3389_v35 = vpop.eup %3388  ;;  %3408 = vrcp.f32 %v1268_v1  ;;  %v1269_v27 = vadd.f32 1.0, %v3387_v22 }
 0x26d   :  { %v3391_v3 = vpop.eup %3390  ;;  %3410 = vrcp.f32 %v1267_v38  ;;  %v1270_v49 = vadd.f32 1.0, %v3389_v35  ;;  %5889 = vst [vmem:[#allocation87_spill] sm:$0xff] %v5194_v39 }
 0x26e   :  { %v3393_v28 = vpop.eup %3392  ;;  %3412 = vrcp.f32 %v1269_v27  ;;  %v1272_v21 = vadd.f32 1.0, %v3391_v3 }
 0x26f   :  { %v3395_v17 = vpop.eup %3394  ;;  %3414 = vrcp.f32 %v1270_v49  ;;  %v1271_v29 = vadd.f32 1.0, %v3393_v28 }
 0x270   :  { %v3397_v36 = vpop.eup %3396  ;;  %3416 = vrcp.f32 %v1272_v21  ;;  %v1273_v33 = vadd.f32 1.0, %v3395_v17 }
 0x271   :  { %v3399_v44 = vpop.eup %3398  ;;  %3418 = vrcp.f32 %v1271_v29  ;;  %v5182_v61 = vmul.f32 %v3397_v36, %v5034_v24 }
 0x272   :  { %v3401_v7 = vpop.eup %3400  ;;  %3420 = vrcp.f32 %v1273_v33  ;;  %v5197_v62 = vmul.f32 %v3399_v44, %v5026_v58 }
 0x273   :  { %v3403_v55 = vpop.eup %3402  ;;  %5885 = vst [vmem:[#allocation28_spill] sm:$0xff] %v5182_v61  ;;  %v5188_v59 = vmul.f32 %v3401_v7, %v5096_v19 }
 0x274   :  { %v3405_v9 = vpop.eup %3404  ;;  %v5191_v18 = vmul.f32 %v3403_v55, %v5108_v41  ;;  %5890 = vst [vmem:[#allocation88_spill] sm:$0xff] %v5197_v62  ;;  %v1586_v41 = vpack.c.bf16 %v5182_v61, %v5194_v39 }
 0x275   :  { %5887 = vst [vmem:[#allocation35_spill] sm:$0xff] %v5188_v59  ;;  %v3407_v34 = vpop.eup %3406  ;;  %v5200_v24 = vmul.f32 %v3405_v9, %v5112_v2  ;;  %v1588_v58 = vpack.c.bf16 %v5188_v59, %v5203_v16 }
 0x276   :  { %5888 = vst [vmem:[#allocation86_spill] sm:$0xff] %v5191_v18  ;;  %v3409_v1 = vpop.eup %3408  ;;  %v1587_v19 = vpack.c.bf16 %v5191_v18, %v5185_v42  ;;  %v5226_v49 = vmul.f32 %v3407_v34, %v5115_v6 }
 0x277   :  { %5891 = vst [vmem:[#allocation38_spill] sm:$0xff] %v5200_v24  ;;  %v3411_v48 = vpop.eup %3410  ;;  %v1589_v0 = vpack.c.bf16 %v5200_v24, %v5197_v62 }
 0x278   :  { %v3413_v40 = vpop.eup %3412  ;;  %1634 = vmatprep.subr.bf16.mxu0 %v1587_v19  ;;  %v5217_v35 = vmul.f32 %v3411_v48, %v5125_v4  ;;  %5897 = vst [vmem:[#allocation97_spill] sm:$0xff] %v5226_v49 }
 0x279   :  { %v3415_v2 = vpop.eup %3414  ;;  %1677 = vmatprep.subr.bf16.mxu1 %v1589_v0  ;;  %1635 = vmatpush1.bf16.msra.mxu0 %v1586_v41  ;;  %v5229_v28 = vmul.f32 %v3413_v40, %v5128_v12 }
 0x27a   :  { %v3417_v51 = vpop.eup %3416  ;;  %1678 = vmatpush1.bf16.msra.mxu1 %v1588_v58  ;;  %v5214_v22 = vmul.f32 %v3415_v2, %v5131_v53  ;;  %5894 = vst [vmem:[#allocation41_spill] sm:$0xff] %v5217_v35  ;;  %v5235_v53 = vmul.f32 %v3409_v1, %v5121_v11  ;;  %v5901_v11 = vmov 0  }
 0x27b   :  { %v3419_v60 = vpop.eup %3418  ;;  %v5220_v27 = vmul.f32 %v3417_v51, %v5134_v23  ;;  %5898 = vst [vmem:[#allocation106_spill] sm:$0xff] %v5229_v28 }
 0x27c   :  { %5893 = vst [vmem:[#allocation40_spill] sm:$0xff] %v5214_v22  ;;  %v3421_v38 = vpop.eup %3420  ;;  %v5223_v3 = vmul.f32 %v3419_v60, %v5137_v57  ;;  %5900 = vst [vmem:[#allocation108_spill] sm:$0xff] %v5235_v53  ;;  %v1590_v23 = vpack.c.bf16 %v5214_v22, %v5226_v49 }
 0x27d   :  { %5895 = vst [vmem:[#allocation92_spill] sm:$0xff] %v5220_v27  ;;  %v5232_v21 = vmul.f32 %v3421_v38, %v5144_v45  ;;  %v1592_v6 = vpack.c.bf16 %v5220_v27, %v5235_v53  ;;  %v2907_v45 = vld [vmem:[%s5517_s7] ss:$8 sps:$4 sm:$0xff]  }
 0x27e   :  { %5896 = vst [vmem:[#allocation95_spill] sm:$0xff] %v5223_v3  ;;  %v1591_v4 = vpack.c.bf16 %v5223_v3, %v5217_v35 }
 0x27f   :  { %5899 = vst [vmem:[#allocation107_spill] sm:$0xff] %v5232_v21  ;;  %v1593_v57 = vpack.c.bf16 %v5232_v21, %v5229_v28 }
 0x280   :  { %1636 = vmatprep.subr.bf16.mxu0 %v1591_v4 }
 0x281   :  { %1679 = vmatprep.subr.bf16.mxu1 %v1593_v57  ;;  %1637 = vmatpush1.bf16.msra.mxu0 %v1590_v23 }
 0x282   :  { %1680 = vmatpush1.bf16.msra.mxu1 %v1592_v6 }
 0x284   :  { %1639 = vmatmul.mubr.bf16.vlgmr.msra.gmra.mrb[64].mxu0 %v2907_v45 }
 0x285   :  { %1682 = vmatmul.mubr.bf16.vlgmr.msra.gmra.mrb[64].mxu1 %v2907_v45  ;;  %1957 = vmatprep.mubr.bf16.mxu0 %v5901_v11 }
 0x286   :  { %2150 = vmatprep.mubr.bf16.mxu1 %v5901_v11 }
 0x357   :  { %v1640_v12 = vpop.f32.mrb[64].mxu0 }
 0x358   :  { %v1692_v17 = vrot.slane %v1640_v12, 4  ;;  %v1683_v29 = vpop.f32.mrb[64].mxu1  ;;  %v1642_v36 = vpop.f32.mrb[65].mxu0 }
 0x359   :  { %v1704_v33 = vrot.slane %v1683_v29, 4  ;;  %v1698_v44 = vrot.slane %v1642_v36, 4  ;;  %v1685_v7 = vpop.f32.mrb[65].mxu1  ;;  %v1644_v55 = vpop.f32.mrb[66].mxu0 }
 0x35a   :  { %v1693_v9 = vmax.f32 %v1640_v12, %v1692_v17  ;;  %v1710_v34 = vrot.slane %v1685_v7, 4  ;;  %v1760_v1 = vrot.slane %v1644_v55, 4  ;;  %v1687_v19 = vpop.f32.mrb[66].mxu1  ;;  %v1646_v48 = vpop.f32.mrb[67].mxu0 }
 0x35b   :  { %v1705_v41 = vmax.f32 %v1683_v29, %v1704_v33  ;;  %v1699_v0 = vmax.f32 %v1642_v36, %v1698_v44  ;;  %v1772_v40 = vrot.slane %v1687_v19, 4  ;;  %v1766_v58 = vrot.slane %v1646_v48, 4  ;;  %v1689_v2 = vpop.f32.mrb[67].mxu1 }
 0x35c   :  { %v1694_v51 = vrot.slane %v1693_v9, 2  ;;  %v1711_v60 = vmax.f32 %v1685_v7, %v1710_v34  ;;  %v1761_v38 = vmax.f32 %v1644_v55, %v1760_v1  ;;  %v1778_v4 = vrot.slane %v1689_v2, 4 }
 0x35d   :  { %v1706_v23 = vrot.slane %v1705_v41, 2  ;;  %v1700_v57 = vrot.slane %v1699_v0, 2  ;;  %v1773_v6 = vmax.f32 %v1687_v19, %v1772_v40  ;;  %v1767_v45 = vmax.f32 %v1646_v48, %v1766_v58 }
 0x35e   :  { %v1695_v21 = vmax.f32 %v1693_v9, %v1694_v51  ;;  %v1712_v28 = vrot.slane %v1711_v60, 2  ;;  %v1762_v17 = vrot.slane %v1761_v38, 2  ;;  %v1779_v3 = vmax.f32 %v1689_v2, %v1778_v4 }
 0x35f   :  { %v1707_v27 = vmax.f32 %v1705_v41, %v1706_v23  ;;  %v1701_v35 = vmax.f32 %v1699_v0, %v1700_v57  ;;  %v1774_v53 = vrot.slane %v1773_v6, 2  ;;  %v1768_v33 = vrot.slane %v1767_v45, 2 }
 0x360   :  { %v1696_v44 = vrot.slane %v1695_v21, 1  ;;  %v1713_v22 = vmax.f32 %v1711_v60, %v1712_v28  ;;  %v1763_v49 = vmax.f32 %v1761_v38, %v1762_v17  ;;  %v1780_v24 = vrot.slane %v1779_v3, 2 }
 0x361   :  { %v1708_v62 = vrot.slane %v1707_v27, 1  ;;  %v1702_v34 = vrot.slane %v1701_v35, 1  ;;  %v1775_v1 = vmax.f32 %v1773_v6, %v1774_v53  ;;  %v1769_v18 = vmax.f32 %v1767_v45, %v1768_v33 }
 0x362   :  { %v1697_v59 = vmax.f32 %v1695_v21, %v1696_v44  ;;  %v1714_v42 = vrot.slane %v1713_v22, 1  ;;  %v1764_v40 = vrot.slane %v1763_v49, 1  ;;  %v1781_v58 = vmax.f32 %v1779_v3, %v1780_v24 }
 0x363   :  { %v1709_v9 = vmax.f32 %v1707_v27, %v1708_v62  ;;  %v1703_v51 = vmax.f32 %v1701_v35, %v1702_v34  ;;  %v1776_v16 = vrot.slane %v1775_v1, 1  ;;  %v1770_v4 = vrot.slane %v1769_v18, 1 }
 0x364   :  { %v1716_v41 = vsub.f32 %v1640_v12, %v1697_v59  ;;  %v1715_v0 = vmax.f32 %v1713_v22, %v1714_v42  ;;  %v1765_v23 = vmax.f32 %v1763_v49, %v1764_v40  ;;  %v1782_v57 = vrot.slane %v1781_v58, 1 }
 0x365   :  { %v1718_v61 = vsub.f32 %v1683_v29, %v1709_v9  ;;  %v1717_v28 = vsub.f32 %v1642_v36, %v1703_v51  ;;  %v1777_v60 = vmax.f32 %v1775_v1, %v1776_v16  ;;  %v1771_v38 = vmax.f32 %v1769_v18, %v1770_v4 }
 0x366   :  { %v1720_v17 = vmul.f32 1.442695, %v1716_v41  ;;  %v1719_v39 = vsub.f32 %v1685_v7, %v1715_v0  ;;  %v1784_v53 = vsub.f32 %v1644_v55, %v1765_v23  ;;  %v1783_v6 = vmax.f32 %v1781_v58, %v1782_v57 }
 0x367   :  { %v1724_v21 = vmul.f32 1.442695, %v1718_v61  ;;  %v1722_v45 = vmul.f32 1.442695, %v1717_v28  ;;  %v1786_v33 = vsub.f32 %v1687_v19, %v1777_v60  ;;  %v1785_v24 = vsub.f32 %v1646_v48, %v1771_v38 }
 0x368   :  { %3422 = vpow2.f32 %v1720_v17  ;;  %v1726_v62 = vmul.f32 1.442695, %v1719_v39  ;;  %v1788_v35 = vmul.f32 1.442695, %v1784_v53  ;;  %v1787_v27 = vsub.f32 %v1689_v2, %v1783_v6 }
 0x369   :  { %3424 = vpow2.f32 %v1724_v21  ;;  %v1792_v42 = vmul.f32 1.442695, %v1786_v33  ;;  %v1790_v59 = vmul.f32 1.442695, %v1785_v24 }
 0x36a   :  { %3426 = vpow2.f32 %v1722_v45  ;;  %v1794_v22 = vmul.f32 1.442695, %v1787_v27 }
 0x36b   :  { %3428 = vpow2.f32 %v1726_v62 }
 0x36c   :  { %3430 = vpow2.f32 %v1788_v35 }
 0x36d   :  { %3432 = vpow2.f32 %v1792_v42 }
 0x36e   :  { %3434 = vpow2.f32 %v1790_v59 }
 0x36f   :  { %3436 = vpow2.f32 %v1794_v22 }
 0x372   :  { %v5250_v18 = vpop.eup %3422 }
 0x373   :  { %v5252_v61 = vpop.eup %3424  ;;  %v1728_v16 = vrot.slane %v5250_v18, 4 }
 0x374   :  { %v5255_v3 = vpop.eup %3426  ;;  %v1740_v39 = vrot.slane %v5252_v61, 4 }
 0x375   :  { %v5258_v49 = vpop.eup %3428  ;;  %v1734_v12 = vrot.slane %v5255_v3, 4  ;;  %v1729_v29 = vadd.f32 %v5250_v18, %v1728_v16 }
 0x376   :  { %v5262_v36 = vpop.eup %3430  ;;  %v1746_v7 = vrot.slane %v5258_v49, 4  ;;  %v1741_v55 = vadd.f32 %v5252_v61, %v1740_v39 }
 0x377   :  { %v5266_v19 = vpop.eup %3432  ;;  %v1735_v48 = vadd.f32 %v5255_v3, %v1734_v12  ;;  %v1730_v2 = vrot.slane %v1729_v29, 2  ;;  %v1796_v44 = vrot.slane %v5262_v36, 4 }
 0x378   :  { %v3435_v34 = vpop.eup %3434  ;;  %v1747_v1 = vadd.f32 %v5258_v49, %v1746_v7  ;;  %v1742_v40 = vrot.slane %v1741_v55, 2  ;;  %v1808_v58 = vrot.slane %v5266_v19, 4 }
 0x379   :  { %v3437_v9 = vpop.eup %3436  ;;  %v1736_v51 = vrot.slane %v1735_v48, 2  ;;  %v1802_v4 = vrot.slane %v3435_v34, 4  ;;  %v1731_v41 = vadd.f32 %v1730_v2, %v1729_v29  ;;  %v1797_v0 = vadd.f32 %v5262_v36, %v1796_v44 }
 0x37a   :  { %v1748_v23 = vrot.slane %v1747_v1, 2  ;;  %v1814_v57 = vrot.slane %v3437_v9, 4  ;;  %v1743_v28 = vadd.f32 %v1742_v40, %v1741_v55  ;;  %v1809_v60 = vadd.f32 %v5266_v19, %v1808_v58 }
 0x37b   :  { %v1737_v38 = vadd.f32 %v1736_v51, %v1735_v48  ;;  %v1803_v17 = vadd.f32 %v3435_v34, %v1802_v4  ;;  %v1732_v53 = vrot.slane %v1731_v41, 1  ;;  %v1798_v6 = vrot.slane %v1797_v0, 2 }
 0x37c   :  { %v1749_v21 = vadd.f32 %v1748_v23, %v1747_v1  ;;  %v1815_v45 = vadd.f32 %v3437_v9, %v1814_v57  ;;  %v1744_v33 = vrot.slane %v1743_v28, 1  ;;  %v1810_v24 = vrot.slane %v1809_v60, 2 }
 0x37d   :  { %v1738_v62 = vrot.slane %v1737_v38, 1  ;;  %v1804_v35 = vrot.slane %v1803_v17, 2  ;;  %v1733_v27 = vadd.f32 %v1732_v53, %v1731_v41  ;;  %v1799_v42 = vadd.f32 %v1798_v6, %v1797_v0 }
 0x37e   :  { %v1750_v59 = vrot.slane %v1749_v21, 1  ;;  %v1816_v22 = vrot.slane %v1815_v45, 2  ;;  %v1745_v16 = vadd.f32 %v1744_v33, %v1743_v28  ;;  %v1811_v39 = vadd.f32 %v1810_v24, %v1809_v60 }
 0x37f   :  { %v1739_v12 = vadd.f32 %v1738_v62, %v1737_v38  ;;  %v1805_v29 = vadd.f32 %v1804_v35, %v1803_v17  ;;  %3438 = vrcp.f32 %v1733_v27  ;;  %v1800_v7 = vrot.slane %v1799_v42, 1 }
 0x380   :  { %v1751_v55 = vadd.f32 %v1750_v59, %v1749_v21  ;;  %v1817_v48 = vadd.f32 %v1816_v22, %v1815_v45  ;;  %3440 = vrcp.f32 %v1745_v16  ;;  %v1812_v2 = vrot.slane %v1811_v39, 1  ;;  %v1868_v16 = vpop.trf.xlu0 }
 0x381   :  { %3442 = vrcp.f32 %v1739_v12  ;;  %v1806_v44 = vrot.slane %v1805_v29, 1  ;;  %v1801_v1 = vadd.f32 %v1800_v7, %v1799_v42 }
 0x382   :  { %3444 = vrcp.f32 %v1751_v55  ;;  %v1818_v40 = vrot.slane %v1817_v48, 1  ;;  %v1813_v58 = vadd.f32 %v1812_v2, %v1811_v39 }
 0x383   :  { %v1807_v51 = vadd.f32 %v1806_v44, %v1805_v29  ;;  %3446 = vrcp.f32 %v1801_v1 }
 0x384   :  { %v1819_v4 = vadd.f32 %v1818_v40, %v1817_v48  ;;  %3448 = vrcp.f32 %v1813_v58  ;;  %v1869_v39 = vpop.trf.xlu0 }
 0x385   :  { %3450 = vrcp.f32 %v1807_v51 }
 0x386   :  { %3452 = vrcp.f32 %v1819_v4 }
 0x388   :  { %v1870_v12 = vpop.trf.xlu0 }
 0x389   :  { %v3439_v41 = vpop.eup %3438 }
 0x38a   :  { %v3441_v0 = vpop.eup %3440  ;;  %v1756_v38 = vmul.f32 %v3439_v41, %v5250_v18  ;;  %v1852_v18 = vpop.trf.xlu1  ;;  %v5902_v41 = vld [vmem:[#allocation12_spill] sm:$0xff] }
 0x38b   :  { %v3443_v23 = vpop.eup %3442  ;;  %v1758_v6 = vmul.f32 %v3441_v0, %v5252_v61 }
 0x38c   :  { %v3445_v57 = vpop.eup %3444  ;;  %v1757_v33 = vmul.f32 %v3443_v23, %v5255_v3  ;;  %v1871_v29 = vpop.trf.xlu0  ;;  %v5903_v23 = vld [vmem:[#allocation15_spill] sm:$0xff] }
 0x38d   :  { %v3447_v28 = vpop.eup %3446  ;;  %v1759_v35 = vmul.f32 %v3445_v57, %v5258_v49 }
 0x38e   :  { %v3449_v60 = vpop.eup %3448  ;;  %v1824_v17 = vmul.f32 %v3447_v28, %v5262_v36  ;;  %v1853_v61 = vpop.trf.xlu1 }
 0x38f   :  { %v3451_v53 = vpop.eup %3450  ;;  %v1826_v21 = vmul.f32 %v3449_v60, %v5266_v19 }
 0x390   :  { %v3453_v45 = vpop.eup %3452  ;;  %v1825_v24 = vmul.f32 %v3451_v53, %v3435_v34  ;;  %v1830_v62 = vpack.c.bf16 %v1824_v17, %v1756_v38  ;;  %v1872_v7 = vpop.trf.xlu0  ;;  %v5904_v38 = vld [vmem:[#allocation14_spill] sm:$0xff]  ;;  %v5905_v17 = vld [vmem:[#allocation16_spill] sm:$0xff] }
 0x391   :  { %v1827_v27 = vmul.f32 %v3453_v45, %v3437_v9  ;;  %v1832_v42 = vpack.c.bf16 %v1826_v21, %v1758_v6  ;;  %v5906_v6 = vld [vmem:[#allocation18_spill] sm:$0xff]  ;;  %v5907_v45 = vld [vmem:[#allocation20_spill] sm:$0xff] }
 0x392   :  { %v1831_v59 = vpack.c.bf16 %v1825_v24, %v1757_v33  ;;  %v1854_v3 = vpop.trf.xlu1 }
 0x393   :  { %v1833_v22 = vpack.c.bf16 %v1827_v27, %v1759_v35 }
 0x394   :  { %1925 = vmatprep.subr.bf16.mxu0 %v1831_v59  ;;  %v1873_v55 = vpop.trf.xlu0 }
 0x395   :  { %2118 = vmatprep.subr.bf16.mxu1 %v1833_v22  ;;  %1926 = vmatpush1.bf16.msra.mxu0 %v1830_v62  ;;  %v5908_v62 = vld [vmem:[#allocation17_spill] sm:$0xff] }
 0x396   :  { %2119 = vmatpush1.bf16.msra.mxu1 %v1832_v42  ;;  %v1855_v49 = vpop.trf.xlu1  ;;  %v5909_v42 = vld [vmem:[#allocation22_spill] sm:$0xff] }
 0x398   :  { %2835 = vmatmul.mubr.msk.bf16.vlgmr.msra.gmra.mrb[68].mxu0 %vm1876_vm2, %v1852_v18  ;;  %v1874_v48 = vpop.trf.xlu0 }
 0x399   :  { %2851 = vmatmul.mubr.msk.bf16.vlgmr.msra.gmra.mrb[68].mxu1 %vm1876_vm2, %v1852_v18  ;;  %1967 = vmatprep.mubr.bf16.mxu0 %v5901_v11 }
 0x39a   :  { %2160 = vmatprep.mubr.bf16.mxu1 %v5901_v11  ;;  %v1856_v36 = vpop.trf.xlu1 }
 0x39c   :  { %v1875_v2 = vpop.trf.xlu0 }
 0x39e   :  { %v1857_v19 = vpop.trf.xlu1 }
 0x3a0   :  { %2836 = vmatmul.mubr.msk.bf16.gmra.mrb[72].mxu0 %vm1876_vm2, %v1853_v61  ;;  %v2661_v44 = vpop.trf.xlu0 }
 0x3a1   :  { %2852 = vmatmul.mubr.msk.bf16.gmra.mrb[72].mxu1 %vm1876_vm2, %v1853_v61  ;;  %1977 = vmatprep.mubr.bf16.mxu0 %v5901_v11 }
 0x3a2   :  { %2170 = vmatprep.mubr.bf16.mxu1 %v5901_v11  ;;  %v1858_v34 = vpop.trf.xlu1 }
 0x3a6   :  { %v1859_v9 = vpop.trf.xlu1 }
 0x3a8   :  { %2837 = vmatmul.mubr.msk.bf16.gmra.mrb[76].mxu0 %vm1876_vm2, %v1854_v3 }
 0x3a9   :  { %2853 = vmatmul.mubr.msk.bf16.gmra.mrb[76].mxu1 %vm1876_vm2, %v1854_v3  ;;  %1987 = vmatprep.mubr.bf16.mxu0 %v5901_v11 }
 0x3aa   :  { %2180 = vmatprep.mubr.bf16.mxu1 %v5901_v11 }
 0x3b0   :  { %2838 = vmatmul.mubr.msk.bf16.gmra.mrb[80].mxu0 %vm1876_vm2, %v1855_v49 }
 0x3b1   :  { %2854 = vmatmul.mubr.msk.bf16.gmra.mrb[80].mxu1 %vm1876_vm2, %v1855_v49  ;;  %1997 = vmatprep.mubr.bf16.mxu0 %v5901_v11 }
 0x3b2   :  { %2190 = vmatprep.mubr.bf16.mxu1 %v5901_v11 }
 0x3b8   :  { %2839 = vmatmul.mubr.msk.bf16.gmra.mrb[84].mxu0 %vm1876_vm2, %v1856_v36 }
 0x3b9   :  { %2855 = vmatmul.mubr.msk.bf16.gmra.mrb[84].mxu1 %vm1876_vm2, %v1856_v36  ;;  %2007 = vmatprep.mubr.bf16.mxu0 %v5901_v11 }
 0x3ba   :  { %2200 = vmatprep.mubr.bf16.mxu1 %v5901_v11 }
 0x3c0   :  { %2840 = vmatmul.mubr.msk.bf16.gmra.mrb[88].mxu0 %vm1876_vm2, %v1857_v19 }
 0x3c1   :  { %2856 = vmatmul.mubr.msk.bf16.gmra.mrb[88].mxu1 %vm1876_vm2, %v1857_v19  ;;  %2017 = vmatprep.mubr.bf16.mxu0 %v5901_v11 }
 0x3c2   :  { %2210 = vmatprep.mubr.bf16.mxu1 %v5901_v11 }
 0x3c8   :  { %2841 = vmatmul.mubr.msk.bf16.gmra.mrb[92].mxu0 %vm1876_vm2, %v1858_v34 }
 0x3c9   :  { %2857 = vmatmul.mubr.msk.bf16.gmra.mrb[92].mxu1 %vm1876_vm2, %v1858_v34  ;;  %2027 = vmatprep.mubr.bf16.mxu0 %v5901_v11 }
 0x3ca   :  { %2220 = vmatprep.mubr.bf16.mxu1 %v5901_v11 }
 0x3d0   :  { %2842 = vmatmul.mubr.msk.bf16.gmra.mrb[96].mxu0 %vm1876_vm2, %v1859_v9 }
 0x3d1   :  { %2858 = vmatmul.mubr.msk.bf16.gmra.mrb[96].mxu1 %vm1876_vm2, %v1859_v9  ;;  %2037 = vmatprep.mubr.bf16.mxu0 %v5901_v11  ;;  %v5910_v9 = vld [vmem:[#allocation30_spill] sm:$0xff] }
 0x3d2   :  { %2230 = vmatprep.mubr.bf16.mxu1 %v5901_v11 }
 0x3d8   :  { %2843 = vmatmul.mubr.msk.bf16.gmra.mrb[100].mxu0 %vm1876_vm2, %v1868_v16 }
 0x3d9   :  { %2859 = vmatmul.mubr.msk.bf16.gmra.mrb[100].mxu1 %vm1876_vm2, %v1868_v16  ;;  %2047 = vmatprep.mubr.bf16.mxu0 %v5901_v11 }
 0x3da   :  { %2240 = vmatprep.mubr.bf16.mxu1 %v5901_v11 }
 0x3e0   :  { %2844 = vmatmul.mubr.msk.bf16.gmra.mrb[104].mxu0 %vm1876_vm2, %v1869_v39 }
 0x3e1   :  { %2860 = vmatmul.mubr.msk.bf16.gmra.mrb[104].mxu1 %vm1876_vm2, %v1869_v39  ;;  %2057 = vmatprep.mubr.bf16.mxu0 %v5901_v11  ;;  %v5911_v39 = vld [vmem:[#allocation33_spill] sm:$0xff] }
 0x3e2   :  { %2250 = vmatprep.mubr.bf16.mxu1 %v5901_v11 }
 0x3e8   :  { %2845 = vmatmul.mubr.msk.bf16.gmra.mrb[108].mxu0 %vm1876_vm2, %v1870_v12 }
 0x3e9   :  { %2861 = vmatmul.mubr.msk.bf16.gmra.mrb[108].mxu1 %vm1876_vm2, %v1870_v12  ;;  %2067 = vmatprep.mubr.bf16.mxu0 %v5901_v11 }
 0x3ea   :  { %2260 = vmatprep.mubr.bf16.mxu1 %v5901_v11 }
 0x3f0   :  { %2846 = vmatmul.mubr.msk.bf16.gmra.mrb[112].mxu0 %vm1876_vm2, %v1871_v29 }
 0x3f1   :  { %2862 = vmatmul.mubr.msk.bf16.gmra.mrb[112].mxu1 %vm1876_vm2, %v1871_v29  ;;  %2077 = vmatprep.mubr.bf16.mxu0 %v5901_v11 }
 0x3f2   :  { %2270 = vmatprep.mubr.bf16.mxu1 %v5901_v11 }
 0x3f8   :  { %2847 = vmatmul.mubr.msk.bf16.gmra.mrb[116].mxu0 %vm1876_vm2, %v1872_v7 }
 0x3f9   :  { %2863 = vmatmul.mubr.msk.bf16.gmra.mrb[116].mxu1 %vm1876_vm2, %v1872_v7  ;;  %2087 = vmatprep.mubr.bf16.mxu0 %v5901_v11 }
 0x3fa   :  { %2280 = vmatprep.mubr.bf16.mxu1 %v5901_v11 }
 0x400   :  { %2848 = vmatmul.mubr.msk.bf16.gmra.mrb[120].mxu0 %vm1876_vm2, %v1873_v55 }
 0x401   :  { %2864 = vmatmul.mubr.msk.bf16.gmra.mrb[120].mxu1 %vm1876_vm2, %v1873_v55  ;;  %2097 = vmatprep.mubr.bf16.mxu0 %v5901_v11  ;;  %v5912_v55 = vld [vmem:[#allocation44_spill] sm:$0xff] }
 0x402   :  { %2290 = vmatprep.mubr.bf16.mxu1 %v5901_v11 }
 0x408   :  { %2849 = vmatmul.mubr.msk.bf16.gmra.mrb[124].mxu0 %vm1876_vm2, %v1874_v48 }
 0x409   :  { %2865 = vmatmul.mubr.msk.bf16.gmra.mrb[124].mxu1 %vm1876_vm2, %v1874_v48  ;;  %2107 = vmatprep.mubr.bf16.mxu0 %v5901_v11 }
 0x40a   :  { %2300 = vmatprep.mubr.bf16.mxu1 %v5901_v11 }
 0x410   :  { %2850 = vmatmul.mubr.msk.bf16.gmra.mrb[128].mxu0 %vm1876_vm2, %v1875_v2 }
 0x411   :  { %2866 = vmatmul.mubr.msk.bf16.gmra.mrb[128].mxu1 %vm1876_vm2, %v1875_v2  ;;  %2701 = vmatprep.mubr.bf16.mxu0 %v2661_v44  ;;  %v5913_v2 = vld [vmem:[#allocation31_spill] sm:$0xff] }
 0x412   :  { %2742 = vmatprep.mubr.bf16.mxu1 %v2661_v44 }
 0x46b   :  { %v1959_v1 = vpop.f32.mrb[68].mxu0 }
 0x46c   :  { %v2152_v40 = vpop.f32.mrb[68].mxu1  ;;  %v1961_v58 = vpop.f32.mrb[69].mxu0  ;;  %v2311_v0 = vadd.f32 %v1959_v1, %v5902_v41  ;;  %v5914_v1 = vld [vmem:[#allocation39_spill] sm:$0xff]  ;;  %v5916_v41 = vld [vmem:[#allocation32_spill] sm:$0xff] }
 0x46d   :  { %v2154_v51 = vpop.f32.mrb[69].mxu1  ;;  %v1963_v4 = vpop.f32.mrb[70].mxu0  ;;  %v2313_v11 = vadd.f32 %v2152_v40, %v5904_v38  ;;  %v2312_v53 = vadd.f32 %v1961_v58, %v5905_v17  ;;  %v5915_v58 = vld [vmem:[#allocation36_spill] sm:$0xff] }
 0x46e   :  { %v2315_v57 = vadd.f32 %v1963_v4, %v5903_v23  ;;  %v2156_v28 = vpop.f32.mrb[70].mxu1  ;;  %v1965_v60 = vpop.f32.mrb[71].mxu0  ;;  %v2314_v35 = vadd.f32 %v2154_v51, %v5908_v62  ;;  %v5919_v62 = vld [vmem:[#allocation3_spill] sm:$0xff] }
 0x46f   :  { %v2317_v21 = vadd.f32 %v2156_v28, %v5906_v6  ;;  %v2316_v33 = vadd.f32 %v1965_v60, %v5907_v45  ;;  %v2158_v24 = vpop.f32.mrb[71].mxu1 }
 0x470   :  { %v2471_v27 = vpack.c.bf16 %v2315_v57, %v2311_v0  ;;  %v2318_v59 = vadd.f32 %v2158_v24, %v5909_v42  ;;  %v5917_v57 = vld [vmem:[#allocation37_spill] sm:$0xff] }
 0x471   :  { %v2473_v22 = vpack.c.bf16 %v2317_v21, %v2313_v11  ;;  %v2472_v18 = vpack.c.bf16 %v2316_v33, %v2312_v53  ;;  %v5918_v33 = vld [vmem:[#allocation45_spill] sm:$0xff] }
 0x472   :  { %v2474_v61 = vpack.c.bf16 %v2318_v59, %v2314_v35  ;;  %v5920_v59 = vld [vmem:[#allocation46_spill] sm:$0xff] }
 0x473   :  { %v1969_v3 = vpop.f32.mrb[72].mxu0  ;;  %2669 = vmatprep.subr.bf16.mxu0 %v2472_v18  ;;  %v5921_v18 = vld [vmem:[#allocation50_spill] sm:$0xff] }
 0x474   :  { %v2162_v49 = vpop.f32.mrb[72].mxu1  ;;  %2710 = vmatprep.subr.bf16.mxu1 %v2474_v61  ;;  %v1971_v36 = vpop.f32.mrb[73].mxu0  ;;  %2670 = vmatpush1.bf16.msra.mxu0 %v2471_v27  ;;  %v2319_v16 = vadd.f32 %v1969_v3, %v5910_v9  ;;  %v5922_v3 = vld [vmem:[#allocation4_spill] sm:$0xff]  ;;  %v5924_v9 = vld [vmem:[#allocation2_spill] sm:$0xff] }
 0x475   :  { %v2164_v19 = vpop.f32.mrb[73].mxu1  ;;  %2711 = vmatpush1.bf16.msra.mxu1 %v2473_v22  ;;  %v1973_v34 = vpop.f32.mrb[74].mxu0  ;;  %v2321_v48 = vadd.f32 %v2162_v49, %v5912_v55  ;;  %v2320_v44 = vadd.f32 %v1971_v36, %v5913_v2  ;;  %v5923_v36 = vld [vmem:[#allocation5_spill] sm:$0xff] }
 0x476   :  { %v2323_v12 = vadd.f32 %v1973_v34, %v5911_v39  ;;  %v2166_v29 = vpop.f32.mrb[74].mxu1  ;;  %v1975_v7 = vpop.f32.mrb[75].mxu0  ;;  %v2322_v0 = vadd.f32 %v2164_v19, %v5916_v41  ;;  %v5927_v41 = vld [vmem:[#allocation19_spill] sm:$0xff] }
 0x477   :  { %v2325_v40 = vadd.f32 %v2166_v29, %v5914_v1  ;;  %v2324_v51 = vadd.f32 %v1975_v7, %v5915_v58  ;;  %v2168_v4 = vpop.f32.mrb[75].mxu1 }
 0x478   :  { %v2475_v23 = vpack.c.bf16 %v2323_v12, %v2319_v16  ;;  %v2326_v28 = vadd.f32 %v2168_v4, %v5917_v57  ;;  %v5925_v12 = vld [vmem:[#allocation6_spill] sm:$0xff] }
 0x479   :  { %v2477_v60 = vpack.c.bf16 %v2325_v40, %v2321_v48  ;;  %v2476_v38 = vpack.c.bf16 %v2324_v51, %v2320_v44  ;;  %v5926_v51 = vld [vmem:[#allocation7_spill] sm:$0xff] }
 0x47a   :  { %v2478_v11 = vpack.c.bf16 %v2326_v28, %v2322_v0  ;;  %v5928_v28 = vld [vmem:[#allocation8_spill] sm:$0xff] }
 0x47b   :  { %v1979_v17 = vpop.f32.mrb[76].mxu0  ;;  %2671 = vmatprep.subr.bf16.mxu0 %v2476_v38  ;;  %v5929_v38 = vld [vmem:[#allocation9_spill] sm:$0xff] }
 0x47c   :  { %v2172_v53 = vpop.f32.mrb[76].mxu1  ;;  %2712 = vmatprep.subr.bf16.mxu1 %v2478_v11  ;;  %v1981_v6 = vpop.f32.mrb[77].mxu0  ;;  %2672 = vmatpush1.bf16.msra.mxu0 %v2475_v23  ;;  %v2327_v24 = vadd.f32 %v1979_v17, %v5918_v33  ;;  %v5930_v17 = vld [vmem:[#allocation67_spill] sm:$0xff]  ;;  %v5932_v33 = vld [vmem:[#allocation10_spill] sm:$0xff] }
 0x47d   :  { %v2174_v21 = vpop.f32.mrb[77].mxu1  ;;  %2713 = vmatpush1.bf16.msra.mxu1 %v2477_v60  ;;  %v1983_v45 = vpop.f32.mrb[78].mxu0  ;;  %v2329_v22 = vadd.f32 %v2172_v53, %v5920_v59  ;;  %v2328_v61 = vadd.f32 %v1981_v6, %v5921_v18  ;;  %v5931_v6 = vld [vmem:[#allocation65_spill] sm:$0xff] }
 0x47e   :  { %v2331_v35 = vadd.f32 %v1983_v45, %v5919_v62  ;;  %v2176_v27 = vpop.f32.mrb[78].mxu1  ;;  %v1985_v42 = vpop.f32.mrb[79].mxu0  ;;  %v2330_v16 = vadd.f32 %v2174_v21, %v5924_v9  ;;  %v5935_v9 = vld [vmem:[#allocation82_spill] sm:$0xff] }
 0x47f   :  { %v2333_v49 = vadd.f32 %v2176_v27, %v5922_v3  ;;  %v2332_v19 = vadd.f32 %v1985_v42, %v5923_v36  ;;  %v2178_v34 = vpop.f32.mrb[79].mxu1 }
 0x480   :  { %v2479_v39 = vpack.c.bf16 %v2331_v35, %v2327_v24  ;;  %v2334_v29 = vadd.f32 %v2178_v34, %v5925_v12  ;;  %v5933_v35 = vld [vmem:[#allocation66_spill] sm:$0xff] }
 0x481   :  { %v2481_v7 = vpack.c.bf16 %v2333_v49, %v2329_v22  ;;  %v2480_v55 = vpack.c.bf16 %v2332_v19, %v2328_v61  ;;  %v5934_v19 = vld [vmem:[#allocation74_spill] sm:$0xff] }
 0x482   :  { %v2482_v48 = vpack.c.bf16 %v2334_v29, %v2330_v16  ;;  %v5936_v29 = vld [vmem:[#allocation24_spill] sm:$0xff] }
 0x483   :  { %v1989_v2 = vpop.f32.mrb[80].mxu0  ;;  %2673 = vmatprep.subr.bf16.mxu0 %v2480_v55  ;;  %v5937_v55 = vld [vmem:[#allocation25_spill] sm:$0xff] }
 0x484   :  { %v2182_v44 = vpop.f32.mrb[80].mxu1  ;;  %2714 = vmatprep.subr.bf16.mxu1 %v2482_v48  ;;  %v1991_v1 = vpop.f32.mrb[81].mxu0  ;;  %2674 = vmatpush1.bf16.msra.mxu0 %v2479_v39  ;;  %v2335_v4 = vadd.f32 %v1989_v2, %v5926_v51  ;;  %v5938_v2 = vld [vmem:[#allocation84_spill] sm:$0xff]  ;;  %v5940_v51 = vld [vmem:[#allocation26_spill] sm:$0xff] }
 0x485   :  { %v2184_v40 = vpop.f32.mrb[81].mxu1  ;;  %2715 = vmatpush1.bf16.msra.mxu1 %v2481_v7  ;;  %v1993_v58 = vpop.f32.mrb[82].mxu0  ;;  %v2337_v60 = vadd.f32 %v2182_v44, %v5928_v28  ;;  %v2336_v11 = vadd.f32 %v1991_v1, %v5929_v38  ;;  %v5939_v1 = vld [vmem:[#allocation80_spill] sm:$0xff] }
 0x486   :  { %v2339_v0 = vadd.f32 %v1993_v58, %v5927_v41  ;;  %v2186_v23 = vpop.f32.mrb[82].mxu1  ;;  %v1995_v57 = vpop.f32.mrb[83].mxu0  ;;  %v2338_v24 = vadd.f32 %v2184_v40, %v5932_v33  ;;  %v5943_v33 = vld [vmem:[#allocation43_spill] sm:$0xff] }
 0x487   :  { %v2341_v53 = vadd.f32 %v2186_v23, %v5930_v17  ;;  %v2340_v21 = vadd.f32 %v1995_v57, %v5931_v6  ;;  %v2188_v45 = vpop.f32.mrb[83].mxu1 }
 0x488   :  { %v2483_v62 = vpack.c.bf16 %v2339_v0, %v2335_v4  ;;  %v2342_v27 = vadd.f32 %v2188_v45, %v5933_v35  ;;  %v5941_v0 = vld [vmem:[#allocation85_spill] sm:$0xff] }
 0x489   :  { %v2485_v42 = vpack.c.bf16 %v2341_v53, %v2337_v60  ;;  %v2484_v59 = vpack.c.bf16 %v2340_v21, %v2336_v11  ;;  %v5942_v21 = vld [vmem:[#allocation34_spill] sm:$0xff] }
 0x48a   :  { %v2486_v22 = vpack.c.bf16 %v2342_v27, %v2338_v24  ;;  %v5944_v27 = vld [vmem:[#allocation96_spill] sm:$0xff] }
 0x48b   :  { %v1999_v18 = vpop.f32.mrb[84].mxu0  ;;  %2675 = vmatprep.subr.bf16.mxu0 %v2484_v59  ;;  %v5945_v59 = vld [vmem:[#allocation93_spill] sm:$0xff] }
 0x48c   :  { %v2192_v61 = vpop.f32.mrb[84].mxu1  ;;  %2716 = vmatprep.subr.bf16.mxu1 %v2486_v22  ;;  %v2001_v3 = vpop.f32.mrb[85].mxu0  ;;  %2676 = vmatpush1.bf16.msra.mxu0 %v2483_v62  ;;  %v2343_v34 = vadd.f32 %v1999_v18, %v5934_v19  ;;  %v5946_v18 = vld [vmem:[#allocation91_spill] sm:$0xff]  ;;  %v5948_v19 = vld [vmem:[#allocation94_spill] sm:$0xff] }
 0x48d   :  { %v2194_v49 = vpop.f32.mrb[85].mxu1  ;;  %2717 = vmatpush1.bf16.msra.mxu1 %v2485_v42  ;;  %v2003_v36 = vpop.f32.mrb[86].mxu0  ;;  %v2345_v7 = vadd.f32 %v2192_v61, %v5936_v29  ;;  %v2344_v48 = vadd.f32 %v2001_v3, %v5937_v55  ;;  %v5947_v3 = vld [vmem:[#allocation42_spill] sm:$0xff] }
 0x48e   :  { %v2347_v16 = vadd.f32 %v2003_v36, %v5935_v9  ;;  %v2196_v39 = vpop.f32.mrb[86].mxu1  ;;  %v2005_v12 = vpop.f32.mrb[87].mxu0  ;;  %v2346_v4 = vadd.f32 %v2194_v49, %v5940_v51  ;;  %v5951_v51 = vld [vmem:[#allocation98_spill] sm:$0xff] }
 0x48f   :  { %v2349_v44 = vadd.f32 %v2196_v39, %v5938_v2  ;;  %v2348_v40 = vadd.f32 %v2005_v12, %v5939_v1  ;;  %v2198_v58 = vpop.f32.mrb[87].mxu1 }
 0x490   :  { %v2487_v41 = vpack.c.bf16 %v2347_v16, %v2343_v34  ;;  %v2350_v23 = vadd.f32 %v2198_v58, %v5941_v0  ;;  %v5949_v16 = vld [vmem:[#allocation90_spill] sm:$0xff] }
 0x491   :  { %v2489_v57 = vpack.c.bf16 %v2349_v44, %v2345_v7  ;;  %v2488_v28 = vpack.c.bf16 %v2348_v40, %v2344_v48  ;;  %v5950_v40 = vld [vmem:[#allocation47_spill] sm:$0xff] }
 0x492   :  { %v2490_v60 = vpack.c.bf16 %v2350_v23, %v2346_v4  ;;  %v5952_v23 = vld [vmem:[#allocation11_spill] sm:$0xff] }
 0x493   :  { %v2009_v38 = vpop.f32.mrb[88].mxu0  ;;  %2677 = vmatprep.subr.bf16.mxu0 %v2488_v28  ;;  %v5953_v28 = vld [vmem:[#allocation48_spill] sm:$0xff] }
 0x494   :  { %v2202_v11 = vpop.f32.mrb[88].mxu1  ;;  %2718 = vmatprep.subr.bf16.mxu1 %v2490_v60  ;;  %v2011_v17 = vpop.f32.mrb[89].mxu0  ;;  %2678 = vmatpush1.bf16.msra.mxu0 %v2487_v41  ;;  %v2351_v45 = vadd.f32 %v2009_v38, %v5942_v21  ;;  %v5954_v38 = vld [vmem:[#allocation49_spill] sm:$0xff]  ;;  %v5956_v21 = vld [vmem:[#allocation51_spill] sm:$0xff] }
 0x495   :  { %v2204_v53 = vpop.f32.mrb[89].mxu1  ;;  %2719 = vmatpush1.bf16.msra.mxu1 %v2489_v57  ;;  %v2013_v6 = vpop.f32.mrb[90].mxu0  ;;  %v2353_v42 = vadd.f32 %v2202_v11, %v5944_v27  ;;  %v2352_v22 = vadd.f32 %v2011_v17, %v5945_v59  ;;  %v5955_v17 = vld [vmem:[#allocation99_spill] sm:$0xff] }
 0x496   :  { %v2355_v24 = vadd.f32 %v2013_v6, %v5943_v33  ;;  %v2206_v62 = vpop.f32.mrb[90].mxu1  ;;  %v2015_v35 = vpop.f32.mrb[91].mxu0  ;;  %v2354_v34 = vadd.f32 %v2204_v53, %v5948_v19  ;;  %v5959_v19 = vld [vmem:[#allocation52_spill] sm:$0xff] }
 0x497   :  { %v2357_v61 = vadd.f32 %v2206_v62, %v5946_v18  ;;  %v2356_v49 = vadd.f32 %v2015_v35, %v5947_v3  ;;  %v2208_v36 = vpop.f32.mrb[91].mxu1 }
 0x498   :  { %v2491_v9 = vpack.c.bf16 %v2355_v24, %v2351_v45  ;;  %v2358_v39 = vadd.f32 %v2208_v36, %v5949_v16  ;;  %v5957_v24 = vld [vmem:[#allocation100_spill] sm:$0xff] }
 0x499   :  { %v2493_v12 = vpack.c.bf16 %v2357_v61, %v2353_v42  ;;  %v2492_v29 = vpack.c.bf16 %v2356_v49, %v2352_v22  ;;  %v5958_v49 = vld [vmem:[#allocation55_spill] sm:$0xff] }
 0x49a   :  { %v2494_v7 = vpack.c.bf16 %v2358_v39, %v2354_v34  ;;  %v5960_v39 = vld [vmem:[#allocation101_spill] sm:$0xff] }
 0x49b   :  { %v2019_v55 = vpop.f32.mrb[92].mxu0  ;;  %2679 = vmatprep.subr.bf16.mxu0 %v2492_v29  ;;  %v5961_v29 = vld [vmem:[#allocation13_spill] sm:$0xff] }
 0x49c   :  { %v2212_v48 = vpop.f32.mrb[92].mxu1  ;;  %2720 = vmatprep.subr.bf16.mxu1 %v2494_v7  ;;  %v2021_v2 = vpop.f32.mrb[93].mxu0  ;;  %2680 = vmatpush1.bf16.msra.mxu0 %v2491_v9  ;;  %v2359_v58 = vadd.f32 %v2019_v55, %v5950_v40  ;;  %v5962_v55 = vld [vmem:[#allocation54_spill] sm:$0xff]  ;;  %v5964_v40 = vld [vmem:[#allocation57_spill] sm:$0xff] }
 0x49d   :  { %v2214_v44 = vpop.f32.mrb[93].mxu1  ;;  %2721 = vmatpush1.bf16.msra.mxu1 %v2493_v12  ;;  %v2023_v1 = vpop.f32.mrb[94].mxu0  ;;  %v2361_v57 = vadd.f32 %v2212_v48, %v5952_v23  ;;  %v2360_v60 = vadd.f32 %v2021_v2, %v5953_v28  ;;  %v5963_v2 = vld [vmem:[#allocation56_spill] sm:$0xff] }
 0x49e   :  { %v2363_v4 = vadd.f32 %v2023_v1, %v5951_v51  ;;  %v2216_v41 = vpop.f32.mrb[94].mxu1  ;;  %v2025_v0 = vpop.f32.mrb[95].mxu0  ;;  %v2362_v45 = vadd.f32 %v2214_v44, %v5956_v21  ;;  %v5967_v21 = vld [vmem:[#allocation58_spill] sm:$0xff] }
 0x49f   :  { %v2365_v11 = vadd.f32 %v2216_v41, %v5954_v38  ;;  %v2364_v53 = vadd.f32 %v2025_v0, %v5955_v17  ;;  %v2218_v6 = vpop.f32.mrb[95].mxu1 }
 0x4a0   :  { %v2495_v33 = vpack.c.bf16 %v2363_v4, %v2359_v58  ;;  %v2366_v62 = vadd.f32 %v2218_v6, %v5957_v24  ;;  %v5965_v4 = vld [vmem:[#allocation53_spill] sm:$0xff] }
 0x4a1   :  { %v2497_v35 = vpack.c.bf16 %v2365_v11, %v2361_v57  ;;  %v2496_v27 = vpack.c.bf16 %v2364_v53, %v2360_v60  ;;  %v5966_v53 = vld [vmem:[#allocation61_spill] sm:$0xff] }
 0x4a2   :  { %v2498_v42 = vpack.c.bf16 %v2366_v62, %v2362_v45  ;;  %v5968_v62 = vld [vmem:[#allocation103_spill] sm:$0xff] }
 0x4a3   :  { %v2029_v59 = vpop.f32.mrb[96].mxu0  ;;  %2681 = vmatprep.subr.bf16.mxu0 %v2496_v27  ;;  %v5969_v27 = vld [vmem:[#allocation59_spill] sm:$0xff] }
 0x4a4   :  { %v2222_v22 = vpop.f32.mrb[96].mxu1  ;;  %2722 = vmatprep.subr.bf16.mxu1 %v2498_v42  ;;  %v2031_v18 = vpop.f32.mrb[97].mxu0  ;;  %2682 = vmatpush1.bf16.msra.mxu0 %v2495_v33  ;;  %v2367_v36 = vadd.f32 %v2029_v59, %v5958_v49  ;;  %v5970_v59 = vld [vmem:[#allocation21_spill] sm:$0xff]  ;;  %v5972_v49 = vld [vmem:[#allocation62_spill] sm:$0xff] }
 0x4a5   :  { %v2224_v61 = vpop.f32.mrb[97].mxu1  ;;  %2723 = vmatpush1.bf16.msra.mxu1 %v2497_v35  ;;  %v2033_v3 = vpop.f32.mrb[98].mxu0  ;;  %v2369_v12 = vadd.f32 %v2222_v22, %v5960_v39  ;;  %v2368_v7 = vadd.f32 %v2031_v18, %v5961_v29  ;;  %v5971_v18 = vld [vmem:[#allocation60_spill] sm:$0xff] }
 0x4a6   :  { %v2371_v34 = vadd.f32 %v2033_v3, %v5959_v19  ;;  %v2226_v9 = vpop.f32.mrb[98].mxu1  ;;  %v2035_v16 = vpop.f32.mrb[99].mxu0  ;;  %v2370_v58 = vadd.f32 %v2224_v61, %v5964_v40 }
 0x4a7   :  { %v2373_v48 = vadd.f32 %v2226_v9, %v5962_v55  ;;  %v2372_v44 = vadd.f32 %v2035_v16, %v5963_v2  ;;  %v2228_v1 = vpop.f32.mrb[99].mxu1 }
 0x4a8   :  { %v2499_v51 = vpack.c.bf16 %v2371_v34, %v2367_v36  ;;  %v2374_v41 = vadd.f32 %v2228_v1, %v5965_v4  ;;  %v5973_v34 = vld [vmem:[#allocation102_spill] sm:$0xff] }
 0x4a9   :  { %v2501_v0 = vpack.c.bf16 %v2373_v48, %v2369_v12  ;;  %v2500_v23 = vpack.c.bf16 %v2372_v44, %v2368_v7 }
 0x4aa   :  { %v2502_v57 = vpack.c.bf16 %v2374_v41, %v2370_v58 }
 0x4ab   :  { %v2039_v28 = vpop.f32.mrb[100].mxu0  ;;  %2683 = vmatprep.subr.bf16.mxu0 %v2500_v23 }
 0x4ac   :  { %v2232_v60 = vpop.f32.mrb[100].mxu1  ;;  %2724 = vmatprep.subr.bf16.mxu1 %v2502_v57  ;;  %v2041_v38 = vpop.f32.mrb[101].mxu0  ;;  %2684 = vmatpush1.bf16.msra.mxu0 %v2499_v51  ;;  %v2375_v6 = vadd.f32 %v2039_v28, %v5966_v53  ;;  %v5975_v28 = vld [vmem:[#allocation63_spill] sm:$0xff] }
 0x4ad   :  { %v2234_v11 = vpop.f32.mrb[101].mxu1  ;;  %2725 = vmatpush1.bf16.msra.mxu1 %v2501_v0  ;;  %v2043_v17 = vpop.f32.mrb[102].mxu0  ;;  %v2377_v35 = vadd.f32 %v2232_v60, %v5968_v62  ;;  %v2376_v42 = vadd.f32 %v2041_v38, %v5969_v27  ;;  %v5974_v0 = vld [vmem:[#allocation23_spill] sm:$0xff] }
 0x4ae   :  { %v2379_v45 = vadd.f32 %v2043_v17, %v5967_v21  ;;  %v2236_v33 = vpop.f32.mrb[102].mxu1  ;;  %v2045_v24 = vpop.f32.mrb[103].mxu0  ;;  %v2378_v36 = vadd.f32 %v2234_v11, %v5972_v49  ;;  %v5976_v11 = vld [vmem:[#allocation64_spill] sm:$0xff]  ;;  %v5982_v49 = vld [vmem:[#allocation71_spill] sm:$0xff] }
 0x4af   :  { %v2381_v22 = vadd.f32 %v2236_v33, %v5970_v59  ;;  %v2380_v61 = vadd.f32 %v2045_v24, %v5971_v18  ;;  %v2238_v3 = vpop.f32.mrb[103].mxu1  ;;  %v5978_v24 = vld [vmem:[#allocation68_spill] sm:$0xff] }
 0x4b0   :  { %v2503_v19 = vpack.c.bf16 %v2379_v45, %v2375_v6  ;;  %v2382_v9 = vadd.f32 %v2238_v3, %v5973_v34  ;;  %v5977_v45 = vld [vmem:[#allocation72_spill] sm:$0xff]  ;;  %v5983_v34 = vld [vmem:[#allocation73_spill] sm:$0xff] }
 0x4b1   :  { %v2505_v16 = vpack.c.bf16 %v2381_v22, %v2377_v35  ;;  %v2504_v39 = vpack.c.bf16 %v2380_v61, %v2376_v42  ;;  %v5979_v42 = vld [vmem:[#allocation105_spill] sm:$0xff]  ;;  %v5981_v61 = vld [vmem:[#allocation70_spill] sm:$0xff] }
 0x4b2   :  { %v2506_v12 = vpack.c.bf16 %v2382_v9, %v2378_v36  ;;  %v5980_v22 = vld [vmem:[#allocation69_spill] sm:$0xff] }
 0x4b3   :  { %v2049_v29 = vpop.f32.mrb[104].mxu0  ;;  %2685 = vmatprep.subr.bf16.mxu0 %v2504_v39  ;;  %v5984_v39 = vld [vmem:[#allocation104_spill] sm:$0xff] }
 0x4b4   :  { %v2242_v7 = vpop.f32.mrb[104].mxu1  ;;  %2726 = vmatprep.subr.bf16.mxu1 %v2506_v12  ;;  %v2051_v55 = vpop.f32.mrb[105].mxu0  ;;  %2686 = vmatpush1.bf16.msra.mxu0 %v2503_v19  ;;  %v2383_v44 = vadd.f32 %v2049_v29, %v4916_v25 }
 0x4b5   :  { %v2244_v48 = vpop.f32.mrb[105].mxu1  ;;  %2727 = vmatpush1.bf16.msra.mxu1 %v2505_v16  ;;  %v2053_v2 = vpop.f32.mrb[106].mxu0  ;;  %v2385_v51 = vadd.f32 %v2242_v7, %v4927_v43  ;;  %v2384_v4 = vadd.f32 %v2051_v55, %v4905_v14 }
 0x4b6   :  { %v2387_v1 = vadd.f32 %v2053_v2, %v4900_v13  ;;  %v2246_v40 = vpop.f32.mrb[106].mxu1  ;;  %v2055_v58 = vpop.f32.mrb[107].mxu0  ;;  %v2386_v60 = vadd.f32 %v2244_v48, %v5975_v28 }
 0x4b7   :  { %v2389_v41 = vadd.f32 %v2246_v40, %v4909_v5  ;;  %v2388_v23 = vadd.f32 %v2055_v58, %v5974_v0  ;;  %v2248_v57 = vpop.f32.mrb[107].mxu1 }
 0x4b8   :  { %v2507_v38 = vpack.c.bf16 %v2387_v1, %v2383_v44  ;;  %v2390_v17 = vadd.f32 %v2248_v57, %v5976_v11 }
 0x4b9   :  { %v2509_v53 = vpack.c.bf16 %v2389_v41, %v2385_v51  ;;  %v2508_v25 = vpack.c.bf16 %v2388_v23, %v2384_v4 }
 0x4ba   :  { %v2510_v6 = vpack.c.bf16 %v2390_v17, %v2386_v60 }
 0x4bb   :  { %v2059_v13 = vpop.f32.mrb[108].mxu0  ;;  %2687 = vmatprep.subr.bf16.mxu0 %v2508_v25 }
 0x4bc   :  { %v2252_v21 = vpop.f32.mrb[108].mxu1  ;;  %2728 = vmatprep.subr.bf16.mxu1 %v2510_v6  ;;  %v2061_v43 = vpop.f32.mrb[109].mxu0  ;;  %2688 = vmatpush1.bf16.msra.mxu0 %v2507_v38  ;;  %v2391_v33 = vadd.f32 %v2059_v13, %v5977_v45  ;;  %v5985_v13 = vld [vmem:[#allocation79_spill] sm:$0xff]  ;;  %v5988_v45 = vld [vmem:[#allocation76_spill] sm:$0xff] }
 0x4bd   :  { %v2254_v14 = vpop.f32.mrb[109].mxu1  ;;  %2729 = vmatpush1.bf16.msra.mxu1 %v2509_v53  ;;  %v2063_v5 = vpop.f32.mrb[110].mxu0  ;;  %v2393_v59 = vadd.f32 %v2252_v21, %v5979_v42  ;;  %v2392_v18 = vadd.f32 %v2061_v43, %v5980_v22  ;;  %v5986_v21 = vld [vmem:[#allocation75_spill] sm:$0xff] }
 0x4be   :  { %v2395_v62 = vadd.f32 %v2063_v5, %v5978_v24  ;;  %v2256_v35 = vpop.f32.mrb[110].mxu1  ;;  %v2065_v27 = vpop.f32.mrb[111].mxu0  ;;  %v2394_v9 = vadd.f32 %v2254_v14, %v5983_v34  ;;  %v5987_v5 = vld [vmem:[#allocation83_spill] sm:$0xff]  ;;  %v5989_v24 = vld [vmem:[#allocation77_spill] sm:$0xff] }
 0x4bf   :  { %v2397_v3 = vadd.f32 %v2256_v35, %v5981_v61  ;;  %v2396_v36 = vadd.f32 %v2065_v27, %v5982_v49  ;;  %v2258_v19 = vpop.f32.mrb[111].mxu1  ;;  %v5990_v35 = vld [vmem:[#allocation78_spill] sm:$0xff]  ;;  %v5992_v61 = vld [vmem:[#allocation81_spill] sm:$0xff] }
 0x4c0   :  { %v2511_v16 = vpack.c.bf16 %v2395_v62, %v2391_v33  ;;  %v2398_v12 = vadd.f32 %v2258_v19, %v5984_v39 }
 0x4c1   :  { %v2513_v29 = vpack.c.bf16 %v2397_v3, %v2393_v59  ;;  %v2512_v7 = vpack.c.bf16 %v2396_v36, %v2392_v18  ;;  %v5991_v59 = vld [vmem:[#allocation27_spill] sm:$0xff] }
 0x4c2   :  { %v2514_v55 = vpack.c.bf16 %v2398_v12, %v2394_v9 }
 0x4c3   :  { %v2069_v48 = vpop.f32.mrb[112].mxu0  ;;  %2689 = vmatprep.subr.bf16.mxu0 %v2512_v7 }
 0x4c4   :  { %v2262_v2 = vpop.f32.mrb[112].mxu1  ;;  %2730 = vmatprep.subr.bf16.mxu1 %v2514_v55  ;;  %v2071_v44 = vpop.f32.mrb[113].mxu0  ;;  %2690 = vmatpush1.bf16.msra.mxu0 %v2511_v16  ;;  %v2399_v58 = vadd.f32 %v2069_v48, %v5048_v56 }
 0x4c5   :  { %v2264_v1 = vpop.f32.mrb[113].mxu1  ;;  %2731 = vmatpush1.bf16.msra.mxu1 %v2513_v29  ;;  %v2073_v40 = vpop.f32.mrb[114].mxu0  ;;  %v2401_v0 = vadd.f32 %v2262_v2, %v5058_v52  ;;  %v2400_v23 = vadd.f32 %v2071_v44, %v5038_v47 }
 0x4c6   :  { %v2403_v51 = vadd.f32 %v2073_v40, %v5029_v26  ;;  %v2266_v4 = vpop.f32.mrb[114].mxu1  ;;  %v2075_v41 = vpop.f32.mrb[115].mxu0  ;;  %v2402_v38 = vadd.f32 %v2264_v1, %v5051_v50 }
 0x4c7   :  { %v2405_v57 = vadd.f32 %v2266_v4, %v5041_v37  ;;  %v2404_v28 = vadd.f32 %v2075_v41, %v5044_v10  ;;  %v2268_v60 = vpop.f32.mrb[115].mxu1 }
 0x4c8   :  { %v2515_v11 = vpack.c.bf16 %v2403_v51, %v2399_v58  ;;  %v2406_v17 = vadd.f32 %v2268_v60, %v5054_v8  ;;  %v5994_v60 = vld [vmem:[#allocation28_spill] sm:$0xff] }
 0x4c9   :  { %v2517_v53 = vpack.c.bf16 %v2405_v57, %v2401_v0  ;;  %v2516_v56 = vpack.c.bf16 %v2404_v28, %v2400_v23  ;;  %v5993_v28 = vld [vmem:[#allocation87_spill] sm:$0xff] }
 0x4ca   :  { %v2518_v25 = vpack.c.bf16 %v2406_v17, %v2402_v38  ;;  %v5995_v17 = vld [vmem:[#allocation89_spill] sm:$0xff] }
 0x4cb   :  { %v2079_v26 = vpop.f32.mrb[116].mxu0  ;;  %2691 = vmatprep.subr.bf16.mxu0 %v2516_v56 }
 0x4cc   :  { %v2272_v6 = vpop.f32.mrb[116].mxu1  ;;  %2732 = vmatprep.subr.bf16.mxu1 %v2518_v25  ;;  %v2081_v52 = vpop.f32.mrb[117].mxu0  ;;  %2692 = vmatpush1.bf16.msra.mxu0 %v2515_v11  ;;  %v2407_v10 = vadd.f32 %v2079_v26, %v5985_v13  ;;  %v5997_v25 = vld [vmem:[#allocation35_spill] sm:$0xff] }
 0x4cd   :  { %v2274_v47 = vpop.f32.mrb[117].mxu1  ;;  %2733 = vmatpush1.bf16.msra.mxu1 %v2517_v53  ;;  %v2083_v37 = vpop.f32.mrb[118].mxu0  ;;  %v2409_v8 = vadd.f32 %v2272_v6, %v5987_v5  ;;  %v2408_v33 = vadd.f32 %v2081_v52, %v5988_v45  ;;  %v5996_v53 = vld [vmem:[#allocation29_spill] sm:$0xff]  ;;  %v5998_v6 = vld [vmem:[#allocation86_spill] sm:$0xff] }
 0x4ce   :  { %v2411_v43 = vadd.f32 %v2083_v37, %v5986_v21  ;;  %v2276_v50 = vpop.f32.mrb[118].mxu1  ;;  %v2085_v14 = vpop.f32.mrb[119].mxu0  ;;  %v2410_v22 = vadd.f32 %v2274_v47, %v5991_v59  ;;  %v5999_v37 = vld [vmem:[#allocation88_spill] sm:$0xff]  ;;  %v6000_v21 = vld [vmem:[#allocation38_spill] sm:$0xff] }
 0x4cf   :  { %v2413_v62 = vadd.f32 %v2276_v50, %v5989_v24  ;;  %v2412_v27 = vadd.f32 %v2085_v14, %v5990_v35  ;;  %v2278_v42 = vpop.f32.mrb[119].mxu1  ;;  %v6001_v35 = vld [vmem:[#allocation97_spill] sm:$0xff] }
 0x4d0   :  { %v2519_v18 = vpack.c.bf16 %v2411_v43, %v2407_v10  ;;  %v2414_v3 = vadd.f32 %v2278_v42, %v5992_v61  ;;  %v6002_v42 = vld [vmem:[#allocation40_spill] sm:$0xff] }
 0x4d1   :  { %v2521_v49 = vpack.c.bf16 %v2413_v62, %v2409_v8  ;;  %v2520_v36 = vpack.c.bf16 %v2412_v27, %v2408_v33  ;;  %v6003_v61 = vld [vmem:[#allocation108_spill] sm:$0xff] }
 0x4d2   :  { %v2522_v19 = vpack.c.bf16 %v2414_v3, %v2410_v22 }
 0x4d3   :  { %v2089_v34 = vpop.f32.mrb[120].mxu0  ;;  %2693 = vmatprep.subr.bf16.mxu0 %v2520_v36 }
 0x4d4   :  { %v2282_v9 = vpop.f32.mrb[120].mxu1  ;;  %2734 = vmatprep.subr.bf16.mxu1 %v2522_v19  ;;  %v2091_v16 = vpop.f32.mrb[121].mxu0  ;;  %2694 = vmatpush1.bf16.msra.mxu0 %v2519_v18  ;;  %v2415_v29 = vadd.f32 %v2089_v34, %v5162_v63  ;;  %v6005_v19 = vld [vmem:[#allocation92_spill] sm:$0xff] }
 0x4d5   :  { %v2284_v39 = vpop.f32.mrb[121].mxu1  ;;  %2735 = vmatpush1.bf16.msra.mxu1 %v2521_v49  ;;  %v2093_v12 = vpop.f32.mrb[122].mxu0  ;;  %v2417_v2 = vadd.f32 %v2282_v9, %v5171_v30  ;;  %v2416_v44 = vadd.f32 %v2091_v16, %v5153_v20  ;;  %v6004_v49 = vld [vmem:[#allocation41_spill] sm:$0xff]  ;;  %v6006_v9 = vld [vmem:[#allocation95_spill] sm:$0xff] }
 0x4d6   :  { %v2419_v7 = vadd.f32 %v2093_v12, %v5150_v54  ;;  %v2286_v55 = vpop.f32.mrb[122].mxu1  ;;  %v2095_v48 = vpop.f32.mrb[123].mxu0  ;;  %v2418_v51 = vadd.f32 %v2284_v39, %v5165_v15  ;;  %v6007_v12 = vld [vmem:[#allocation106_spill] sm:$0xff] }
 0x4d7   :  { %v2421_v1 = vadd.f32 %v2286_v55, %v5156_v46  ;;  %v2420_v40 = vadd.f32 %v2095_v48, %v5159_v32  ;;  %v2288_v58 = vpop.f32.mrb[123].mxu1  ;;  %v6008_v55 = vld [vmem:[#allocation107_spill] sm:$0xff] }
 0x4d8   :  { %v2523_v4 = vpack.c.bf16 %v2419_v7, %v2415_v29  ;;  %v2422_v41 = vadd.f32 %v2288_v58, %v5168_v31  ;;  %v2539_v58 = vpop.permute.xlu0 %2538 }
 0x4d9   :  { %v2525_v0 = vpack.c.bf16 %v2421_v1, %v2417_v2  ;;  %v2524_v63 = vpack.c.bf16 %v2420_v40, %v2416_v44  ;;  %v2645_v40 = vpop.trf.xlu1 }
 0x4da   :  { %v2526_v23 = vpack.c.bf16 %v2422_v41, %v2418_v51 }
 0x4db   :  { %v2099_v54 = vpop.f32.mrb[124].mxu0  ;;  %2695 = vmatprep.subr.bf16.mxu0 %v2524_v63 }
 0x4dc   :  { %v2292_v57 = vpop.f32.mrb[124].mxu1  ;;  %2736 = vmatprep.subr.bf16.mxu1 %v2526_v23  ;;  %v2101_v30 = vpop.f32.mrb[125].mxu0  ;;  %2696 = vmatpush1.bf16.msra.mxu0 %v2523_v4  ;;  %v2423_v32 = vadd.f32 %v2099_v54, %v5993_v28 }
 0x4dd   :  { %v2294_v20 = vpop.f32.mrb[125].mxu1  ;;  %2737 = vmatpush1.bf16.msra.mxu1 %v2525_v0  ;;  %v2103_v46 = vpop.f32.mrb[126].mxu0  ;;  %v2425_v31 = vadd.f32 %v2292_v57, %v5995_v17  ;;  %v2424_v56 = vadd.f32 %v2101_v30, %v5996_v53 }
 0x4de   :  { %v2427_v38 = vadd.f32 %v2103_v46, %v5994_v60  ;;  %v2296_v15 = vpop.f32.mrb[126].mxu1  ;;  %v2105_v11 = vpop.f32.mrb[127].mxu0  ;;  %v2426_v13 = vadd.f32 %v2294_v20, %v5999_v37 }
 0x4df   :  { %v2429_v26 = vadd.f32 %v2296_v15, %v5997_v25  ;;  %v2428_v52 = vadd.f32 %v2105_v11, %v5998_v6  ;;  %v2298_v47 = vpop.f32.mrb[127].mxu1  ;;  %v2759_v51 = vpop.permute.xlu1 %2758  ;;  %v3454_v11 = vld [vmem:[%s5514_s11] sm:$0xff] }
 0x4e0   :  { %v2527_v10 = vpack.c.bf16 %v2427_v38, %v2423_v32  ;;  %v2430_v43 = vadd.f32 %v2298_v47, %v6000_v21  ;;  %v3457_v47 = vld [vmem:[%s5514_s11 + $0x18] sm:$0xff] }
 0x4e1   :  { %v2529_v50 = vpack.c.bf16 %v2429_v26, %v2425_v31  ;;  %v2528_v14 = vpack.c.bf16 %v2428_v52, %v2424_v56  ;;  %v3455_v56 = vld [vmem:[%s5514_s11 + $0x10] sm:$0xff]  ;;  %v3456_v26 = vld [vmem:[%s5514_s11 + $0x8] sm:$0xff] }
 0x4e2   :  { %v2530_v5 = vpack.c.bf16 %v2430_v43, %v2426_v13 }
 0x4e3   :  { %v2109_v8 = vpop.f32.mrb[128].mxu0  ;;  %2697 = vmatprep.subr.bf16.mxu0 %v2528_v14  ;;  %v2773_v53 = vpop.permute.xlu1 %2772 }
 0x4e4   :  { %v2302_v45 = vpop.f32.mrb[128].mxu1  ;;  %2738 = vmatprep.subr.bf16.mxu1 %v2530_v5  ;;  %v2111_v33 = vpop.f32.mrb[129].mxu0  ;;  %2698 = vmatpush1.bf16.msra.mxu0 %v2527_v10  ;;  %v2431_v27 = vadd.f32 %v2109_v8, %v6001_v35 }
 0x4e5   :  { %v2304_v24 = vpop.f32.mrb[129].mxu1  ;;  %2739 = vmatpush1.bf16.msra.mxu1 %v2529_v50  ;;  %v2113_v62 = vpop.f32.mrb[130].mxu0  ;;  %v2433_v3 = vadd.f32 %v2302_v45, %v6003_v61  ;;  %v2432_v36 = vadd.f32 %v2111_v33, %v6004_v49 }
 0x4e6   :  { %v2435_v59 = vadd.f32 %v2113_v62, %v6002_v42  ;;  %v2306_v22 = vpop.f32.mrb[130].mxu1  ;;  %v2115_v18 = vpop.f32.mrb[131].mxu0  ;;  %v2434_v29 = vadd.f32 %v2304_v24, %v6007_v12 }
 0x4e7   :  { %v2437_v34 = vadd.f32 %v2306_v22, %v6005_v19  ;;  %v2436_v16 = vadd.f32 %v2115_v18, %v6006_v9  ;;  %v2308_v39 = vpop.f32.mrb[131].mxu1 }
 0x4e8   :  { %v2531_v7 = vpack.c.bf16 %v2435_v59, %v2431_v27  ;;  %v2438_v48 = vadd.f32 %v2308_v39, %v6008_v55 }
 0x4e9   :  { %v2533_v2 = vpack.c.bf16 %v2437_v34, %v2433_v3  ;;  %v2532_v44 = vpack.c.bf16 %v2436_v16, %v2432_v36 }
 0x4ea   :  { %v2534_v1 = vpack.c.bf16 %v2438_v48, %v2434_v29 }
 0x4eb   :  { %2699 = vmatprep.subr.bf16.mxu0 %v2532_v44 }
 0x4ec   :  { %2740 = vmatprep.subr.bf16.mxu1 %v2534_v1  ;;  %2700 = vmatpush1.bf16.msra.mxu0 %v2531_v7 }
 0x4ed   :  { %2741 = vmatpush1.bf16.msra.mxu1 %v2533_v2 }
 0x4ef   :  { %2702 = vmatmul.mubr.bf16.vlgmr.msra.gmra.mrb[132].mxu0 %v2645_v40 }
 0x4f0   :  { %2743 = vmatmul.mubr.bf16.vlgmr.msra.gmra.mrb[132].mxu1 %v2645_v40 }
 0x5c2   :  { %v2703_v4 = vpop.f32.mrb[132].mxu0 }
 0x5c3   :  { %v2704_v41 = vadd.f32 %v2703_v4, %v2539_v58  ;;  %v2744_v0 = vpop.f32.mrb[132].mxu1  ;;  %v2705_v63 = vpop.f32.mrb[133].mxu0 }
 0x5c4   :  { %v2745_v23 = vadd.f32 %v2744_v0, %v2539_v58  ;;  %v2706_v54 = vadd.f32 %v2705_v63, %v2539_v58  ;;  %v2746_v57 = vpop.f32.mrb[133].mxu1  ;;  %v2707_v30 = vpop.f32.mrb[134].mxu0 }
 0x5c5   :  { %2751 = vst [vmem:[%s5518_s12] sm:$0xff] %v2704_v41  ;;  %v2761_v20 = vmul.f32 %v2759_v51, %v2704_v41  ;;  %v2747_v46 = vadd.f32 %v2746_v57, %v2539_v58  ;;  %v2748_v28 = vpop.f32.mrb[134].mxu1  ;;  %v2708_v32 = vpop.f32.mrb[135].mxu0 }
 0x5c6   :  { %2753 = vst [vmem:[%s5518_s12 + $0x10] sm:$0xff] %v2745_v23  ;;  %v2763_v60 = vmul.f32 %v2759_v51, %v2745_v23  ;;  %2752 = vst [vmem:[%s5518_s12 + $0x8] sm:$0xff] %v2706_v54  ;;  %v2762_v38 = vmul.f32 %v2759_v51, %v2706_v54  ;;  %v2749_v15 = vpop.f32.mrb[135].mxu1 }
 0x5c7   :  { %v2765_v17 = vsub.f32 %v3454_v11, %v2761_v20  ;;  %2754 = vst [vmem:[%s5518_s12 + $0x18] sm:$0xff] %v2747_v46  ;;  %v2764_v31 = vmul.f32 %v2759_v51, %v2747_v46 }
 0x5c8   :  { %v2767_v25 = vsub.f32 %v3455_v56, %v2763_v60  ;;  %v2766_v6 = vsub.f32 %v3456_v26, %v2762_v38 }
 0x5c9   :  { %v2775_v52 = vmul.f32 %v2773_v53, %v2765_v17  ;;  %v2768_v37 = vsub.f32 %v3457_v47, %v2764_v31 }
 0x5ca   :  { %v2777_v13 = vmul.f32 %v2773_v53, %v2767_v25  ;;  %v2776_v10 = vmul.f32 %v2773_v53, %v2766_v6 }
 0x5cb   :  { %2779 = vst [vmem:[%s5519_s13] sm:$0xff] %v2775_v52  ;;  %v2778_v21 = vmul.f32 %v2773_v53, %v2768_v37 }
 0x5cc   :  { %2781 = vst [vmem:[%s5519_s13 + $0x10] sm:$0xff] %v2777_v13  ;;  %2780 = vst [vmem:[%s5519_s13 + $0x8] sm:$0xff] %v2776_v10 }
 0x5cd   :  { %2782 = vst [vmem:[%s5519_s13 + $0x18] sm:$0xff] %v2778_v21 }

</bundles_post_ra>
